<compile_context>
chip_gen: v6e
topology: v6e:2x2x1
jax: 0.10.0
libtpu: 0.0.40
codegen_flags: <defaults>
</compile_context>

<pallas_src>
import jax
import jax.numpy as jnp
from jax import lax
from jax.experimental import pallas as pl
from jax.experimental.pallas import tpu as pltpu

_EPS = 1e-5


def _down_kernel(x_ref, w1_ref, p1_ref, w2_ref, p2_ref, o_ref, pad1, pad2):
    # x_ref : (N, H, Wp, 2*Cin)   -- width column-pairs folded into lanes
    # w1_ref: (9*Cin, Cmid)       -- tap-major conv-1 weights
    # p1_ref: (3, Cmid)           -- rows = [conv1 bias, bn1 gamma, bn1 beta]
    # w2_ref: (Cout, 9*Cmid)      -- pre-transposed tap-major conv-2 weights
    # p2_ref: (Cout, 3)           -- cols = [conv2 bias, bn2 gamma, bn2 beta]
    # o_ref : (Cout, N*Hp*Wp)     -- lane-dense output slab
    N, H, Wp, Cin2 = x_ref.shape
    Cin = Cin2 // 2
    Hp = H // 2
    Cmid = w1_ref.shape[-1]
    Cout = w2_ref.shape[0]
    M = N * Hp * Wp

    # ---------------- MaxPool2d(2): two vector maxes, one store ----------------
    x = x_ref[...]                                                 # (N, H, Wp, 2*Cin)
    colmax = jnp.maximum(x[..., :Cin], x[..., Cin:])               # (N, H, Wp, Cin)
    pooled = jnp.max(colmax.reshape(N, Hp, 2, Wp, Cin), axis=2)    # (N, Hp, Wp, Cin)

    def zero_halo(pad_ref):
        n, hp2, wp2, c = pad_ref.shape
        pad_ref[:, 0:1, :, :] = jnp.zeros((n, 1, wp2, c), jnp.float32)
        pad_ref[:, hp2 - 1:hp2, :, :] = jnp.zeros((n, 1, wp2, c), jnp.float32)
        pad_ref[:, 1:hp2 - 1, 0:1, :] = jnp.zeros((n, hp2 - 2, 1, c), jnp.float32)
        pad_ref[:, 1:hp2 - 1, wp2 - 1:wp2, :] = jnp.zeros((n, hp2 - 2, 1, c), jnp.float32)

    zero_halo(pad1)
    pad1[:, 1:1 + Hp, 1:1 + Wp, :] = pooled

    # ------- 3x3 "same" conv: 9 taps, each a flattened-M MXU matmul -------
    # NOTE: cast patch / weight tap to bfloat16 (keep f32 accumulation) at
    # production sizes on v6e/v7x; kept f32 here for a tight small-shape check.
    def conv3x3_rows(pad_ref, w_ref, cin, cout):
        # -> (M, cout) : (M, cin) x (cin, cout) per tap
        acc = jnp.zeros((M, cout), jnp.float32)
        for dy in range(3):
            for dx in range(3):
                tap = dy * 3 + dx
                patch = pad_ref[:, dy:dy + Hp, dx:dx + Wp, :].reshape(M, cin)
                acc = acc + lax.dot_general(
                    patch, w_ref[tap * cin:(tap + 1) * cin, :],
                    dimension_numbers=(((1,), (0,)), ((), ())),
                    preferred_element_type=jnp.float32)
        return acc

    def conv3x3_cols(pad_ref, wT_ref, cin, cout):
        # -> (cout, M) : (cout, cin) x (M, cin)^T per tap (trans-B matmul),
        # so the final output store is lane-dense without any explicit transpose.
        acc = jnp.zeros((cout, M), jnp.float32)
        for dy in range(3):
            for dx in range(3):
                tap = dy * 3 + dx
                patch = pad_ref[:, dy:dy + Hp, dx:dx + Wp, :].reshape(M, cin)
                acc = acc + lax.dot_general(
                    wT_ref[:, tap * cin:(tap + 1) * cin], patch,
                    dimension_numbers=(((1,), (1,)), ((), ())),
                    preferred_element_type=jnp.float32)
        return acc

    # ------- training-mode BatchNorm2d (+conv bias) + ReLU, flat frames -------
    def bn_relu_rows(y, p_ref):          # y: (M, C), p_ref: (3, C)
        y = y + p_ref[0:1, :]
        mean = jnp.mean(y, axis=0, keepdims=True)
        var = jnp.mean((y - mean) ** 2, axis=0, keepdims=True)     # biased var
        y = (y - mean) * lax.rsqrt(var + _EPS) * p_ref[1:2, :] + p_ref[2:3, :]
        return jnp.maximum(y, 0.0)

    def bn_relu_cols(y, p_ref):          # y: (C, M), p_ref: (C, 3)
        y = y + p_ref[:, 0:1]
        mean = jnp.mean(y, axis=1, keepdims=True)
        var = jnp.mean((y - mean) ** 2, axis=1, keepdims=True)     # biased var
        y = (y - mean) * lax.rsqrt(var + _EPS) * p_ref[:, 1:2] + p_ref[:, 2:3]
        return jnp.maximum(y, 0.0)

    # conv1 -> bn1 -> relu, written straight into the padded conv-2 input
    a1 = bn_relu_rows(conv3x3_rows(pad1, w1_ref, Cin, Cmid), p1_ref)   # (M, Cmid)
    zero_halo(pad2)
    pad2[:, 1:1 + Hp, 1:1 + Wp, :] = a1.reshape(N, Hp, Wp, Cmid)

    # conv2 -> bn2 -> relu, written straight to the lane-dense output slab
    o_ref[...] = bn_relu_cols(conv3x3_cols(pad2, w2_ref, Cmid, Cout), p2_ref)


@jax.jit
def down_pallas(x_nchw, params):
    x = jnp.transpose(x_nchw, (0, 2, 3, 1)).astype(jnp.float32)    # NCHW -> NHWC
    N, H, W, Cin = x.shape
    Hp, Wp = H // 2, W // 2

    w1 = params["w1"].astype(jnp.float32).reshape(9 * Cin, -1)     # (9*Cin, Cmid)
    Cmid = w1.shape[-1]
    w2 = params["w2"].astype(jnp.float32).reshape(9 * Cmid, -1)    # (9*Cmid, Cout)
    Cout = w2.shape[-1]
    w2T = w2.T                                                     # (Cout, 9*Cmid)

    p1 = jnp.concatenate(
        [params["b1"].reshape(1, Cmid), params["g1"].reshape(1, Cmid),
         params["be1"].reshape(1, Cmid)], axis=0).astype(jnp.float32)       # (3, Cmid)
    p2 = jnp.concatenate(
        [params["b2"].reshape(Cout, 1), params["g2"].reshape(Cout, 1),
         params["be2"].reshape(Cout, 1)], axis=1).astype(jnp.float32)       # (Cout, 3)

    # Fold width column pairs into the channel (lane) dim so the in-kernel
    # maxpool is a contiguous lane-half max (this reshape is free, done by XLA).
    x2 = x.reshape(N, H, Wp, 2 * Cin)

    def full(shape):
        return pl.BlockSpec(shape, lambda i: (0,) * len(shape))

    out_flat = pl.pallas_call(
        _down_kernel,
        out_shape=jax.ShapeDtypeStruct((Cout, N * Hp * Wp), jnp.float32),
        grid=(1,),
        in_specs=[full(x2.shape), full(w1.shape), full(p1.shape),
                  full(w2T.shape), full(p2.shape)],
        out_specs=full((Cout, N * Hp * Wp)),
        scratch_shapes=[
            pltpu.VMEM((N, Hp + 2, Wp + 2, Cin), jnp.float32),    # padded pooled input
            pltpu.VMEM((N, Hp + 2, Wp + 2, Cmid), jnp.float32),   # padded conv-2 input
        ],
        compiler_params=pltpu.CompilerParams(dimension_semantics=("arbitrary",)),
    )(x2, w1, p1, w2T, p2)

    # (Cout, N*Hp*Wp) lane-dense slab -> NCHW
    return out_flat.reshape(Cout, N, Hp, Wp).transpose(1, 0, 2, 3)


def down_ref(x_nchw, params):
    """Pure-JAX reference mirroring the PyTorch forward (training-mode BN)."""
    x = jnp.transpose(x_nchw, (0, 2, 3, 1)).astype(jnp.float32)
    init = jnp.array(-jnp.inf, dtype=jnp.float32)
    x = lax.reduce_window(x, init, lax.max, (1, 2, 2, 1), (1, 2, 2, 1), "VALID")

    def conv_bn_relu(v, w, b, g, be):
        y = lax.conv_general_dilated(
            v, w, window_strides=(1, 1), padding="SAME",
            dimension_numbers=("NHWC", "HWIO", "NHWC")) + b.reshape(1, 1, 1, -1)
        m = jnp.mean(y, axis=(0, 1, 2), keepdims=True)
        var = jnp.mean((y - m) ** 2, axis=(0, 1, 2), keepdims=True)
        y = (y - m) / jnp.sqrt(var + _EPS) * g.reshape(1, 1, 1, -1) + be.reshape(1, 1, 1, -1)
        return jnp.maximum(y, 0.0)

    v = conv_bn_relu(x, params["w1"], params["b1"], params["g1"], params["be1"])
    v = conv_bn_relu(v, params["w2"], params["b2"], params["g2"], params["be2"])
    return jnp.transpose(v, (0, 3, 1, 2))


if __name__ == "__main__":
    N, Cin, H, W = 2, 4, 16, 16        # Down(in_channels=4, out_channels=8)
    Cmid = Cout = 8
    ks = jax.random.split(jax.random.PRNGKey(0), 9)
    x = jax.random.normal(ks[0], (N, Cin, H, W), jnp.float32)      # NCHW like PyTorch
    params = {
        "w1": 0.1 * jax.random.normal(ks[1], (3, 3, Cin, Cmid), jnp.float32),   # HWIO
        "b1": 0.1 * jax.random.normal(ks[2], (1, Cmid), jnp.float32),
        "g1": 1.0 + 0.1 * jax.random.normal(ks[3], (1, Cmid), jnp.float32),
        "be1": 0.1 * jax.random.normal(ks[4], (1, Cmid), jnp.float32),
        "w2": 0.1 * jax.random.normal(ks[5], (3, 3, Cmid, Cout), jnp.float32),  # HWIO
        "b2": 0.1 * jax.random.normal(ks[6], (1, Cout), jnp.float32),
        "g2": 1.0 + 0.1 * jax.random.normal(ks[7], (1, Cout), jnp.float32),
        "be2": 0.1 * jax.random.normal(ks[8], (1, Cout), jnp.float32),
    }

    out = jax.block_until_ready(down_pallas(x, params))
    ref = down_ref(x, params)
    assert out.shape == (N, Cout, H // 2, W // 2)
    assert jnp.allclose(out, ref, atol=2e-3, rtol=2e-3), "mismatch vs reference"
    print("KERNEL_OK")
</pallas_src>

<mosaic_0001>
module attributes {stable_mosaic.version = 11 : i64} {
  func.func @_down_kernel(%arg0: i32, %arg1: memref<2x16x8x8xf32, #tpu.memory_space<vmem>>, %arg2: memref<36x8xf32, #tpu.memory_space<vmem>>, %arg3: memref<3x8xf32, #tpu.memory_space<vmem>>, %arg4: memref<8x72xf32, #tpu.memory_space<vmem>>, %arg5: memref<8x3xf32, #tpu.memory_space<vmem>>, %arg6: memref<8x128xf32, #tpu.memory_space<vmem>>, %arg7: memref<2x10x10x4xf32, #tpu.memory_space<vmem>>, %arg8: memref<2x10x10x8xf32, #tpu.memory_space<vmem>>) attributes {dimension_semantics = [#tpu.dimension_semantics<arbitrary>], iteration_bounds = array<i64: 1>, scalar_prefetch = 0 : i64, scratch_operands = 2 : i64, tpu.core_type = #tpu.core_type<tc>, window_params = [{pipeline_mode = #tpu.pipeline_mode<synchronous>, transform_indices = @transform_0, window_bounds = array<i64: 2, 16, 8, 8>}, {pipeline_mode = #tpu.pipeline_mode<synchronous>, transform_indices = @transform_1, window_bounds = array<i64: 36, 8>}, {pipeline_mode = #tpu.pipeline_mode<synchronous>, transform_indices = @transform_2, window_bounds = array<i64: 3, 8>}, {pipeline_mode = #tpu.pipeline_mode<synchronous>, transform_indices = @transform_3, window_bounds = array<i64: 8, 72>}, {pipeline_mode = #tpu.pipeline_mode<synchronous>, transform_indices = @transform_4, window_bounds = array<i64: 8, 3>}, {pipeline_mode = #tpu.pipeline_mode<synchronous>, transform_indices = @transform_5, window_bounds = array<i64: 8, 128>}]} {
    %c0 = arith.constant 0 : index
    %c0_0 = arith.constant 0 : index
    %c0_1 = arith.constant 0 : index
    %c0_2 = arith.constant 0 : index
    %0 = vector.load %arg1[%c0, %c0_0, %c0_1, %c0_2] : memref<2x16x8x8xf32, #tpu.memory_space<vmem>>, vector<2x16x8x8xf32>
    %1 = vector.extract_strided_slice %0 {offsets = [0, 0, 0, 0], sizes = [2, 16, 8, 4], strides = [1, 1, 1, 1]} : vector<2x16x8x8xf32> to vector<2x16x8x4xf32>
    %2 = vector.extract_strided_slice %0 {offsets = [0, 0, 0, 4], sizes = [2, 16, 8, 4], strides = [1, 1, 1, 1]} : vector<2x16x8x8xf32> to vector<2x16x8x4xf32>
    %3 = arith.maximumf %1, %2 : vector<2x16x8x4xf32>
    %4 = vector.shape_cast %3 : vector<2x16x8x4xf32> to vector<2x8x2x8x4xf32>
    %cst = arith.constant dense<0xFF800000> : vector<2x8x8x4xf32>
    %5 = vector.multi_reduction <maximumf>, %4, %cst [2] : vector<2x8x2x8x4xf32> to vector<2x8x8x4xf32>
    %cst_3 = arith.constant 0.000000e+00 : f32
    %6 = vector.broadcast %cst_3 : f32 to vector<2x1x10x4xf32>
    %c0_4 = arith.constant 0 : index
    %c0_5 = arith.constant 0 : index
    %c0_6 = arith.constant 0 : index
    %c0_7 = arith.constant 0 : index
    %7 = vector.load %arg7[%c0_4, %c0_5, %c0_6, %c0_7] : memref<2x10x10x4xf32, #tpu.memory_space<vmem>>, vector<2x1x10x4xf32>
    tpu.vector_store %arg7[%c0_4, %c0_5, %c0_6, %c0_7], %6 {strides = array<i32>} : memref<2x10x10x4xf32, #tpu.memory_space<vmem>>, vector<2x1x10x4xf32>,
    %cst_8 = arith.constant 0.000000e+00 : f32
    %8 = vector.broadcast %cst_8 : f32 to vector<2x1x10x4xf32>
    %c0_9 = arith.constant 0 : index
    %c9 = arith.constant 9 : index
    %c0_10 = arith.constant 0 : index
    %c0_11 = arith.constant 0 : index
    %9 = vector.load %arg7[%c0_9, %c9, %c0_10, %c0_11] : memref<2x10x10x4xf32, #tpu.memory_space<vmem>>, vector<2x1x10x4xf32>
    tpu.vector_store %arg7[%c0_9, %c9, %c0_10, %c0_11], %8 {strides = array<i32>} : memref<2x10x10x4xf32, #tpu.memory_space<vmem>>, vector<2x1x10x4xf32>,
    %cst_12 = arith.constant 0.000000e+00 : f32
    %10 = vector.broadcast %cst_12 : f32 to vector<2x8x1x4xf32>
    %c0_13 = arith.constant 0 : index
    %c1 = arith.constant 1 : index
    %c0_14 = arith.constant 0 : index
    %c0_15 = arith.constant 0 : index
    %11 = vector.load %arg7[%c0_13, %c1, %c0_14, %c0_15] : memref<2x10x10x4xf32, #tpu.memory_space<vmem>>, vector<2x8x1x4xf32>
    tpu.vector_store %arg7[%c0_13, %c1, %c0_14, %c0_15], %10 {strides = array<i32>} : memref<2x10x10x4xf32, #tpu.memory_space<vmem>>, vector<2x8x1x4xf32>,
    %cst_16 = arith.constant 0.000000e+00 : f32
    %12 = vector.broadcast %cst_16 : f32 to vector<2x8x1x4xf32>
    %c0_17 = arith.constant 0 : index
    %c1_18 = arith.constant 1 : index
    %c9_19 = arith.constant 9 : index
    %c0_20 = arith.constant 0 : index
    %13 = vector.load %arg7[%c0_17, %c1_18, %c9_19, %c0_20] : memref<2x10x10x4xf32, #tpu.memory_space<vmem>>, vector<2x8x1x4xf32>
    tpu.vector_store %arg7[%c0_17, %c1_18, %c9_19, %c0_20], %12 {strides = array<i32>} : memref<2x10x10x4xf32, #tpu.memory_space<vmem>>, vector<2x8x1x4xf32>,
    %c0_21 = arith.constant 0 : index
    %c1_22 = arith.constant 1 : index
    %c1_23 = arith.constant 1 : index
    %c0_24 = arith.constant 0 : index
    %14 = vector.load %arg7[%c0_21, %c1_22, %c1_23, %c0_24] : memref<2x10x10x4xf32, #tpu.memory_space<vmem>>, vector<2x8x8x4xf32>
    tpu.vector_store %arg7[%c0_21, %c1_22, %c1_23, %c0_24], %5 {strides = array<i32>} : memref<2x10x10x4xf32, #tpu.memory_space<vmem>>, vector<2x8x8x4xf32>,
    %cst_25 = arith.constant 0.000000e+00 : f32
    %15 = vector.broadcast %cst_25 : f32 to vector<128x8xf32>
    %c0_26 = arith.constant 0 : index
    %c0_27 = arith.constant 0 : index
    %c0_28 = arith.constant 0 : index
    %c0_29 = arith.constant 0 : index
    %16 = vector.load %arg7[%c0_26, %c0_27, %c0_28, %c0_29] : memref<2x10x10x4xf32, #tpu.memory_space<vmem>>, vector<2x8x8x4xf32>
    %17 = vector.shape_cast %16 : vector<2x8x8x4xf32> to vector<128x4xf32>
    %c0_30 = arith.constant 0 : index
    %c0_31 = arith.constant 0 : index
    %18 = vector.load %arg2[%c0_30, %c0_31] : memref<36x8xf32, #tpu.memory_space<vmem>>, vector<4x8xf32>
    %cst_32 = arith.constant dense<0.000000e+00> : vector<128x8xf32>
    %19 = tpu.matmul %17, %18, %cst_32 {dimension_numbers = #tpu.dot_dimension_numbers<[1], [0], [0], [1], [0, 0, 1, 1], [], []>} : vector<128x4xf32>, vector<4x8xf32>, vector<128x8xf32> -> vector<128x8xf32>
    %20 = arith.addf %15, %19 : vector<128x8xf32>
    %c0_33 = arith.constant 0 : index
    %c0_34 = arith.constant 0 : index
    %c1_35 = arith.constant 1 : index
    %c0_36 = arith.constant 0 : index
    %21 = vector.load %arg7[%c0_33, %c0_34, %c1_35, %c0_36] : memref<2x10x10x4xf32, #tpu.memory_space<vmem>>, vector<2x8x8x4xf32>
    %22 = vector.shape_cast %21 : vector<2x8x8x4xf32> to vector<128x4xf32>
    %c4 = arith.constant 4 : index
    %c0_37 = arith.constant 0 : index
    %23 = vector.load %arg2[%c4, %c0_37] : memref<36x8xf32, #tpu.memory_space<vmem>>, vector<4x8xf32>
    %cst_38 = arith.constant dense<0.000000e+00> : vector<128x8xf32>
    %24 = tpu.matmul %22, %23, %cst_38 {dimension_numbers = #tpu.dot_dimension_numbers<[1], [0], [0], [1], [0, 0, 1, 1], [], []>} : vector<128x4xf32>, vector<4x8xf32>, vector<128x8xf32> -> vector<128x8xf32>
    %25 = arith.addf %20, %24 : vector<128x8xf32>
    %c0_39 = arith.constant 0 : index
    %c0_40 = arith.constant 0 : index
    %c2 = arith.constant 2 : index
    %c0_41 = arith.constant 0 : index
    %26 = vector.load %arg7[%c0_39, %c0_40, %c2, %c0_41] : memref<2x10x10x4xf32, #tpu.memory_space<vmem>>, vector<2x8x8x4xf32>
    %27 = vector.shape_cast %26 : vector<2x8x8x4xf32> to vector<128x4xf32>
    %c8 = arith.constant 8 : index
    %c0_42 = arith.constant 0 : index
    %28 = vector.load %arg2[%c8, %c0_42] : memref<36x8xf32, #tpu.memory_space<vmem>>, vector<4x8xf32>
    %cst_43 = arith.constant dense<0.000000e+00> : vector<128x8xf32>
    %29 = tpu.matmul %27, %28, %cst_43 {dimension_numbers = #tpu.dot_dimension_numbers<[1], [0], [0], [1], [0, 0, 1, 1], [], []>} : vector<128x4xf32>, vector<4x8xf32>, vector<128x8xf32> -> vector<128x8xf32>
    %30 = arith.addf %25, %29 : vector<128x8xf32>
    %c0_44 = arith.constant 0 : index
    %c1_45 = arith.constant 1 : index
    %c0_46 = arith.constant 0 : index
    %c0_47 = arith.constant 0 : index
    %31 = vector.load %arg7[%c0_44, %c1_45, %c0_46, %c0_47] : memref<2x10x10x4xf32, #tpu.memory_space<vmem>>, vector<2x8x8x4xf32>
    %32 = vector.shape_cast %31 : vector<2x8x8x4xf32> to vector<128x4xf32>
    %c12 = arith.constant 12 : index
    %c0_48 = arith.constant 0 : index
    %33 = vector.load %arg2[%c12, %c0_48] : memref<36x8xf32, #tpu.memory_space<vmem>>, vector<4x8xf32>
    %cst_49 = arith.constant dense<0.000000e+00> : vector<128x8xf32>
    %34 = tpu.matmul %32, %33, %cst_49 {dimension_numbers = #tpu.dot_dimension_numbers<[1], [0], [0], [1], [0, 0, 1, 1], [], []>} : vector<128x4xf32>, vector<4x8xf32>, vector<128x8xf32> -> vector<128x8xf32>
    %35 = arith.addf %30, %34 : vector<128x8xf32>
    %c0_50 = arith.constant 0 : index
    %c1_51 = arith.constant 1 : index
    %c1_52 = arith.constant 1 : index
    %c0_53 = arith.constant 0 : index
    %36 = vector.load %arg7[%c0_50, %c1_51, %c1_52, %c0_53] : memref<2x10x10x4xf32, #tpu.memory_space<vmem>>, vector<2x8x8x4xf32>
    %37 = vector.shape_cast %36 : vector<2x8x8x4xf32> to vector<128x4xf32>
    %c16 = arith.constant 16 : index
    %c0_54 = arith.constant 0 : index
    %38 = vector.load %arg2[%c16, %c0_54] : memref<36x8xf32, #tpu.memory_space<vmem>>, vector<4x8xf32>
    %cst_55 = arith.constant dense<0.000000e+00> : vector<128x8xf32>
    %39 = tpu.matmul %37, %38, %cst_55 {dimension_numbers = #tpu.dot_dimension_numbers<[1], [0], [0], [1], [0, 0, 1, 1], [], []>} : vector<128x4xf32>, vector<4x8xf32>, vector<128x8xf32> -> vector<128x8xf32>
    %40 = arith.addf %35, %39 : vector<128x8xf32>
    %c0_56 = arith.constant 0 : index
    %c1_57 = arith.constant 1 : index
    %c2_58 = arith.constant 2 : index
    %c0_59 = arith.constant 0 : index
    %41 = vector.load %arg7[%c0_56, %c1_57, %c2_58, %c0_59] : memref<2x10x10x4xf32, #tpu.memory_space<vmem>>, vector<2x8x8x4xf32>
    %42 = vector.shape_cast %41 : vector<2x8x8x4xf32> to vector<128x4xf32>
    %c20 = arith.constant 20 : index
    %c0_60 = arith.constant 0 : index
    %43 = vector.load %arg2[%c20, %c0_60] : memref<36x8xf32, #tpu.memory_space<vmem>>, vector<4x8xf32>
    %cst_61 = arith.constant dense<0.000000e+00> : vector<128x8xf32>
    %44 = tpu.matmul %42, %43, %cst_61 {dimension_numbers = #tpu.dot_dimension_numbers<[1], [0], [0], [1], [0, 0, 1, 1], [], []>} : vector<128x4xf32>, vector<4x8xf32>, vector<128x8xf32> -> vector<128x8xf32>
    %45 = arith.addf %40, %44 : vector<128x8xf32>
    %c0_62 = arith.constant 0 : index
    %c2_63 = arith.constant 2 : index
    %c0_64 = arith.constant 0 : index
    %c0_65 = arith.constant 0 : index
    %46 = vector.load %arg7[%c0_62, %c2_63, %c0_64, %c0_65] : memref<2x10x10x4xf32, #tpu.memory_space<vmem>>, vector<2x8x8x4xf32>
    %47 = vector.shape_cast %46 : vector<2x8x8x4xf32> to vector<128x4xf32>
    %c24 = arith.constant 24 : index
    %c0_66 = arith.constant 0 : index
    %48 = vector.load %arg2[%c24, %c0_66] : memref<36x8xf32, #tpu.memory_space<vmem>>, vector<4x8xf32>
    %cst_67 = arith.constant dense<0.000000e+00> : vector<128x8xf32>
    %49 = tpu.matmul %47, %48, %cst_67 {dimension_numbers = #tpu.dot_dimension_numbers<[1], [0], [0], [1], [0, 0, 1, 1], [], []>} : vector<128x4xf32>, vector<4x8xf32>, vector<128x8xf32> -> vector<128x8xf32>
    %50 = arith.addf %45, %49 : vector<128x8xf32>
    %c0_68 = arith.constant 0 : index
    %c2_69 = arith.constant 2 : index
    %c1_70 = arith.constant 1 : index
    %c0_71 = arith.constant 0 : index
    %51 = vector.load %arg7[%c0_68, %c2_69, %c1_70, %c0_71] : memref<2x10x10x4xf32, #tpu.memory_space<vmem>>, vector<2x8x8x4xf32>
    %52 = vector.shape_cast %51 : vector<2x8x8x4xf32> to vector<128x4xf32>
    %c28 = arith.constant 28 : index
    %c0_72 = arith.constant 0 : index
    %53 = vector.load %arg2[%c28, %c0_72] : memref<36x8xf32, #tpu.memory_space<vmem>>, vector<4x8xf32>
    %cst_73 = arith.constant dense<0.000000e+00> : vector<128x8xf32>
    %54 = tpu.matmul %52, %53, %cst_73 {dimension_numbers = #tpu.dot_dimension_numbers<[1], [0], [0], [1], [0, 0, 1, 1], [], []>} : vector<128x4xf32>, vector<4x8xf32>, vector<128x8xf32> -> vector<128x8xf32>
    %55 = arith.addf %50, %54 : vector<128x8xf32>
    %c0_74 = arith.constant 0 : index
    %c2_75 = arith.constant 2 : index
    %c2_76 = arith.constant 2 : index
    %c0_77 = arith.constant 0 : index
    %56 = vector.load %arg7[%c0_74, %c2_75, %c2_76, %c0_77] : memref<2x10x10x4xf32, #tpu.memory_space<vmem>>, vector<2x8x8x4xf32>
    %57 = vector.shape_cast %56 : vector<2x8x8x4xf32> to vector<128x4xf32>
    %c32 = arith.constant 32 : index
    %c0_78 = arith.constant 0 : index
    %58 = vector.load %arg2[%c32, %c0_78] : memref<36x8xf32, #tpu.memory_space<vmem>>, vector<4x8xf32>
    %cst_79 = arith.constant dense<0.000000e+00> : vector<128x8xf32>
    %59 = tpu.matmul %57, %58, %cst_79 {dimension_numbers = #tpu.dot_dimension_numbers<[1], [0], [0], [1], [0, 0, 1, 1], [], []>} : vector<128x4xf32>, vector<4x8xf32>, vector<128x8xf32> -> vector<128x8xf32>
    %60 = arith.addf %55, %59 : vector<128x8xf32>
    %c0_80 = arith.constant 0 : index
    %c0_81 = arith.constant 0 : index
    %61 = vector.load %arg3[%c0_80, %c0_81] : memref<3x8xf32, #tpu.memory_space<vmem>>, vector<1x8xf32>
    %62 = vector.broadcast %61 : vector<1x8xf32> to vector<128x8xf32>
    %63 = arith.addf %60, %62 : vector<128x8xf32>
    %cst_82 = arith.constant dense<0.000000e+00> : vector<8xf32>
    %64 = vector.multi_reduction <add>, %63, %cst_82 [0] : vector<128x8xf32> to vector<8xf32>
    %65 = vector.shape_cast %64 : vector<8xf32> to vector<1x8xf32>
    %cst_83 = arith.constant 1.280000e+02 : f32
    %66 = vector.broadcast %cst_83 : f32 to vector<1x8xf32>
    %67 = arith.divf %65, %66 : vector<1x8xf32>
    %68 = vector.broadcast %67 : vector<1x8xf32> to vector<128x8xf32>
    %69 = arith.subf %63, %68 : vector<128x8xf32>
    %70 = arith.mulf %69, %69 : vector<128x8xf32>
    %cst_84 = arith.constant dense<0.000000e+00> : vector<8xf32>
    %71 = vector.multi_reduction <add>, %70, %cst_84 [0] : vector<128x8xf32> to vector<8xf32>
    %72 = vector.shape_cast %71 : vector<8xf32> to vector<1x8xf32>
    %cst_85 = arith.constant 1.280000e+02 : f32
    %73 = vector.broadcast %cst_85 : f32 to vector<1x8xf32>
    %74 = arith.divf %72, %73 : vector<1x8xf32>
    %75 = vector.broadcast %67 : vector<1x8xf32> to vector<128x8xf32>
    %76 = arith.subf %63, %75 : vector<128x8xf32>
    %cst_86 = arith.constant 9.99999974E-6 : f32
    %77 = vector.broadcast %cst_86 : f32 to vector<1x8xf32>
    %78 = arith.addf %74, %77 : vector<1x8xf32>
    %79 = math.rsqrt %78 : vector<1x8xf32>
    %80 = vector.broadcast %79 : vector<1x8xf32> to vector<128x8xf32>
    %81 = arith.mulf %76, %80 : vector<128x8xf32>
    %c1_87 = arith.constant 1 : index
    %c0_88 = arith.constant 0 : index
    %82 = vector.load %arg3[%c1_87, %c0_88] : memref<3x8xf32, #tpu.memory_space<vmem>>, vector<1x8xf32>
    %83 = vector.broadcast %82 : vector<1x8xf32> to vector<128x8xf32>
    %84 = arith.mulf %81, %83 : vector<128x8xf32>
    %c2_89 = arith.constant 2 : index
    %c0_90 = arith.constant 0 : index
    %85 = vector.load %arg3[%c2_89, %c0_90] : memref<3x8xf32, #tpu.memory_space<vmem>>, vector<1x8xf32>
    %86 = vector.broadcast %85 : vector<1x8xf32> to vector<128x8xf32>
    %87 = arith.addf %84, %86 : vector<128x8xf32>
    %cst_91 = arith.constant 0.000000e+00 : f32
    %88 = vector.broadcast %cst_91 : f32 to vector<128x8xf32>
    %89 = arith.maximumf %87, %88 : vector<128x8xf32>
    %cst_92 = arith.constant 0.000000e+00 : f32
    %90 = vector.broadcast %cst_92 : f32 to vector<2x1x10x8xf32>
    %c0_93 = arith.constant 0 : index
    %c0_94 = arith.constant 0 : index
    %c0_95 = arith.constant 0 : index
    %c0_96 = arith.constant 0 : index
    %91 = vector.load %arg8[%c0_93, %c0_94, %c0_95, %c0_96] : memref<2x10x10x8xf32, #tpu.memory_space<vmem>>, vector<2x1x10x8xf32>
    tpu.vector_store %arg8[%c0_93, %c0_94, %c0_95, %c0_96], %90 {strides = array<i32>} : memref<2x10x10x8xf32, #tpu.memory_space<vmem>>, vector<2x1x10x8xf32>,
    %cst_97 = arith.constant 0.000000e+00 : f32
    %92 = vector.broadcast %cst_97 : f32 to vector<2x1x10x8xf32>
    %c0_98 = arith.constant 0 : index
    %c9_99 = arith.constant 9 : index
    %c0_100 = arith.constant 0 : index
    %c0_101 = arith.constant 0 : index
    %93 = vector.load %arg8[%c0_98, %c9_99, %c0_100, %c0_101] : memref<2x10x10x8xf32, #tpu.memory_space<vmem>>, vector<2x1x10x8xf32>
    tpu.vector_store %arg8[%c0_98, %c9_99, %c0_100, %c0_101], %92 {strides = array<i32>} : memref<2x10x10x8xf32, #tpu.memory_space<vmem>>, vector<2x1x10x8xf32>,
    %cst_102 = arith.constant 0.000000e+00 : f32
    %94 = vector.broadcast %cst_102 : f32 to vector<2x8x1x8xf32>
    %c0_103 = arith.constant 0 : index
    %c1_104 = arith.constant 1 : index
    %c0_105 = arith.constant 0 : index
    %c0_106 = arith.constant 0 : index
    %95 = vector.load %arg8[%c0_103, %c1_104, %c0_105, %c0_106] : memref<2x10x10x8xf32, #tpu.memory_space<vmem>>, vector<2x8x1x8xf32>
    tpu.vector_store %arg8[%c0_103, %c1_104, %c0_105, %c0_106], %94 {strides = array<i32>} : memref<2x10x10x8xf32, #tpu.memory_space<vmem>>, vector<2x8x1x8xf32>,
    %cst_107 = arith.constant 0.000000e+00 : f32
    %96 = vector.broadcast %cst_107 : f32 to vector<2x8x1x8xf32>
    %c0_108 = arith.constant 0 : index
    %c1_109 = arith.constant 1 : index
    %c9_110 = arith.constant 9 : index
    %c0_111 = arith.constant 0 : index
    %97 = vector.load %arg8[%c0_108, %c1_109, %c9_110, %c0_111] : memref<2x10x10x8xf32, #tpu.memory_space<vmem>>, vector<2x8x1x8xf32>
    tpu.vector_store %arg8[%c0_108, %c1_109, %c9_110, %c0_111], %96 {strides = array<i32>} : memref<2x10x10x8xf32, #tpu.memory_space<vmem>>, vector<2x8x1x8xf32>,
    %98 = vector.shape_cast %89 : vector<128x8xf32> to vector<2x8x8x8xf32>
    %c0_112 = arith.constant 0 : index
    %c1_113 = arith.constant 1 : index
    %c1_114 = arith.constant 1 : index
    %c0_115 = arith.constant 0 : index
    %99 = vector.load %arg8[%c0_112, %c1_113, %c1_114, %c0_115] : memref<2x10x10x8xf32, #tpu.memory_space<vmem>>, vector<2x8x8x8xf32>
    tpu.vector_store %arg8[%c0_112, %c1_113, %c1_114, %c0_115], %98 {strides = array<i32>} : memref<2x10x10x8xf32, #tpu.memory_space<vmem>>, vector<2x8x8x8xf32>,
    %cst_116 = arith.constant 0.000000e+00 : f32
    %100 = vector.broadcast %cst_116 : f32 to vector<8x128xf32>
    %c0_117 = arith.constant 0 : index
    %c0_118 = arith.constant 0 : index
    %c0_119 = arith.constant 0 : index
    %c0_120 = arith.constant 0 : index
    %101 = vector.load %arg8[%c0_117, %c0_118, %c0_119, %c0_120] : memref<2x10x10x8xf32, #tpu.memory_space<vmem>>, vector<2x8x8x8xf32>
    %102 = vector.shape_cast %101 : vector<2x8x8x8xf32> to vector<128x8xf32>
    %c0_121 = arith.constant 0 : index
    %c0_122 = arith.constant 0 : index
    %103 = vector.load %arg4[%c0_121, %c0_122] : memref<8x72xf32, #tpu.memory_space<vmem>>, vector<8x8xf32>
    %cst_123 = arith.constant dense<0.000000e+00> : vector<8x128xf32>
    %104 = tpu.matmul %103, %102, %cst_123 {dimension_numbers = #tpu.dot_dimension_numbers<[1], [1], [0], [0], [0, 0, 1, 0], [], []>} : vector<8x8xf32>, vector<128x8xf32>, vector<8x128xf32> -> vector<8x128xf32>
    %105 = arith.addf %100, %104 : vector<8x128xf32>
    %c0_124 = arith.constant 0 : index
    %c0_125 = arith.constant 0 : index
    %c1_126 = arith.constant 1 : index
    %c0_127 = arith.constant 0 : index
    %106 = vector.load %arg8[%c0_124, %c0_125, %c1_126, %c0_127] : memref<2x10x10x8xf32, #tpu.memory_space<vmem>>, vector<2x8x8x8xf32>
    %107 = vector.shape_cast %106 : vector<2x8x8x8xf32> to vector<128x8xf32>
    %c0_128 = arith.constant 0 : index
    %c8_129 = arith.constant 8 : index
    %108 = vector.load %arg4[%c0_128, %c8_129] : memref<8x72xf32, #tpu.memory_space<vmem>>, vector<8x8xf32>
    %cst_130 = arith.constant dense<0.000000e+00> : vector<8x128xf32>
    %109 = tpu.matmul %108, %107, %cst_130 {dimension_numbers = #tpu.dot_dimension_numbers<[1], [1], [0], [0], [0, 0, 1, 0], [], []>} : vector<8x8xf32>, vector<128x8xf32>, vector<8x128xf32> -> vector<8x128xf32>
    %110 = arith.addf %105, %109 : vector<8x128xf32>
    %c0_131 = arith.constant 0 : index
    %c0_132 = arith.constant 0 : index
    %c2_133 = arith.constant 2 : index
    %c0_134 = arith.constant 0 : index
    %111 = vector.load %arg8[%c0_131, %c0_132, %c2_133, %c0_134] : memref<2x10x10x8xf32, #tpu.memory_space<vmem>>, vector<2x8x8x8xf32>
    %112 = vector.shape_cast %111 : vector<2x8x8x8xf32> to vector<128x8xf32>
    %c0_135 = arith.constant 0 : index
    %c16_136 = arith.constant 16 : index
    %113 = vector.load %arg4[%c0_135, %c16_136] : memref<8x72xf32, #tpu.memory_space<vmem>>, vector<8x8xf32>
    %cst_137 = arith.constant dense<0.000000e+00> : vector<8x128xf32>
    %114 = tpu.matmul %113, %112, %cst_137 {dimension_numbers = #tpu.dot_dimension_numbers<[1], [1], [0], [0], [0, 0, 1, 0], [], []>} : vector<8x8xf32>, vector<128x8xf32>, vector<8x128xf32> -> vector<8x128xf32>
    %115 = arith.addf %110, %114 : vector<8x128xf32>
    %c0_138 = arith.constant 0 : index
    %c1_139 = arith.constant 1 : index
    %c0_140 = arith.constant 0 : index
    %c0_141 = arith.constant 0 : index
    %116 = vector.load %arg8[%c0_138, %c1_139, %c0_140, %c0_141] : memref<2x10x10x8xf32, #tpu.memory_space<vmem>>, vector<2x8x8x8xf32>
    %117 = vector.shape_cast %116 : vector<2x8x8x8xf32> to vector<128x8xf32>
    %c0_142 = arith.constant 0 : index
    %c24_143 = arith.constant 24 : index
    %118 = vector.load %arg4[%c0_142, %c24_143] : memref<8x72xf32, #tpu.memory_space<vmem>>, vector<8x8xf32>
    %cst_144 = arith.constant dense<0.000000e+00> : vector<8x128xf32>
    %119 = tpu.matmul %118, %117, %cst_144 {dimension_numbers = #tpu.dot_dimension_numbers<[1], [1], [0], [0], [0, 0, 1, 0], [], []>} : vector<8x8xf32>, vector<128x8xf32>, vector<8x128xf32> -> vector<8x128xf32>
    %120 = arith.addf %115, %119 : vector<8x128xf32>
    %c0_145 = arith.constant 0 : index
    %c1_146 = arith.constant 1 : index
    %c1_147 = arith.constant 1 : index
    %c0_148 = arith.constant 0 : index
    %121 = vector.load %arg8[%c0_145, %c1_146, %c1_147, %c0_148] : memref<2x10x10x8xf32, #tpu.memory_space<vmem>>, vector<2x8x8x8xf32>
    %122 = vector.shape_cast %121 : vector<2x8x8x8xf32> to vector<128x8xf32>
    %c0_149 = arith.constant 0 : index
    %c32_150 = arith.constant 32 : index
    %123 = vector.load %arg4[%c0_149, %c32_150] : memref<8x72xf32, #tpu.memory_space<vmem>>, vector<8x8xf32>
    %cst_151 = arith.constant dense<0.000000e+00> : vector<8x128xf32>
    %124 = tpu.matmul %123, %122, %cst_151 {dimension_numbers = #tpu.dot_dimension_numbers<[1], [1], [0], [0], [0, 0, 1, 0], [], []>} : vector<8x8xf32>, vector<128x8xf32>, vector<8x128xf32> -> vector<8x128xf32>
    %125 = arith.addf %120, %124 : vector<8x128xf32>
    %c0_152 = arith.constant 0 : index
    %c1_153 = arith.constant 1 : index
    %c2_154 = arith.constant 2 : index
    %c0_155 = arith.constant 0 : index
    %126 = vector.load %arg8[%c0_152, %c1_153, %c2_154, %c0_155] : memref<2x10x10x8xf32, #tpu.memory_space<vmem>>, vector<2x8x8x8xf32>
    %127 = vector.shape_cast %126 : vector<2x8x8x8xf32> to vector<128x8xf32>
    %c0_156 = arith.constant 0 : index
    %c40 = arith.constant 40 : index
    %128 = vector.load %arg4[%c0_156, %c40] : memref<8x72xf32, #tpu.memory_space<vmem>>, vector<8x8xf32>
    %cst_157 = arith.constant dense<0.000000e+00> : vector<8x128xf32>
    %129 = tpu.matmul %128, %127, %cst_157 {dimension_numbers = #tpu.dot_dimension_numbers<[1], [1], [0], [0], [0, 0, 1, 0], [], []>} : vector<8x8xf32>, vector<128x8xf32>, vector<8x128xf32> -> vector<8x128xf32>
    %130 = arith.addf %125, %129 : vector<8x128xf32>
    %c0_158 = arith.constant 0 : index
    %c2_159 = arith.constant 2 : index
    %c0_160 = arith.constant 0 : index
    %c0_161 = arith.constant 0 : index
    %131 = vector.load %arg8[%c0_158, %c2_159, %c0_160, %c0_161] : memref<2x10x10x8xf32, #tpu.memory_space<vmem>>, vector<2x8x8x8xf32>
    %132 = vector.shape_cast %131 : vector<2x8x8x8xf32> to vector<128x8xf32>
    %c0_162 = arith.constant 0 : index
    %c48 = arith.constant 48 : index
    %133 = vector.load %arg4[%c0_162, %c48] : memref<8x72xf32, #tpu.memory_space<vmem>>, vector<8x8xf32>
    %cst_163 = arith.constant dense<0.000000e+00> : vector<8x128xf32>
    %134 = tpu.matmul %133, %132, %cst_163 {dimension_numbers = #tpu.dot_dimension_numbers<[1], [1], [0], [0], [0, 0, 1, 0], [], []>} : vector<8x8xf32>, vector<128x8xf32>, vector<8x128xf32> -> vector<8x128xf32>
    %135 = arith.addf %130, %134 : vector<8x128xf32>
    %c0_164 = arith.constant 0 : index
    %c2_165 = arith.constant 2 : index
    %c1_166 = arith.constant 1 : index
    %c0_167 = arith.constant 0 : index
    %136 = vector.load %arg8[%c0_164, %c2_165, %c1_166, %c0_167] : memref<2x10x10x8xf32, #tpu.memory_space<vmem>>, vector<2x8x8x8xf32>
    %137 = vector.shape_cast %136 : vector<2x8x8x8xf32> to vector<128x8xf32>
    %c0_168 = arith.constant 0 : index
    %c56 = arith.constant 56 : index
    %138 = vector.load %arg4[%c0_168, %c56] : memref<8x72xf32, #tpu.memory_space<vmem>>, vector<8x8xf32>
    %cst_169 = arith.constant dense<0.000000e+00> : vector<8x128xf32>
    %139 = tpu.matmul %138, %137, %cst_169 {dimension_numbers = #tpu.dot_dimension_numbers<[1], [1], [0], [0], [0, 0, 1, 0], [], []>} : vector<8x8xf32>, vector<128x8xf32>, vector<8x128xf32> -> vector<8x128xf32>
    %140 = arith.addf %135, %139 : vector<8x128xf32>
    %c0_170 = arith.constant 0 : index
    %c2_171 = arith.constant 2 : index
    %c2_172 = arith.constant 2 : index
    %c0_173 = arith.constant 0 : index
    %141 = vector.load %arg8[%c0_170, %c2_171, %c2_172, %c0_173] : memref<2x10x10x8xf32, #tpu.memory_space<vmem>>, vector<2x8x8x8xf32>
    %142 = vector.shape_cast %141 : vector<2x8x8x8xf32> to vector<128x8xf32>
    %c0_174 = arith.constant 0 : index
    %c64 = arith.constant 64 : index
    %143 = vector.load %arg4[%c0_174, %c64] : memref<8x72xf32, #tpu.memory_space<vmem>>, vector<8x8xf32>
    %cst_175 = arith.constant dense<0.000000e+00> : vector<8x128xf32>
    %144 = tpu.matmul %143, %142, %cst_175 {dimension_numbers = #tpu.dot_dimension_numbers<[1], [1], [0], [0], [0, 0, 1, 0], [], []>} : vector<8x8xf32>, vector<128x8xf32>, vector<8x128xf32> -> vector<8x128xf32>
    %145 = arith.addf %140, %144 : vector<8x128xf32>
    %c0_176 = arith.constant 0 : index
    %c0_177 = arith.constant 0 : index
    %146 = vector.load %arg5[%c0_176, %c0_177] : memref<8x3xf32, #tpu.memory_space<vmem>>, vector<8x1xf32>
    %147 = vector.broadcast %146 : vector<8x1xf32> to vector<8x128xf32>
    %148 = arith.addf %145, %147 : vector<8x128xf32>
    %cst_178 = arith.constant dense<0.000000e+00> : vector<8xf32>
    %149 = vector.multi_reduction <add>, %148, %cst_178 [1] : vector<8x128xf32> to vector<8xf32>
    %150 = vector.shape_cast %149 : vector<8xf32> to vector<8x1xf32>
    %cst_179 = arith.constant 1.280000e+02 : f32
    %151 = vector.broadcast %cst_179 : f32 to vector<8x1xf32>
    %152 = arith.divf %150, %151 : vector<8x1xf32>
    %153 = vector.broadcast %152 : vector<8x1xf32> to vector<8x128xf32>
    %154 = arith.subf %148, %153 : vector<8x128xf32>
    %155 = arith.mulf %154, %154 : vector<8x128xf32>
    %cst_180 = arith.constant dense<0.000000e+00> : vector<8xf32>
    %156 = vector.multi_reduction <add>, %155, %cst_180 [1] : vector<8x128xf32> to vector<8xf32>
    %157 = vector.shape_cast %156 : vector<8xf32> to vector<8x1xf32>
    %cst_181 = arith.constant 1.280000e+02 : f32
    %158 = vector.broadcast %cst_181 : f32 to vector<8x1xf32>
    %159 = arith.divf %157, %158 : vector<8x1xf32>
    %160 = vector.broadcast %152 : vector<8x1xf32> to vector<8x128xf32>
    %161 = arith.subf %148, %160 : vector<8x128xf32>
    %cst_182 = arith.constant 9.99999974E-6 : f32
    %162 = vector.broadcast %cst_182 : f32 to vector<8x1xf32>
    %163 = arith.addf %159, %162 : vector<8x1xf32>
    %164 = math.rsqrt %163 : vector<8x1xf32>
    %165 = vector.broadcast %164 : vector<8x1xf32> to vector<8x128xf32>
    %166 = arith.mulf %161, %165 : vector<8x128xf32>
    %c0_183 = arith.constant 0 : index
    %c1_184 = arith.constant 1 : index
    %167 = vector.load %arg5[%c0_183, %c1_184] : memref<8x3xf32, #tpu.memory_space<vmem>>, vector<8x1xf32>
    %168 = vector.broadcast %167 : vector<8x1xf32> to vector<8x128xf32>
    %169 = arith.mulf %166, %168 : vector<8x128xf32>
    %c0_185 = arith.constant 0 : index
    %c2_186 = arith.constant 2 : index
    %170 = vector.load %arg5[%c0_185, %c2_186] : memref<8x3xf32, #tpu.memory_space<vmem>>, vector<8x1xf32>
    %171 = vector.broadcast %170 : vector<8x1xf32> to vector<8x128xf32>
    %172 = arith.addf %169, %171 : vector<8x128xf32>
    %cst_187 = arith.constant 0.000000e+00 : f32
    %173 = vector.broadcast %cst_187 : f32 to vector<8x128xf32>
    %174 = arith.maximumf %172, %173 : vector<8x128xf32>
    %c0_188 = arith.constant 0 : index
    %c0_189 = arith.constant 0 : index
    %175 = vector.load %arg6[%c0_188, %c0_189] : memref<8x128xf32, #tpu.memory_space<vmem>>, vector<8x128xf32>
    tpu.vector_store %arg6[%c0_188, %c0_189], %174 {strides = array<i32>} : memref<8x128xf32, #tpu.memory_space<vmem>>, vector<8x128xf32>,
    return
  }
  func.func @transform_0(%arg0: i32) -> (i32, i32, i32, i32) {
    %c0_i32 = arith.constant 0 : i32
    %c0_i32_0 = arith.constant 0 : i32
    %c0_i32_1 = arith.constant 0 : i32
    %c0_i32_2 = arith.constant 0 : i32
    %c0_i32_3 = arith.constant 0 : i32
    return %c0_i32, %c0_i32_0, %c0_i32_1, %c0_i32_2 : i32, i32, i32, i32
  }
  func.func @transform_1(%arg0: i32) -> (i32, i32) {
    %c0_i32 = arith.constant 0 : i32
    %c0_i32_0 = arith.constant 0 : i32
    %c0_i32_1 = arith.constant 0 : i32
    return %c0_i32, %c0_i32_0 : i32, i32
  }
  func.func @transform_2(%arg0: i32) -> (i32, i32) {
    %c0_i32 = arith.constant 0 : i32
    %c0_i32_0 = arith.constant 0 : i32
    %c0_i32_1 = arith.constant 0 : i32
    return %c0_i32, %c0_i32_0 : i32, i32
  }
  func.func @transform_3(%arg0: i32) -> (i32, i32) {
    %c0_i32 = arith.constant 0 : i32
    %c0_i32_0 = arith.constant 0 : i32
    %c0_i32_1 = arith.constant 0 : i32
    return %c0_i32, %c0_i32_0 : i32, i32
  }
  func.func @transform_4(%arg0: i32) -> (i32, i32) {
    %c0_i32 = arith.constant 0 : i32
    %c0_i32_0 = arith.constant 0 : i32
    %c0_i32_1 = arith.constant 0 : i32
    return %c0_i32, %c0_i32_0 : i32, i32
  }
  func.func @transform_5(%arg0: i32) -> (i32, i32) {
    %c0_i32 = arith.constant 0 : i32
    %c0_i32_0 = arith.constant 0 : i32
    %c0_i32_1 = arith.constant 0 : i32
    return %c0_i32, %c0_i32_0 : i32, i32
  }
}

</mosaic_0001>

<bundles_post_ra>
// kernel: down_pallas.1
= control target key start
LH: loop header
LB: loop body
LE: loop exit
PB: predicated region body
PF: predicated region fallthrough
CT: control target
= control target key end

     0   :  { %vm212_vm0 = vcmask 31744   ;;  %vm262_vm1 = vcmask 25600   ;;  %vm272_vm2 = vcmask 24576   ;;  %v7052_v2 = vmov 0.0   ;;  %s5092_s22 = smov 124   ;;  %s5093_s28 = smov 120   ;;  %s7046_s0 = inlined_call_operand.vmem [shape: f32[2,16,8,8], index: 0, kind: input, shape index: {}]   ;;  %s7047_s1 = inlined_call_operand.vmem [shape: f32[36,8], index: 1, kind: input, shape index: {}]   ;;  %s7048_s3 = inlined_call_operand.vmem [shape: f32[8,72], index: 3, kind: input, shape index: {}]   ;;  %s7049_s2 = inlined_call_operand.vmem [shape: f32[3,8], index: 2, kind: input, shape index: {}]   ;;  %s7050_s4 = inlined_call_operand.vmem [shape: f32[8,3], index: 4, kind: input, shape index: {}]   ;;  %s7051_s5 = inlined_call_operand.vmem [shape: f32[8,128], index: 5, kind: output, shape index: {}]  }
   0x1   :  { %v5138_v0 = vld [vmem:[%s7046_s0 + $0x10] sm:$0xff]  ;;  %v5143_v1 = vld [vmem:[%s7046_s0] sm:$0xff]  ;;  %261 = vst.msk [vmem:[#allocation2] sm:$0xff] %vm212_vm0, %v7052_v2  ;;  %264 = vst.msk [vmem:[#allocation2 + $0xa0] sm:$0xff] %vm212_vm0, %v7052_v2  ;;  %vm403_vm3 = vcmask 1043456   ;;  %vm2373_vm4 = vcmask 64512  }
   0x2   :  { %263 = vst.msk [vmem:[#allocation2 + $0x8] sm:$0x3] %vm262_vm1, %v7052_v2  ;;  %265 = vst.msk [vmem:[#allocation2 + $0xa8] sm:$0x3] %vm262_vm1, %v7052_v2  ;;  %88 = vrot.lane.b32.xlu1 %v5138_v0, %s5092_s22  ;;  %84 = vrot.lane.b32.xlu0 %v5143_v1, %s5092_s22  ;;  %v5228_v3 = vld [vmem:[%s7046_s0 + $0x18] sm:$0xff]  ;;  %v5233_v4 = vld [vmem:[%s7046_s0 + $0x8] sm:$0xff] }
   0x3   :  { %267 = vst.msk [vmem:[#allocation2 + $0x90] sm:$0xff] %vm212_vm0, %v7052_v2  ;;  %269 = vst.msk [vmem:[#allocation2 + $0x130] sm:$0xff] %vm212_vm0, %v7052_v2  ;;  %v5242_v5 = vld [vmem:[%s7046_s0 + $0x28] sm:$0xff]  ;;  %v5247_v6 = vld [vmem:[%s7046_s0 + $0x20] sm:$0xff]  ;;  %vm2570_vm5 = vcmask 57344   ;;  %s5094_s6 = smov 112  }
   0x4   :  { %268 = vst.msk [vmem:[#allocation2 + $0x98] sm:$0x3] %vm262_vm1, %v7052_v2  ;;  %270 = vst.msk [vmem:[#allocation2 + $0x138] sm:$0x3] %vm262_vm1, %v7052_v2  ;;  %v5256_v8 = vld [vmem:[%s7046_s0 + $0x38] sm:$0xff]  ;;  %v5261_v9 = vld [vmem:[%s7046_s0 + $0x30] sm:$0xff] }
   0x5   :  { %281 = vst.msk [vmem:[#allocation2 + $0xb0] sm:$0x1] %vm272_vm2, %v7052_v2  ;;  %273 = vst.msk [vmem:[#allocation2 + $0x10] sm:$0x1] %vm272_vm2, %v7052_v2  ;;  %v354_v10 = vld [vmem:[%s7047_s1 + $0x4] sm:$0xf] }
   0x6   :  { %274 = vst.msk [vmem:[#allocation2 + $0x20] sm:$0x1] %vm272_vm2, %v7052_v2  ;;  %275 = vst.msk [vmem:[#allocation2 + $0x30] sm:$0x1] %vm272_vm2, %v7052_v2  ;;  %90 = vrot.lane.b32.xlu1 %v5228_v3, %s5092_s22  ;;  %86 = vrot.lane.b32.xlu0 %v5233_v4, %s5092_s22  ;;  %v5275_v11 = vld [vmem:[%s7046_s0 + $0x48] sm:$0xff]  ;;  %v5280_v12 = vld [vmem:[%s7046_s0 + $0x40] sm:$0xff] }
   0x7   :  { %276 = vst.msk [vmem:[#allocation2 + $0x40] sm:$0x1] %vm272_vm2, %v7052_v2  ;;  %277 = vst.msk [vmem:[#allocation2 + $0x50] sm:$0x1] %vm272_vm2, %v7052_v2  ;;  %4518 = vmatprep.subr.msk.mxu0 %vm403_vm3, %v354_v10  ;;  %v5290_v13 = vld [vmem:[%s7046_s0 + $0x58] sm:$0xff]  ;;  %v5295_v14 = vld [vmem:[%s7046_s0 + $0x50] sm:$0xff] }
   0x8   :  { %278 = vst.msk [vmem:[#allocation2 + $0x60] sm:$0x1] %vm272_vm2, %v7052_v2  ;;  %279 = vst.msk [vmem:[#allocation2 + $0x70] sm:$0x1] %vm272_vm2, %v7052_v2  ;;  %4519 = vmatpush3.msk.msra.mxu0 %vm403_vm3, %v354_v10  ;;  %v5304_v15 = vld [vmem:[%s7046_s0 + $0x68] sm:$0xff]  ;;  %v5309_v16 = vld [vmem:[%s7046_s0 + $0x60] sm:$0xff] }
   0x9   :  { %280 = vst.msk [vmem:[#allocation2 + $0x80] sm:$0x1] %vm272_vm2, %v7052_v2  ;;  %282 = vst.msk [vmem:[#allocation2 + $0xc0] sm:$0x1] %vm272_vm2, %v7052_v2  ;;  %v338_v7 = vld [vmem:[#allocation2 + $0x1] sm:$0xff]  ;;  %v5344_v21 = vld [vmem:[%s7046_s0 + $0x98] sm:$0xff] }
   0xa   :  { %283 = vst.msk [vmem:[#allocation2 + $0xd0] sm:$0x1] %vm272_vm2, %v7052_v2  ;;  %284 = vst.msk [vmem:[#allocation2 + $0xe0] sm:$0x1] %vm272_vm2, %v7052_v2  ;;  %94 = vrot.lane.b32.xlu1 %v5242_v5, %s5092_s22  ;;  %92 = vrot.lane.b32.xlu0 %v5247_v6, %s5092_s22  ;;  %v5318_v17 = vld [vmem:[%s7046_s0 + $0x88] sm:$0xff]  ;;  %v5323_v18 = vld [vmem:[%s7046_s0 + $0x80] sm:$0xff] }
   0xb   :  { %285 = vst.msk [vmem:[#allocation2 + $0xf0] sm:$0x1] %vm272_vm2, %v7052_v2  ;;  %286 = vst.msk [vmem:[#allocation2 + $0x100] sm:$0x1] %vm272_vm2, %v7052_v2  ;;  %4520 = vmatprep.mubr.msk.f32.mxu0 %vm212_vm0, %v338_v7  ;;  %v5328_v19 = vld [vmem:[%s7047_s1] sm:$0xf] }
   0xc   :  { %287 = vst.msk [vmem:[#allocation2 + $0x110] sm:$0x1] %vm272_vm2, %v7052_v2  ;;  %288 = vst.msk [vmem:[#allocation2 + $0x120] sm:$0x1] %vm272_vm2, %v7052_v2  ;;  %4544 = vmatprep.subr.msk.mxu0 %vm403_vm3, %v5328_v19  ;;  %5067 = vmatprep.subr.msk.mxu1 %vm403_vm3, %v5328_v19  ;;  %v329_v20 = vld [vmem:[#allocation2 + $0xa0] sm:$0xff]  ;;  %v5349_v22 = vld [vmem:[%s7046_s0 + $0x90] sm:$0xff] }
   0xd   :  { %289 = vst.msk [vmem:[#allocation2 + $0x19] sm:$0x1] %vm272_vm2, %v7052_v2  ;;  %290 = vst.msk [vmem:[#allocation2 + $0x29] sm:$0x1] %vm272_vm2, %v7052_v2  ;;  %5068 = vmatpush3.msk.msra.mxu1 %vm403_vm3, %v5328_v19  ;;  %4558 = vmatprep.mubr.msk.f32.mxu1 %vm212_vm0, %v329_v20  ;;  %v5358_v23 = vld [vmem:[%s7046_s0 + $0xa8] sm:$0xff]  ;;  %v5363_v24 = vld [vmem:[%s7046_s0 + $0xa0] sm:$0xff] }
   0xe   :  { %291 = vst.msk [vmem:[#allocation2 + $0x39] sm:$0x1] %vm272_vm2, %v7052_v2  ;;  %292 = vst.msk [vmem:[#allocation2 + $0x49] sm:$0x1] %vm272_vm2, %v7052_v2  ;;  %98 = vrot.lane.b32.xlu1 %v5256_v8, %s5092_s22  ;;  %96 = vrot.lane.b32.xlu0 %v5261_v9, %s5092_s22  ;;  %v5372_v25 = vld [vmem:[%s7046_s0 + $0xb8] sm:$0xff]  ;;  %v5377_v26 = vld [vmem:[%s7046_s0 + $0xb0] sm:$0xff] }
   0xf   :  { %293 = vst.msk [vmem:[#allocation2 + $0x59] sm:$0x1] %vm272_vm2, %v7052_v2  ;;  %294 = vst.msk [vmem:[#allocation2 + $0x69] sm:$0x1] %vm272_vm2, %v7052_v2  ;;  %v5386_v27 = vld [vmem:[%s7046_s0 + $0xc8] sm:$0xff]  ;;  %v5391_v28 = vld [vmem:[%s7046_s0 + $0xc0] sm:$0xff] }
  0x10   :  { %295 = vst.msk [vmem:[#allocation2 + $0x79] sm:$0x1] %vm272_vm2, %v7052_v2  ;;  %296 = vst.msk [vmem:[#allocation2 + $0x89] sm:$0x1] %vm272_vm2, %v7052_v2  ;;  %v5400_v29 = vld [vmem:[%s7046_s0 + $0xd8] sm:$0xff]  ;;  %v5405_v30 = vld [vmem:[%s7046_s0 + $0xd0] sm:$0xff] }
  0x11   :  { %297 = vst.msk [vmem:[#allocation2 + $0xb9] sm:$0x1] %vm272_vm2, %v7052_v2  ;;  %298 = vst.msk [vmem:[#allocation2 + $0xc9] sm:$0x1] %vm272_vm2, %v7052_v2  ;;  %v5414_v31 = vld [vmem:[%s7046_s0 + $0xe8] sm:$0xff]  ;;  %v5419_v32 = vld [vmem:[%s7046_s0 + $0xe0] sm:$0xff] }
  0x12   :  { %299 = vst.msk [vmem:[#allocation2 + $0xd9] sm:$0x1] %vm272_vm2, %v7052_v2  ;;  %300 = vst.msk [vmem:[#allocation2 + $0xe9] sm:$0x1] %vm272_vm2, %v7052_v2  ;;  %102 = vrot.lane.b32.xlu1 %v5275_v11, %s5092_s22  ;;  %100 = vrot.lane.b32.xlu0 %v5280_v12, %s5092_s22  ;;  %v5428_v33 = vld [vmem:[%s7046_s0 + $0x78] sm:$0xff]  ;;  %v5433_v34 = vld [vmem:[%s7046_s0 + $0x70] sm:$0xff] }
  0x13   :  { %301 = vst.msk [vmem:[#allocation2 + $0xf9] sm:$0x1] %vm272_vm2, %v7052_v2  ;;  %302 = vst.msk [vmem:[#allocation2 + $0x109] sm:$0x1] %vm272_vm2, %v7052_v2  ;;  %v5438_v35 = vld [vmem:[%s7047_s1 + $0xc] sm:$0xf] }
  0x14   :  { %303 = vst.msk [vmem:[#allocation2 + $0x119] sm:$0x1] %vm272_vm2, %v7052_v2  ;;  %304 = vst.msk [vmem:[#allocation2 + $0x129] sm:$0x1] %vm272_vm2, %v7052_v2  ;;  %4596 = vmatprep.subr.msk.mxu1 %vm403_vm3, %v5438_v35  ;;  %v5449_v36 = vld [vmem:[%s7046_s0 + $0xf8] sm:$0xff]  ;;  %v5454_v37 = vld [vmem:[%s7046_s0 + $0xf0] sm:$0xff] }
  0x15   :  { %2559 = vst.msk [vmem:[#allocation3] sm:$0xff] %vm2373_vm4, %v7052_v2  ;;  %2562 = vst.msk [vmem:[#allocation3 + $0xa0] sm:$0xff] %vm2373_vm4, %v7052_v2  ;;  %s5095_s7 = smov 104   ;;  %vm2560_vm6 = vcmask 58368   ;;  %vm5096_vm7 = vmmov 0   ;;  %s5097_s8 = smov 96  }
  0x16   :  { %106 = vrot.lane.b32.xlu1 %v5290_v13, %s5092_s22  ;;  %104 = vrot.lane.b32.xlu0 %v5295_v14, %s5092_s22  ;;  %2565 = vst.msk [vmem:[#allocation3 + $0x90] sm:$0xff] %vm2373_vm4, %v7052_v2  ;;  %2567 = vst.msk [vmem:[#allocation3 + $0x130] sm:$0xff] %vm2373_vm4, %v7052_v2  ;;  %s5098_s9 = smov 88   ;;  %s5100_s14 = smov 72  }
  0x1a   :  { %110 = vrot.lane.b32.xlu1 %v5304_v15, %s5092_s22  ;;  %108 = vrot.lane.b32.xlu0 %v5309_v16, %s5092_s22 }
  0x1e   :  { %118 = vrot.lane.b32.xlu1 %v5318_v17, %s5092_s22  ;;  %116 = vrot.lane.b32.xlu0 %v5323_v18, %s5092_s22 }
  0x22   :  { %122 = vrot.lane.b32.xlu1 %v5344_v21, %s5092_s22  ;;  %120 = vrot.lane.b32.xlu0 %v5349_v22, %s5092_s22 }
  0x26   :  { %126 = vrot.lane.b32.xlu1 %v5358_v23, %s5092_s22  ;;  %124 = vrot.lane.b32.xlu0 %v5363_v24, %s5092_s22 }
  0x2a   :  { %130 = vrot.lane.b32.xlu1 %v5372_v25, %s5092_s22  ;;  %128 = vrot.lane.b32.xlu0 %v5377_v26, %s5092_s22 }
  0x2e   :  { %134 = vrot.lane.b32.xlu1 %v5386_v27, %s5092_s22  ;;  %132 = vrot.lane.b32.xlu0 %v5391_v28, %s5092_s22 }
  0x32   :  { %138 = vrot.lane.b32.xlu1 %v5400_v29, %s5092_s22  ;;  %136 = vrot.lane.b32.xlu0 %v5405_v30, %s5092_s22 }
  0x36   :  { %142 = vrot.lane.b32.xlu1 %v5414_v31, %s5092_s22  ;;  %140 = vrot.lane.b32.xlu0 %v5419_v32, %s5092_s22 }
  0x3a   :  { %114 = vrot.lane.b32.xlu1 %v5428_v33, %s5092_s22  ;;  %112 = vrot.lane.b32.xlu0 %v5433_v34, %s5092_s22 }
  0x3e   :  { %146 = vrot.lane.b32.xlu1 %v5449_v36, %s5092_s22  ;;  %144 = vrot.lane.b32.xlu0 %v5454_v37, %s5092_s22  ;;  %s5101_s22 = smov 64  }
  0x74   :  { %v89_v38 = vpop.permute.xlu1 %88  ;;  %v85_v39 = vpop.permute.xlu0 %84 }
  0x75   :  { %v182_v40 = vmax.f32 %v5138_v0, %v89_v38  ;;  %v180_v41 = vmax.f32 %v5143_v1, %v85_v39 }
  0x77   :  { %v216_v46 = vsel %vm212_vm0, %v182_v40, -inf  ;;  %v213_v47 = vsel %vm212_vm0, %v180_v41, -inf }
  0x78   :  { %v91_v42 = vpop.permute.xlu1 %90  ;;  %v87_v43 = vpop.permute.xlu0 %86 }
  0x79   :  { %v183_v44 = vmax.f32 %v5228_v3, %v91_v42  ;;  %v181_v45 = vmax.f32 %v5233_v4, %v87_v43 }
  0x7b   :  { %v217_v48 = vsel %vm212_vm0, %v183_v44, -inf  ;;  %v214_v49 = vsel %vm212_vm0, %v181_v45, -inf }
  0x7c   :  { %v218_v50 = vmax.f32 %v216_v46, %v217_v48  ;;  %v215_v51 = vmax.f32 %v213_v47, %v214_v49  ;;  %v95_v52 = vpop.permute.xlu1 %94  ;;  %v93_v53 = vpop.permute.xlu0 %92 }
  0x7d   :  { %v185_v54 = vmax.f32 %v5242_v5, %v95_v52  ;;  %v184_v55 = vmax.f32 %v5247_v6, %v93_v53 }
  0x7e   :  { %306 = vst.msk [vmem:[#allocation2 + $0x21] sm:$0xff] %vm212_vm0, %v218_v50  ;;  %305 = vst.msk [vmem:[#allocation2 + $0x11] sm:$0xff] %vm212_vm0, %v215_v51 }
  0x7f   :  { %v220_v56 = vsel %vm212_vm0, %v185_v54, -inf  ;;  %v219_v57 = vsel %vm212_vm0, %v184_v55, -inf }
  0x80   :  { %v221_v58 = vmax.f32 %v219_v57, %v220_v56  ;;  %v99_v59 = vpop.permute.xlu1 %98  ;;  %v97_v60 = vpop.permute.xlu0 %96 }
  0x81   :  { %v187_v61 = vmax.f32 %v5256_v8, %v99_v59  ;;  %v186_v62 = vmax.f32 %v5261_v9, %v97_v60  ;;  %v5488_v8 = vld [vmem:[%s7047_s1 + $0x8] sm:$0xf] }
  0x82   :  { %307 = vst.msk [vmem:[#allocation2 + $0x31] sm:$0xff] %vm212_vm0, %v221_v58 }
  0x83   :  { %v223_v63 = vsel %vm212_vm0, %v187_v61, -inf  ;;  %v222_v0 = vsel %vm212_vm0, %v186_v62, -inf }
  0x84   :  { %v224_v1 = vmax.f32 %v222_v0, %v223_v63  ;;  %v103_v3 = vpop.permute.xlu1 %102  ;;  %v101_v4 = vpop.permute.xlu0 %100  ;;  %v346_v0 = vld [vmem:[#allocation2 + $0xa1] sm:$0xff] }
  0x85   :  { %v189_v5 = vmax.f32 %v5275_v11, %v103_v3  ;;  %v188_v6 = vmax.f32 %v5280_v12, %v101_v4  ;;  %v5481_v7 = vld [vmem:[#allocation2 + $0x11] sm:$0xff]  ;;  %v5483_v10 = vld [vmem:[#allocation2 + $0x21] sm:$0xff] }
  0x86   :  { %308 = vst.msk [vmem:[#allocation2 + $0x41] sm:$0xff] %vm212_vm0, %v224_v1  ;;  %4521 = vmatmul.mubr.msk.f32.vlgmr.msra.gmra.mxu0 %vm212_vm0, %v5481_v7 }
  0x87   :  { %v226_v9 = vsel %vm212_vm0, %v189_v5, -inf  ;;  %v225_v11 = vsel %vm212_vm0, %v188_v6, -inf  ;;  %4523 = vmatprep.mubr.msk.f32.mxu0 %vm212_vm0, %v5483_v10  ;;  %4545 = vmatpush3.msk.msra.mxu0 %vm403_vm3, %v5328_v19 }
  0x88   :  { %v227_v12 = vmax.f32 %v225_v11, %v226_v9  ;;  %v107_v20 = vpop.permute.xlu1 %106  ;;  %v105_v38 = vpop.permute.xlu0 %104  ;;  %4570 = vmatprep.subr.msk.mxu0 %vm403_vm3, %v5488_v8 }
  0x89   :  { %v191_v39 = vmax.f32 %v5290_v13, %v107_v20  ;;  %v190_v40 = vmax.f32 %v5295_v14, %v105_v38  ;;  %v5503_v41 = vld [vmem:[#allocation2 + $0x31] sm:$0xff] }
  0x8a   :  { %309 = vst.msk [vmem:[#allocation2 + $0x51] sm:$0xff] %vm212_vm0, %v227_v12  ;;  %4524 = vmatmul.mubr.msk.f32.gmra.mxu0 %vm212_vm0, %v5503_v41  ;;  %v5556_v20 = vld [vmem:[%s7047_s1 + $0x14] sm:$0xf] }
  0x8b   :  { %v229_v42 = vsel %vm212_vm0, %v191_v39, -inf  ;;  %v228_v19 = vsel %vm212_vm0, %v190_v40, -inf }
  0x8c   :  { %v230_v43 = vmax.f32 %v228_v19, %v229_v42  ;;  %v111_v44 = vpop.permute.xlu1 %110  ;;  %v109_v45 = vpop.permute.xlu0 %108 }
  0x8d   :  { %v193_v46 = vmax.f32 %v5304_v15, %v111_v44  ;;  %v192_v13 = vmax.f32 %v5309_v16, %v109_v45  ;;  %v5512_v47 = vld [vmem:[#allocation2 + $0x41] sm:$0xff] }
  0x8e   :  { %310 = vst.msk [vmem:[#allocation2 + $0x61] sm:$0xff] %vm212_vm0, %v230_v43  ;;  %4526 = vmatprep.mubr.msk.f32.mxu0 %vm212_vm0, %v5512_v47 }
  0x8f   :  { %v232_v14 = vsel %vm212_vm0, %v193_v46, -inf  ;;  %v231_v48 = vsel %vm212_vm0, %v192_v13, -inf }
  0x90   :  { %v233_v49 = vmax.f32 %v231_v48, %v232_v14  ;;  %v119_v50 = vpop.permute.xlu1 %118  ;;  %v117_v51 = vpop.permute.xlu0 %116 }
  0x91   :  { %v197_v52 = vmax.f32 %v5318_v17, %v119_v50  ;;  %v196_v15 = vmax.f32 %v5323_v18, %v117_v51  ;;  %v5521_v53 = vld [vmem:[#allocation2 + $0x51] sm:$0xff] }
  0x92   :  { %311 = vst.msk [vmem:[#allocation2 + $0x71] sm:$0xff] %vm212_vm0, %v233_v49  ;;  %4527 = vmatmul.mubr.msk.f32.gmra.mxu0 %vm212_vm0, %v5521_v53 }
  0x93   :  { %v238_v16 = vsel %vm212_vm0, %v197_v52, -inf  ;;  %v237_v54 = vsel %vm212_vm0, %v196_v15, -inf }
  0x94   :  { %v239_v55 = vmax.f32 %v237_v54, %v238_v16  ;;  %v123_v56 = vpop.permute.xlu1 %122  ;;  %v121_v57 = vpop.permute.xlu0 %120 }
  0x95   :  { %v199_v58 = vmax.f32 %v5344_v21, %v123_v56  ;;  %v198_v17 = vmax.f32 %v5349_v22, %v121_v57  ;;  %v5530_v59 = vld [vmem:[#allocation2 + $0x61] sm:$0xff] }
  0x96   :  { %313 = vst.msk [vmem:[#allocation2 + $0xb1] sm:$0xff] %vm212_vm0, %v239_v55  ;;  %4529 = vmatprep.mubr.msk.f32.mxu0 %vm212_vm0, %v5530_v59 }
  0x97   :  { %v241_v18 = vsel %vm212_vm0, %v199_v58, -inf  ;;  %v240_v60 = vsel %vm212_vm0, %v198_v17, -inf }
  0x98   :  { %v242_v61 = vmax.f32 %v240_v60, %v241_v18  ;;  %v127_v62 = vpop.permute.xlu1 %126  ;;  %v125_v63 = vpop.permute.xlu0 %124 }
  0x99   :  { %v201_v1 = vmax.f32 %v5358_v23, %v127_v62  ;;  %v200_v21 = vmax.f32 %v5363_v24, %v125_v63  ;;  %v5539_v22 = vld [vmem:[#allocation2 + $0x71] sm:$0xff] }
  0x9a   :  { %314 = vst.msk [vmem:[#allocation2 + $0xc1] sm:$0xff] %vm212_vm0, %v242_v61  ;;  %4530 = vmatmul.mubr.msk.f32.gmra.mxu0 %vm212_vm0, %v5539_v22 }
  0x9b   :  { %v244_v3 = vsel %vm212_vm0, %v201_v1, -inf  ;;  %v243_v4 = vsel %vm212_vm0, %v200_v21, -inf  ;;  %4532 = vmatprep.mubr.msk.f32.mxu0 %vm212_vm0, %v346_v0 }
  0x9c   :  { %v245_v5 = vmax.f32 %v243_v4, %v244_v3  ;;  %v131_v6 = vpop.permute.xlu1 %130  ;;  %v129_v9 = vpop.permute.xlu0 %128 }
  0x9d   :  { %v203_v23 = vmax.f32 %v5372_v25, %v131_v6  ;;  %v202_v24 = vmax.f32 %v5377_v26, %v129_v9  ;;  %v5549_v11 = vld [vmem:[#allocation2 + $0xb1] sm:$0xff]  ;;  %v321_v9 = vld [vmem:[#allocation2] sm:$0xff] }
  0x9e   :  { %v5551_v12 = vld [vmem:[#allocation2 + $0xb0] sm:$0xff]  ;;  %315 = vst.msk [vmem:[#allocation2 + $0xd1] sm:$0xff] %vm212_vm0, %v245_v5  ;;  %4533 = vmatmul.mubr.msk.f32.gmra.mxu0 %vm212_vm0, %v5549_v11 }
  0x9f   :  { %4559 = vmatmul.mubr.msk.f32.vlgmr.msra.gmra.mxu1 %vm212_vm0, %v5551_v12  ;;  %v247_v25 = vsel %vm212_vm0, %v203_v23, -inf  ;;  %v246_v26 = vsel %vm212_vm0, %v202_v24, -inf }
  0xa0   :  { %4597 = vmatpush3.msk.msra.mxu1 %vm403_vm3, %v5438_v35  ;;  %v248_v38 = vmax.f32 %v246_v26, %v247_v25  ;;  %v135_v39 = vpop.permute.xlu1 %134  ;;  %v133_v40 = vpop.permute.xlu0 %132  ;;  %v1222_v26 = vld [vmem:[%s7047_s1 + $0x10] sm:$0xf] }
  0xa1   :  { %4648 = vmatprep.subr.msk.mxu1 %vm403_vm3, %v5556_v20  ;;  %v205_v42 = vmax.f32 %v5386_v27, %v135_v39  ;;  %v204_v19 = vmax.f32 %v5391_v28, %v133_v40  ;;  %v5571_v43 = vld [vmem:[#allocation2 + $0xc1] sm:$0xff]  ;;  %v1910_v40 = vld [vmem:[%s7047_s1 + $0x1c] sm:$0xf] }
  0xa2   :  { %v5573_v44 = vld [vmem:[#allocation2 + $0xc0] sm:$0xff]  ;;  %316 = vst.msk [vmem:[#allocation2 + $0xe1] sm:$0xff] %vm212_vm0, %v248_v38  ;;  %4535 = vmatprep.mubr.msk.f32.mxu0 %vm212_vm0, %v5571_v43  ;;  %v5657_v38 = vld [vmem:[#allocation2 + $0x30] sm:$0xff] }
  0xa3   :  { %4561 = vmatprep.mubr.msk.f32.mxu1 %vm212_vm0, %v5573_v44  ;;  %v250_v35 = vsel %vm212_vm0, %v205_v42, -inf  ;;  %v249_v45 = vsel %vm212_vm0, %v204_v19, -inf  ;;  %v5662_v39 = vld [vmem:[#allocation2 + $0x40] sm:$0xff]  ;;  %v5686_v42 = vld [vmem:[#allocation2 + $0x70] sm:$0xff] }
  0xa4   :  { %v251_v46 = vmax.f32 %v249_v45, %v250_v35  ;;  %v139_v27 = vpop.permute.xlu1 %138  ;;  %v137_v13 = vpop.permute.xlu0 %136  ;;  %v748_v35 = vld [vmem:[#allocation2 + $0x2] sm:$0xff]  ;;  %v749_v45 = vld [vmem:[#allocation2 + $0x12] sm:$0xff] }
  0xa5   :  { %v207_v28 = vmax.f32 %v5400_v29, %v139_v27  ;;  %v206_v14 = vmax.f32 %v5405_v30, %v137_v13  ;;  %v5584_v48 = vld [vmem:[#allocation2 + $0xd1] sm:$0xff]  ;;  %v5707_v27 = vld [vmem:[#allocation2 + $0x22] sm:$0xff] }
  0xa6   :  { %v5586_v49 = vld [vmem:[#allocation2 + $0xd0] sm:$0xff]  ;;  %317 = vst.msk [vmem:[#allocation2 + $0xf1] sm:$0xff] %vm212_vm0, %v251_v46  ;;  %4536 = vmatmul.mubr.msk.f32.gmra.mxu0 %vm212_vm0, %v5584_v48  ;;  %v1681_v46 = vld [vmem:[%s7047_s1 + $0x18] sm:$0xf]  ;;  %v5721_v13 = vld [vmem:[#allocation2 + $0x42] sm:$0xff] }
  0xa7   :  { %4562 = vmatmul.mubr.msk.f32.gmra.mxu1 %vm212_vm0, %v5586_v49  ;;  %v253_v50 = vsel %vm212_vm0, %v207_v28, -inf  ;;  %v252_v51 = vsel %vm212_vm0, %v206_v14, -inf  ;;  %v5727_v28 = vld [vmem:[#allocation2 + $0x52] sm:$0xff]  ;;  %v5733_v14 = vld [vmem:[#allocation2 + $0x62] sm:$0xff] }
  0xa8   :  { %v254_v52 = vmax.f32 %v252_v51, %v253_v50  ;;  %v143_v29 = vpop.permute.xlu1 %142  ;;  %v141_v15 = vpop.permute.xlu0 %140  ;;  %v756_v51 = vld [vmem:[#allocation2 + $0xa2] sm:$0xff] }
  0xa9   :  { %v209_v30 = vmax.f32 %v5414_v31, %v143_v29  ;;  %v208_v16 = vmax.f32 %v5419_v32, %v141_v15  ;;  %v5597_v54 = vld [vmem:[#allocation2 + $0xe1] sm:$0xff]  ;;  %v757_v29 = vld [vmem:[#allocation2 + $0xb2] sm:$0xff] }
  0xaa   :  { %v5599_v55 = vld [vmem:[#allocation2 + $0xe0] sm:$0xff]  ;;  %318 = vst.msk [vmem:[#allocation2 + $0x101] sm:$0xff] %vm212_vm0, %v254_v52  ;;  %4538 = vmatprep.mubr.msk.f32.mxu0 %vm212_vm0, %v5597_v54  ;;  %v5741_v52 = vld [vmem:[#allocation2 + $0x72] sm:$0xff] }
  0xab   :  { %4564 = vmatprep.mubr.msk.f32.mxu1 %vm212_vm0, %v5599_v55  ;;  %v256_v56 = vsel %vm212_vm0, %v209_v30, -inf  ;;  %v255_v57 = vsel %vm212_vm0, %v208_v16, -inf  ;;  %v5752_v15 = vld [vmem:[#allocation2 + $0xc2] sm:$0xff]  ;;  %v5759_v30 = vld [vmem:[#allocation2 + $0xd2] sm:$0xff] }
  0xac   :  { %v257_v58 = vmax.f32 %v255_v57, %v256_v56  ;;  %v115_v31 = vpop.permute.xlu1 %114  ;;  %v113_v17 = vpop.permute.xlu0 %112  ;;  %v5766_v16 = vld [vmem:[#allocation2 + $0xe2] sm:$0xff] }
  0xad   :  { %v5608_v32 = vld [vmem:[#allocation2 + $0xf1] sm:$0xff]  ;;  %v195_v60 = vmax.f32 %v5428_v33, %v115_v31  ;;  %v194_v61 = vmax.f32 %v5433_v34, %v113_v17  ;;  %v2139_v17 = vld [vmem:[%s7047_s1 + $0x20] sm:$0xf] }
  0xae   :  { %v5610_v18 = vld [vmem:[#allocation2 + $0xf0] sm:$0xff]  ;;  %319 = vst.msk [vmem:[#allocation2 + $0x111] sm:$0xff] %vm212_vm0, %v257_v58  ;;  %4539 = vmatmul.mubr.msk.f32.gmra.mxu0 %vm212_vm0, %v5608_v32 }
  0xaf   :  { %4565 = vmatmul.mubr.msk.f32.gmra.mxu1 %vm212_vm0, %v5610_v18  ;;  %v235_v62 = vsel %vm212_vm0, %v195_v60, -inf  ;;  %v234_v63 = vsel %vm212_vm0, %v194_v61, -inf  ;;  %v5772_v56 = vld [vmem:[#allocation2 + $0xf2] sm:$0xff] }
  0xb0   :  { %v236_v0 = vmax.f32 %v234_v63, %v235_v62  ;;  %v147_v1 = vpop.permute.xlu1 %146  ;;  %v145_v21 = vpop.permute.xlu0 %144 }
  0xb1   :  { %v5621_v3 = vld [vmem:[#allocation2 + $0x101] sm:$0xff]  ;;  %v211_v34 = vmax.f32 %v5449_v36, %v147_v1  ;;  %v210_v4 = vmax.f32 %v5454_v37, %v145_v21  ;;  %v977_v36 = vld [vmem:[#allocation2 + $0x10] sm:$0xff] }
  0xb2   :  { %v5623_v33 = vld [vmem:[#allocation2 + $0x100] sm:$0xff]  ;;  %4541 = vmatprep.mubr.msk.f32.mxu0 %vm212_vm0, %v5621_v3  ;;  %312 = vst.msk [vmem:[#allocation2 + $0x81] sm:$0xff] %vm212_vm0, %v236_v0 }
  0xb3   :  { %4567 = vmatprep.mubr.msk.f32.mxu1 %vm212_vm0, %v5623_v33  ;;  %v259_v5 = vsel %vm212_vm0, %v211_v34, -inf  ;;  %v258_v6 = vsel %vm212_vm0, %v210_v4, -inf  ;;  %v5645_v37 = vld [vmem:[#allocation2 + $0x20] sm:$0xff] }
  0xb4   :  { %v260_v23 = vmax.f32 %v258_v6, %v259_v5  ;;  %v5778_v57 = vld [vmem:[#allocation2 + $0x102] sm:$0xff] }
  0xb5   :  { %v5634_v24 = vld [vmem:[#allocation2 + $0x111] sm:$0xff] }
  0xb6   :  { %v5636_v25 = vld [vmem:[#allocation2 + $0x110] sm:$0xff]  ;;  %4542 = vmatmul.mubr.msk.f32.gmra.mxu0 %vm212_vm0, %v5634_v24  ;;  %320 = vst.msk [vmem:[#allocation2 + $0x121] sm:$0xff] %vm212_vm0, %v260_v23 }
  0xb7   :  { %4568 = vmatmul.mubr.msk.f32.gmra.mxu1 %vm212_vm0, %v5636_v25  ;;  %4546 = vmatprep.mubr.msk.f32.mxu0 %vm212_vm0, %v321_v9  ;;  %v5786_v31 = vld [vmem:[#allocation2 + $0x112] sm:$0xff] }
  0xb8   :  { %4598 = vmatprep.mubr.msk.f32.mxu1 %vm212_vm0, %v977_v36 }
  0xb9   :  { %v5692_v19 = vld [vmem:[#allocation2 + $0x80] sm:$0xff] }
  0xba   :  { %4547 = vmatmul.mubr.msk.f32.vlgmr.msra.gmra.mxu0 %vm212_vm0, %v977_v36  ;;  %v5784_v58 = vld [vmem:[#allocation2 + $0x82] sm:$0xff] }
  0xbb   :  { %4599 = vmatmul.mubr.msk.f32.vlgmr.msra.gmra.mxu1 %vm212_vm0, %v5645_v37  ;;  %4571 = vmatpush3.msk.msra.mxu0 %vm403_vm3, %v5488_v8  ;;  %v5673_v8 = vld [vmem:[#allocation2 + $0x50] sm:$0xff]  ;;  %v1213_v60 = vld [vmem:[#allocation2 + $0x81] sm:$0xff] }
  0xbc   :  { %4549 = vmatprep.mubr.msk.f32.mxu0 %vm212_vm0, %v5645_v37  ;;  %4601 = vmatprep.mubr.msk.f32.mxu1 %vm212_vm0, %v5657_v38 }
  0xbd   :  { %4622 = vmatprep.subr.msk.mxu0 %vm403_vm3, %v1222_v26  ;;  %4649 = vmatpush3.msk.msra.mxu1 %vm403_vm3, %v5556_v20  ;;  %v5680_v20 = vld [vmem:[#allocation2 + $0x60] sm:$0xff] }
  0xbe   :  { %4550 = vmatmul.mubr.msk.f32.gmra.mxu0 %vm212_vm0, %v5657_v38  ;;  %4700 = vmatprep.subr.msk.mxu1 %vm403_vm3, %v1910_v40  ;;  %v5739_v50 = vld [vmem:[#allocation2 + $0x120] sm:$0xff] }
  0xbf   :  { %4602 = vmatmul.mubr.msk.f32.gmra.mxu1 %vm212_vm0, %v5662_v39  ;;  %4552 = vmatprep.mubr.msk.f32.mxu0 %vm212_vm0, %v5662_v39 }
  0xc0   :  { %4604 = vmatprep.mubr.msk.f32.mxu1 %vm212_vm0, %v5673_v8 }
  0xc2   :  { %4553 = vmatmul.mubr.msk.f32.gmra.mxu0 %vm212_vm0, %v5673_v8 }
  0xc3   :  { %4605 = vmatmul.mubr.msk.f32.gmra.mxu1 %vm212_vm0, %v5680_v20  ;;  %4555 = vmatprep.mubr.msk.f32.mxu0 %vm212_vm0, %v5680_v20 }
  0xc4   :  { %4607 = vmatprep.mubr.msk.f32.mxu1 %vm212_vm0, %v5686_v42 }
  0xc6   :  { %4556 = vmatmul.mubr.msk.f32.gmra.mxu0 %vm212_vm0, %v5686_v42 }
  0xc7   :  { %4608 = vmatmul.mubr.msk.f32.gmra.mxu1 %vm212_vm0, %v5692_v19  ;;  %4572 = vmatprep.mubr.msk.f32.mxu0 %vm212_vm0, %v748_v35 }
  0xc8   :  { %4610 = vmatprep.mubr.msk.f32.mxu1 %vm212_vm0, %v5551_v12  ;;  %v5715_v12 = vld [vmem:[#allocation2 + $0x32] sm:$0xff] }
  0xca   :  { %4573 = vmatmul.mubr.msk.f32.vlgmr.msra.gmra.mxu0 %vm212_vm0, %v749_v45 }
  0xcb   :  { %4611 = vmatmul.mubr.msk.f32.gmra.mxu1 %vm212_vm0, %v5573_v44  ;;  %4623 = vmatpush3.msk.msra.mxu0 %vm403_vm3, %v1222_v26 }
  0xcc   :  { %4575 = vmatprep.mubr.msk.f32.mxu0 %vm212_vm0, %v5707_v27  ;;  %4613 = vmatprep.mubr.msk.f32.mxu1 %vm212_vm0, %v5586_v49 }
  0xcd   :  { %4674 = vmatprep.subr.msk.mxu0 %vm403_vm3, %v1681_v46 }
  0xce   :  { %4576 = vmatmul.mubr.msk.f32.gmra.mxu0 %vm212_vm0, %v5715_v12 }
  0xcf   :  { %4614 = vmatmul.mubr.msk.f32.gmra.mxu1 %vm212_vm0, %v5599_v55  ;;  %4578 = vmatprep.mubr.msk.f32.mxu0 %vm212_vm0, %v5721_v13 }
  0xd0   :  { %4616 = vmatprep.mubr.msk.f32.mxu1 %vm212_vm0, %v5610_v18 }
  0xd2   :  { %4579 = vmatmul.mubr.msk.f32.gmra.mxu0 %vm212_vm0, %v5727_v28 }
  0xd3   :  { %4617 = vmatmul.mubr.msk.f32.gmra.mxu1 %vm212_vm0, %v5623_v33  ;;  %4581 = vmatprep.mubr.msk.f32.mxu0 %vm212_vm0, %v5733_v14 }
  0xd4   :  { %4619 = vmatprep.mubr.msk.f32.mxu1 %vm212_vm0, %v5636_v25 }
  0xd6   :  { %4582 = vmatmul.mubr.msk.f32.gmra.mxu0 %vm212_vm0, %v5741_v52 }
  0xd7   :  { %4620 = vmatmul.mubr.msk.f32.gmra.mxu1 %vm212_vm0, %v5739_v50  ;;  %4584 = vmatprep.mubr.msk.f32.mxu0 %vm212_vm0, %v756_v51 }
  0xd8   :  { %4650 = vmatprep.mubr.msk.f32.mxu1 %vm212_vm0, %v749_v45 }
  0xda   :  { %4585 = vmatmul.mubr.msk.f32.gmra.mxu0 %vm212_vm0, %v757_v29 }
  0xdb   :  { %4651 = vmatmul.mubr.msk.f32.vlgmr.msra.gmra.mxu1 %vm212_vm0, %v5707_v27  ;;  %4587 = vmatprep.mubr.msk.f32.mxu0 %vm212_vm0, %v5752_v15 }
  0xdc   :  { %4653 = vmatprep.mubr.msk.f32.mxu1 %vm212_vm0, %v5715_v12  ;;  %4701 = vmatpush3.msk.msra.mxu1 %vm403_vm3, %v1910_v40 }
  0xdd   :  { %4752 = vmatprep.subr.mxu1 %v7052_v2 }
  0xde   :  { %4588 = vmatmul.mubr.msk.f32.gmra.mxu0 %vm212_vm0, %v5759_v30 }
  0xdf   :  { %4654 = vmatmul.mubr.msk.f32.gmra.mxu1 %vm212_vm0, %v5721_v13  ;;  %4590 = vmatprep.mubr.msk.f32.mxu0 %vm212_vm0, %v5766_v16 }
  0xe0   :  { %4656 = vmatprep.mubr.msk.f32.mxu1 %vm212_vm0, %v5727_v28 }
  0xe2   :  { %4591 = vmatmul.mubr.msk.f32.gmra.mxu0 %vm212_vm0, %v5772_v56 }
  0xe3   :  { %4657 = vmatmul.mubr.msk.f32.gmra.mxu1 %vm212_vm0, %v5733_v14  ;;  %4593 = vmatprep.mubr.msk.f32.mxu0 %vm212_vm0, %v5778_v57 }
  0xe4   :  { %4659 = vmatprep.mubr.msk.f32.mxu1 %vm212_vm0, %v5741_v52 }
  0xe6   :  { %4594 = vmatmul.mubr.msk.f32.gmra.mxu0 %vm212_vm0, %v5786_v31 }
  0xe7   :  { %4660 = vmatmul.mubr.msk.f32.gmra.mxu1 %vm212_vm0, %v5784_v58  ;;  %4624 = vmatprep.mubr.msk.f32.mxu0 %vm212_vm0, %v5481_v7  ;;  %v5824_v7 = vld [vmem:[#allocation2 + $0x122] sm:$0xff] }
  0xe8   :  { %4662 = vmatprep.mubr.msk.f32.mxu1 %vm212_vm0, %v757_v29 }
  0xea   :  { %4625 = vmatmul.mubr.msk.f32.vlgmr.msra.gmra.mxu0 %vm212_vm0, %v5483_v10 }
  0xeb   :  { %4663 = vmatmul.mubr.msk.f32.gmra.mxu1 %vm212_vm0, %v5752_v15  ;;  %4675 = vmatpush3.msk.msra.mxu0 %vm403_vm3, %v1681_v46 }
  0xec   :  { %4627 = vmatprep.mubr.msk.f32.mxu0 %vm212_vm0, %v5503_v41  ;;  %4665 = vmatprep.mubr.msk.f32.mxu1 %vm212_vm0, %v5759_v30 }
  0xed   :  { %4726 = vmatprep.subr.msk.mxu0 %vm403_vm3, %v2139_v17 }
  0xee   :  { %4628 = vmatmul.mubr.msk.f32.gmra.mxu0 %vm212_vm0, %v5512_v47 }
  0xef   :  { %4666 = vmatmul.mubr.msk.f32.gmra.mxu1 %vm212_vm0, %v5766_v16  ;;  %4630 = vmatprep.mubr.msk.f32.mxu0 %vm212_vm0, %v5521_v53 }
  0xf0   :  { %4668 = vmatprep.mubr.msk.f32.mxu1 %vm212_vm0, %v5772_v56 }
  0xf2   :  { %4631 = vmatmul.mubr.msk.f32.gmra.mxu0 %vm212_vm0, %v5530_v59 }
  0xf3   :  { %4669 = vmatmul.mubr.msk.f32.gmra.mxu1 %vm212_vm0, %v5778_v57  ;;  %4633 = vmatprep.mubr.msk.f32.mxu0 %vm212_vm0, %v5539_v22 }
  0xf4   :  { %4671 = vmatprep.mubr.msk.f32.mxu1 %vm212_vm0, %v5786_v31 }
  0xf6   :  { %4634 = vmatmul.mubr.msk.f32.gmra.mxu0 %vm212_vm0, %v1213_v60 }
  0xf7   :  { %4672 = vmatmul.mubr.msk.f32.gmra.mxu1 %vm212_vm0, %v5824_v7  ;;  %4636 = vmatprep.mubr.msk.f32.mxu0 %vm212_vm0, %v5549_v11  ;;  %v2138_v11 = vld [vmem:[#allocation2 + $0x132] sm:$0xff] }
  0xf8   :  { %4702 = vmatprep.mubr.msk.f32.mxu1 %vm212_vm0, %v5483_v10  ;;  %v1901_v10 = vld [vmem:[#allocation2 + $0x91] sm:$0xff] }
  0xfa   :  { %4637 = vmatmul.mubr.msk.f32.gmra.mxu0 %vm212_vm0, %v5571_v43 }
  0xfb   :  { %4703 = vmatmul.mubr.msk.f32.vlgmr.msra.gmra.mxu1 %vm212_vm0, %v5503_v41  ;;  %4639 = vmatprep.mubr.msk.f32.mxu0 %vm212_vm0, %v5584_v48  ;;  %v1221_v41 = vld [vmem:[#allocation2 + $0x121] sm:$0xff] }
  0xfc   :  { %4705 = vmatprep.mubr.msk.f32.mxu1 %vm212_vm0, %v5512_v47  ;;  %v1672_v47 = vld [vmem:[#allocation2 + $0x90] sm:$0xff] }
  0xfe   :  { %4640 = vmatmul.mubr.msk.f32.gmra.mxu0 %vm212_vm0, %v5597_v54 }
  0xff   :  { %4706 = vmatmul.mubr.msk.f32.gmra.mxu1 %vm212_vm0, %v5521_v53  ;;  %4642 = vmatprep.mubr.msk.f32.mxu0 %vm212_vm0, %v5608_v32  ;;  %v1909_v53 = vld [vmem:[#allocation2 + $0x131] sm:$0xff] }
 0x100   :  { %4708 = vmatprep.mubr.msk.f32.mxu1 %vm212_vm0, %v5530_v59  ;;  %v1680_v59 = vld [vmem:[#allocation2 + $0x130] sm:$0xff] }
 0x102   :  { %4643 = vmatmul.mubr.msk.f32.gmra.mxu0 %vm212_vm0, %v5621_v3 }
 0x103   :  { %4709 = vmatmul.mubr.msk.f32.gmra.mxu1 %vm212_vm0, %v5539_v22  ;;  %4645 = vmatprep.mubr.msk.f32.mxu0 %vm212_vm0, %v5634_v24  ;;  %v2130_v22 = vld [vmem:[#allocation2 + $0x92] sm:$0xff] }
 0x104   :  { %4711 = vmatprep.mubr.msk.f32.mxu1 %vm212_vm0, %v1213_v60 }
 0x106   :  { %4646 = vmatmul.mubr.msk.f32.gmra.mxu0 %vm212_vm0, %v1221_v41 }
 0x107   :  { %4712 = vmatmul.mubr.msk.f32.gmra.mxu1 %vm212_vm0, %v1901_v10  ;;  %4676 = vmatprep.mubr.msk.f32.mxu0 %vm212_vm0, %v5645_v37 }
 0x108   :  { %4714 = vmatprep.mubr.msk.f32.mxu1 %vm212_vm0, %v5571_v43 }
 0x10a   :  { %4677 = vmatmul.mubr.msk.f32.vlgmr.msra.gmra.mxu0 %vm212_vm0, %v5657_v38 }
 0x10b   :  { %4715 = vmatmul.mubr.msk.f32.gmra.mxu1 %vm212_vm0, %v5584_v48  ;;  %4727 = vmatpush3.msk.msra.mxu0 %vm403_vm3, %v2139_v17 }
 0x10c   :  { %4679 = vmatprep.mubr.msk.f32.mxu0 %vm212_vm0, %v5662_v39  ;;  %4717 = vmatprep.mubr.msk.f32.mxu1 %vm212_vm0, %v5597_v54 }
 0x10d   :  { %4787 = vmatprep.subr.mxu0 %v7052_v2  ;;  %v6085_v2 = vld [vmem:[%s7048_s3] sm:$0xff] }
 0x10e   :  { %4680 = vmatmul.mubr.msk.f32.gmra.mxu0 %vm212_vm0, %v5673_v8  ;;  %7074 = vst [vmem:[#allocation22_spill] sm:$0xff] %v6085_v2  ;;  %2653 = vrot.lane.b32.xlu0 %v6085_v2, %s5093_s28 }
 0x10f   :  { %4718 = vmatmul.mubr.msk.f32.gmra.mxu1 %vm212_vm0, %v5608_v32  ;;  %4682 = vmatprep.mubr.msk.f32.mxu0 %vm212_vm0, %v5680_v20 }
 0x110   :  { %4720 = vmatprep.mubr.msk.f32.mxu1 %vm212_vm0, %v5621_v3 }
 0x112   :  { %4683 = vmatmul.mubr.msk.f32.gmra.mxu0 %vm212_vm0, %v5686_v42 }
 0x113   :  { %4721 = vmatmul.mubr.msk.f32.gmra.mxu1 %vm212_vm0, %v5634_v24  ;;  %4685 = vmatprep.mubr.msk.f32.mxu0 %vm212_vm0, %v5692_v19 }
 0x114   :  { %4723 = vmatprep.mubr.msk.f32.mxu1 %vm212_vm0, %v1221_v41 }
 0x116   :  { %4686 = vmatmul.mubr.msk.f32.gmra.mxu0 %vm212_vm0, %v1672_v47 }
 0x117   :  { %4724 = vmatmul.mubr.msk.f32.gmra.mxu1 %vm212_vm0, %v1909_v53  ;;  %4688 = vmatprep.mubr.msk.f32.mxu0 %vm212_vm0, %v5573_v44 }
 0x11a   :  { %4689 = vmatmul.mubr.msk.f32.gmra.mxu0 %vm212_vm0, %v5586_v49 }
 0x11b   :  { %4691 = vmatprep.mubr.msk.f32.mxu0 %vm212_vm0, %v5599_v55 }
 0x11e   :  { %4692 = vmatmul.mubr.msk.f32.gmra.mxu0 %vm212_vm0, %v5610_v18 }
 0x11f   :  { %4694 = vmatprep.mubr.msk.f32.mxu0 %vm212_vm0, %v5623_v33 }
 0x122   :  { %4695 = vmatmul.mubr.msk.f32.gmra.mxu0 %vm212_vm0, %v5636_v25 }
 0x123   :  { %4697 = vmatprep.mubr.msk.f32.mxu0 %vm212_vm0, %v5739_v50 }
 0x126   :  { %4698 = vmatmul.mubr.msk.f32.gmra.mxu0 %vm212_vm0, %v1680_v59 }
 0x127   :  { %4728 = vmatprep.mubr.msk.f32.mxu0 %vm212_vm0, %v5707_v27 }
 0x12a   :  { %4729 = vmatmul.mubr.msk.f32.vlgmr.msra.gmra.mxu0 %vm212_vm0, %v5715_v12 }
 0x12b   :  { %4731 = vmatprep.mubr.msk.f32.mxu0 %vm212_vm0, %v5721_v13 }
 0x12e   :  { %4732 = vmatmul.mubr.msk.f32.gmra.mxu0 %vm212_vm0, %v5727_v28 }
 0x12f   :  { %4734 = vmatprep.mubr.msk.f32.mxu0 %vm212_vm0, %v5733_v14 }
 0x132   :  { %4735 = vmatmul.mubr.msk.f32.gmra.mxu0 %vm212_vm0, %v5741_v52 }
 0x133   :  { %4737 = vmatprep.mubr.msk.f32.mxu0 %vm212_vm0, %v5784_v58 }
 0x136   :  { %4738 = vmatmul.mubr.msk.f32.gmra.mxu0 %vm212_vm0, %v2130_v22 }
 0x137   :  { %4740 = vmatprep.mubr.msk.f32.mxu0 %vm212_vm0, %v5752_v15 }
 0x13a   :  { %4741 = vmatmul.mubr.msk.f32.gmra.mxu0 %vm212_vm0, %v5759_v30 }
 0x13b   :  { %4743 = vmatprep.mubr.msk.f32.mxu0 %vm212_vm0, %v5766_v16 }
 0x13e   :  { %4744 = vmatmul.mubr.msk.f32.gmra.mxu0 %vm212_vm0, %v5772_v56 }
 0x13f   :  { %4746 = vmatprep.mubr.msk.f32.mxu0 %vm212_vm0, %v5778_v57 }
 0x142   :  { %4747 = vmatmul.mubr.msk.f32.gmra.mxu0 %vm212_vm0, %v5786_v31 }
 0x143   :  { %4749 = vmatprep.mubr.msk.f32.mxu0 %vm212_vm0, %v5824_v7 }
 0x146   :  { %v4522_v43 = vpop.f32.mrf.mxu0  ;;  %4750 = vmatmul.mubr.msk.f32.gmra.mxu0 %vm212_vm0, %v2138_v11 }
 0x148   :  { %v473_v44 = vpop.f32.mrf.mxu0 }
 0x14a   :  { %v4525_v48 = vpop.f32.mrf.mxu0 }
 0x14c   :  { %v483_v49 = vpop.f32.mrf.mxu0 }
 0x152   :  { %v4528_v54 = vpop.f32.mrf.mxu0 }
 0x154   :  { %v493_v55 = vpop.f32.mrf.mxu0 }
 0x15a   :  { %v4531_v32 = vpop.f32.mrf.mxu0 }
 0x15c   :  { %v503_v18 = vpop.f32.mrf.mxu0 }
 0x15e   :  { %v4534_v61 = vpop.f32.mrf.mxu0 }
 0x15f   :  { %v4560_v62 = vpop.f32.mrf.mxu1 }
 0x160   :  { %v5934_v63 = vadd.f32 %v4560_v62, %v4534_v61  ;;  %v513_v0 = vpop.f32.mrf.mxu0 }
 0x161   :  { %v709_v1 = vpop.f32.mrf.mxu1 }
 0x162   :  { %v5936_v21 = vadd.f32 %v709_v1, %v513_v0 }
 0x166   :  { %v4537_v3 = vpop.f32.mrf.mxu0 }
 0x167   :  { %v4563_v33 = vpop.f32.mrf.mxu1 }
 0x168   :  { %v5938_v34 = vadd.f32 %v4563_v33, %v4537_v3  ;;  %v523_v4 = vpop.f32.mrf.mxu0 }
 0x169   :  { %v719_v5 = vpop.f32.mrf.mxu1 }
 0x16a   :  { %v5940_v6 = vadd.f32 %v719_v5, %v523_v4 }
 0x16e   :  { %v4540_v9 = vpop.f32.mrf.mxu0 }
 0x16f   :  { %v4566_v23 = vpop.f32.mrf.mxu1 }
 0x170   :  { %v5950_v24 = vadd.f32 %v4566_v23, %v4540_v9  ;;  %v533_v25 = vpop.f32.mrf.mxu0 }
 0x171   :  { %v729_v36 = vpop.f32.mrf.mxu1 }
 0x172   :  { %v5952_v37 = vadd.f32 %v729_v36, %v533_v25 }
 0x176   :  { %v4543_v26 = vpop.f32.mrf.mxu0 }
 0x177   :  { %v4569_v38 = vpop.f32.mrf.mxu1 }
 0x178   :  { %v5954_v39 = vadd.f32 %v4569_v38, %v4543_v26  ;;  %v543_v40 = vpop.f32.mrf.mxu0 }
 0x179   :  { %v739_v8 = vpop.f32.mrf.mxu1 }
 0x17a   :  { %v5956_v20 = vadd.f32 %v739_v8, %v543_v40  ;;  %v4548_v42 = vpop.f32.mrf.mxu0 }
 0x17b   :  { %v5958_v19 = vpop.f32.mrf.mxu1  ;;  %v675_v35 = vadd.f32 %v4548_v42, %v4522_v43 }
 0x17c   :  { %v669_v45 = vpop.f32.mrf.mxu0 }
 0x17d   :  { %v5960_v46 = vpop.f32.mrf.mxu1  ;;  %v670_v27 = vadd.f32 %v669_v45, %v473_v44 }
 0x17e   :  { %v4551_v12 = vpop.f32.mrf.mxu0 }
 0x17f   :  { %v5962_v13 = vpop.f32.mrf.mxu1  ;;  %v685_v28 = vadd.f32 %v4551_v12, %v4525_v48 }
 0x180   :  { %v679_v14 = vpop.f32.mrf.mxu0 }
 0x181   :  { %v5964_v50 = vpop.f32.mrf.mxu1  ;;  %v680_v51 = vadd.f32 %v679_v14, %v483_v49 }
 0x182   :  { %v4554_v52 = vpop.f32.mrf.mxu0 }
 0x183   :  { %v5966_v29 = vpop.f32.mrf.mxu1  ;;  %v695_v15 = vadd.f32 %v4554_v52, %v4528_v54 }
 0x184   :  { %v689_v30 = vpop.f32.mrf.mxu0 }
 0x185   :  { %v5968_v16 = vpop.f32.mrf.mxu1  ;;  %v690_v56 = vadd.f32 %v689_v30, %v493_v55 }
 0x186   :  { %v4557_v57 = vpop.f32.mrf.mxu0 }
 0x187   :  { %v5970_v58 = vpop.f32.mrf.mxu1  ;;  %v705_v31 = vadd.f32 %v4557_v57, %v4531_v32 }
 0x188   :  { %v699_v17 = vpop.f32.mrf.mxu0 }
 0x189   :  { %v5972_v7 = vpop.f32.mrf.mxu1  ;;  %v700_v60 = vadd.f32 %v699_v17, %v503_v18 }
 0x18a   :  { %v4574_v10 = vpop.f32.mrf.mxu0 }
 0x18b   :  { %v5974_v41 = vpop.f32.mrf.mxu1  ;;  %v5976_v47 = vadd.f32 %v4574_v10, %v675_v35 }
 0x18c   :  { %v882_v53 = vpop.f32.mrf.mxu0 }
 0x18d   :  { %v5978_v59 = vpop.f32.mrf.mxu1  ;;  %v5980_v22 = vadd.f32 %v882_v53, %v670_v27 }
 0x18e   :  { %v4577_v11 = vpop.f32.mrf.mxu0 }
 0x18f   :  { %v5982_v43 = vpop.f32.mrf.mxu1  ;;  %v5984_v44 = vadd.f32 %v4577_v11, %v685_v28 }
 0x190   :  { %v892_v48 = vpop.f32.mrf.mxu0 }
 0x191   :  { %v5986_v49 = vpop.f32.mrf.mxu1  ;;  %v5988_v54 = vadd.f32 %v892_v48, %v680_v51 }
 0x192   :  { %v4580_v55 = vpop.f32.mrf.mxu0 }
 0x193   :  { %v5990_v32 = vpop.f32.mrf.mxu1  ;;  %v5992_v18 = vadd.f32 %v4580_v55, %v695_v15 }
 0x194   :  { %v902_v61 = vpop.f32.mrf.mxu0 }
 0x195   :  { %v5994_v62 = vpop.f32.mrf.mxu1  ;;  %v5996_v0 = vadd.f32 %v902_v61, %v690_v56 }
 0x196   :  { %v4583_v1 = vpop.f32.mrf.mxu0 }
 0x197   :  { %v5998_v3 = vpop.f32.mrf.mxu1  ;;  %v6000_v33 = vadd.f32 %v4583_v1, %v705_v31 }
 0x198   :  { %v912_v4 = vpop.f32.mrf.mxu0 }
 0x199   :  { %v6002_v5 = vpop.f32.mrf.mxu1  ;;  %v6004_v9 = vadd.f32 %v912_v4, %v700_v60 }
 0x19a   :  { %7056 = vst [vmem:[#allocation4_spill] sm:$0xff] %v6002_v5  ;;  %v4586_v23 = vpop.f32.mrf.mxu0 }
 0x19b   :  { %v6006_v25 = vpop.f32.mrf.mxu1  ;;  %v6009_v36 = vadd.f32 %v4586_v23, %v5934_v63 }
 0x19c   :  { %v922_v26 = vpop.f32.mrf.mxu0 }
 0x19d   :  { %v6011_v38 = vpop.f32.mrf.mxu1  ;;  %v6014_v40 = vadd.f32 %v922_v26, %v5936_v21 }
 0x19e   :  { %v4589_v8 = vpop.f32.mrf.mxu0 }
 0x19f   :  { %v6016_v42 = vpop.f32.mrf.mxu1  ;;  %v6019_v35 = vadd.f32 %v4589_v8, %v5938_v34 }
 0x1a0   :  { %v932_v45 = vpop.f32.mrf.mxu0 }
 0x1a1   :  { %v6021_v27 = vpop.f32.mrf.mxu1  ;;  %v6024_v12 = vadd.f32 %v932_v45, %v5940_v6 }
 0x1a2   :  { %v4592_v63 = vpop.f32.mrf.mxu0 }
 0x1a3   :  { %v6026_v28 = vpop.f32.mrf.mxu1  ;;  %v6029_v14 = vadd.f32 %v4592_v63, %v5950_v24 }
 0x1a4   :  { %v942_v21 = vpop.f32.mrf.mxu0 }
 0x1a5   :  { %v6031_v51 = vpop.f32.mrf.mxu1  ;;  %v6034_v52 = vadd.f32 %v942_v21, %v5952_v37 }
 0x1a6   :  { %v4595_v34 = vpop.f32.mrf.mxu0 }
 0x1a7   :  { %v6036_v15 = vpop.f32.mrf.mxu1  ;;  %v6039_v30 = vadd.f32 %v4595_v34, %v5954_v39 }
 0x1a8   :  { %7057 = vst [vmem:[#allocation5_spill] sm:$0xff] %v6036_v15  ;;  %v952_v6 = vpop.f32.mrf.mxu0 }
 0x1a9   :  { %v6041_v56 = vpop.f32.mrf.mxu1  ;;  %v6044_v57 = vadd.f32 %v952_v6, %v5956_v20 }
 0x1aa   :  { %7058 = vst [vmem:[#allocation6_spill] sm:$0xff] %v6041_v56  ;;  %v4626_v24 = vpop.f32.mrf.mxu0 }
 0x1ab   :  { %7059 = vst [vmem:[#allocation7_spill] sm:$0xff] %v6044_v57  ;;  %v6046_v31 = vpop.f32.mrf.mxu1 }
 0x1ac   :  { %7060 = vst [vmem:[#allocation8_spill] sm:$0xff] %v6046_v31  ;;  %v1340_v17 = vpop.f32.mrf.mxu0  ;;  %v1191_v31 = vadd.f32 %v5958_v19, %v5976_v47  ;;  %v1192_v19 = vadd.f32 %v5964_v50, %v5988_v54 }
 0x1ad   :  { %v6048_v60 = vpop.f32.mrf.mxu1 }
 0x1ae   :  { %7061 = vst [vmem:[#allocation9_spill] sm:$0xff] %v6048_v60  ;;  %v4629_v37 = vpop.f32.mrf.mxu0 }
 0x1af   :  { %v6050_v53 = vpop.f32.mrf.mxu1 }
 0x1b0   :  { %v1350_v10 = vpop.f32.mrf.mxu0  ;;  %7062 = vst [vmem:[#allocation10_spill] sm:$0xff] %v6050_v53 }
 0x1b1   :  { %v6054_v39 = vpop.f32.mrf.mxu1 }
 0x1b2   :  { %v4632_v11 = vpop.f32.mrf.mxu0  ;;  %7063 = vst [vmem:[#allocation11_spill] sm:$0xff] %v6054_v39 }
 0x1b3   :  { %v6060_v20 = vpop.f32.mrf.mxu1 }
 0x1b4   :  { %v6052_v48 = vpop.f32.mrf.mxu0  ;;  %7064 = vst [vmem:[#allocation12_spill] sm:$0xff] %v6060_v20 }
 0x1b5   :  { %v6066_v23 = vpop.f32.mrf.mxu1 }
 0x1b6   :  { %v6056_v55 = vpop.f32.mrf.mxu0  ;;  %7066 = vst [vmem:[#allocation14_spill] sm:$0xff] %v6066_v23 }
 0x1b7   :  { %v6072_v45 = vpop.f32.mrf.mxu1 }
 0x1b8   :  { %v6058_v61 = vpop.f32.mrf.mxu0  ;;  %7069 = vst [vmem:[#allocation17_spill] sm:$0xff] %v6072_v45 }
 0x1b9   :  { %v6078_v34 = vpop.f32.mrf.mxu1 }
 0x1ba   :  { %v6062_v1 = vpop.f32.mrf.mxu0  ;;  %7072 = vst [vmem:[#allocation20_spill] sm:$0xff] %v6078_v34 }
 0x1bb   :  { %v4704_v20 = vpop.f32.mrf.mxu1 }
 0x1bc   :  { %v6064_v4 = vpop.f32.mrf.mxu0 }
 0x1bd   :  { %7065 = vst [vmem:[#allocation13_spill] sm:$0xff] %v6064_v4  ;;  %v2028_v53 = vpop.f32.mrf.mxu1 }
 0x1be   :  { %v6068_v26 = vpop.f32.mrf.mxu0 }
 0x1bf   :  { %7067 = vst [vmem:[#allocation15_spill] sm:$0xff] %v6068_v26  ;;  %v4707_v5 = vpop.f32.mrf.mxu1 }
 0x1c0   :  { %v6070_v8 = vpop.f32.mrf.mxu0 }
 0x1c1   :  { %7068 = vst [vmem:[#allocation16_spill] sm:$0xff] %v6070_v8 }
 0x1c2   :  { %v6074_v63 = vpop.f32.mrf.mxu0 }
 0x1c3   :  { %7070 = vst [vmem:[#allocation18_spill] sm:$0xff] %v6074_v63 }
 0x1c4   :  { %v6076_v21 = vpop.f32.mrf.mxu0 }
 0x1c5   :  { %7071 = vst [vmem:[#allocation19_spill] sm:$0xff] %v6076_v21 }
 0x1c6   :  { %v6080_v6 = vpop.f32.mrf.mxu0 }
 0x1c7   :  { %7073 = vst [vmem:[#allocation21_spill] sm:$0xff] %v6080_v6  ;;  %v6092_v6 = vpop.f32.mrf.mxu1 }
 0x1c8   :  { %v6088_v23 = vpop.f32.mrf.mxu0  ;;  %7077 = vst [vmem:[#allocation25_spill] sm:$0xff] %v6092_v6  ;;  %v1190_v6 = vadd.f32 %v5960_v46, %v5980_v22  ;;  %v1421_v22 = vadd.f32 %v1350_v10, %v1192_v19  ;;  %v7087_v19 = vld [vmem:[#allocation6_spill] sm:$0xff] }
 0x1c9   :  { %7075 = vst [vmem:[#allocation23_spill] sm:$0xff] %v6088_v23  ;;  %v6098_v26 = vpop.f32.mrf.mxu1 }
 0x1ca   :  { %v4678_v45 = vpop.f32.mrf.mxu0  ;;  %7080 = vst [vmem:[#allocation28_spill] sm:$0xff] %v6098_v26  ;;  %v1193_v26 = vadd.f32 %v5962_v13, %v5984_v44 }
 0x1cb   :  { %v6106_v56 = vpop.f32.mrf.mxu1 }
 0x1cc   :  { %v1799_v39 = vpop.f32.mrf.mxu0  ;;  %v1422_v15 = vadd.f32 %v4629_v37, %v1193_v26  ;;  %v1194_v37 = vadd.f32 %v5968_v16, %v5996_v0  ;;  %v1199_v0 = vadd.f32 %v5974_v41, %v6009_v36 }
 0x1ce   :  { %v4681_v60 = vpop.f32.mrf.mxu0  ;;  %v1651_v54 = vadd.f32 %v6016_v42, %v1422_v15  ;;  %v1201_v42 = vadd.f32 %v5982_v43, %v6019_v35  ;;  %v1428_v41 = vadd.f32 %v6062_v1, %v1199_v0 }
 0x1d0   :  { %v1809_v21 = vpop.f32.mrf.mxu0  ;;  %v1881_v10 = vadd.f32 %v4681_v60, %v1651_v54  ;;  %v7091_v54 = vld [vmem:[#allocation15_spill] sm:$0xff] }
 0x1d2   :  { %v4684_v34 = vpop.f32.mrf.mxu0  ;;  %v2110_v35 = vadd.f32 %v4707_v5, %v1881_v10 }
 0x1d4   :  { %v6090_v57 = vpop.f32.mrf.mxu0 }
 0x1d5   :  { %7076 = vst [vmem:[#allocation24_spill] sm:$0xff] %v6090_v57  ;;  %v1420_v57 = vadd.f32 %v4626_v24, %v1191_v31  ;;  %v1195_v24 = vadd.f32 %v5966_v29, %v5992_v18  ;;  %v1197_v29 = vadd.f32 %v5970_v58, %v6000_v33  ;;  %v1196_v18 = vadd.f32 %v5972_v7, %v6004_v9  ;;  %v6154_v9 = vld [vmem:[%s7049_s2] ss:$0 sm:$0xff] }
 0x1d6   :  { %v6094_v63 = vpop.f32.mrf.mxu0  ;;  %v1198_v58 = vadd.f32 %v5978_v59, %v6014_v40  ;;  %v6162_v59 = vadd.f32 %v5986_v49, %v6024_v12  ;;  %v6178_v49 = vadd.f32 %v5998_v3, %v6039_v30  ;;  %v7083_v12 = vld [vmem:[#allocation5_spill] sm:$0xff]  ;;  %v7089_v3 = vld [vmem:[#allocation28_spill] sm:$0xff] }
 0x1d7   :  { %7078 = vst [vmem:[#allocation26_spill] sm:$0xff] %v6094_v63  ;;  %v1649_v47 = vadd.f32 %v6006_v25, %v1420_v57  ;;  %v1424_v44 = vadd.f32 %v4632_v11, %v1195_v24  ;;  %v1423_v57 = vadd.f32 %v6052_v48, %v1194_v37  ;;  %v1650_v11 = vadd.f32 %v6021_v27, %v1421_v22 }
 0x1d8   :  { %v6096_v8 = vpop.f32.mrf.mxu0  ;;  %v1426_v16 = vadd.f32 %v6056_v55, %v1197_v29  ;;  %v1425_v48 = vadd.f32 %v6058_v61, %v1196_v18  ;;  %v6174_v61 = vadd.f32 %v5994_v62, %v6034_v52  ;;  %v7088_v52 = vld [vmem:[#allocation8_spill] sm:$0xff]  ;;  %v1430_v29 = vadd.f32 %v7091_v54, %v1201_v42  ;;  %v7095_v42 = vld [vmem:[#allocation18_spill] sm:$0xff] }
 0x1d9   :  { %7079 = vst [vmem:[#allocation27_spill] sm:$0xff] %v6096_v8  ;;  %v1419_v8 = vadd.f32 %v1340_v17, %v1190_v6  ;;  %v1879_v17 = vadd.f32 %v4678_v45, %v1649_v47  ;;  %v1653_v7 = vadd.f32 %v6026_v28, %v1424_v44  ;;  %v1880_v27 = vadd.f32 %v1809_v21, %v1650_v11  ;;  %v7085_v21 = vld [vmem:[#allocation25_spill] sm:$0xff] }
 0x1da   :  { %v6100_v2 = vpop.f32.mrf.mxu0  ;;  %v1654_v62 = vadd.f32 %v7087_v19, %v1425_v48  ;;  %v1657_v47 = vadd.f32 %v7088_v52, %v1428_v41  ;;  %v7098_v41 = vld [vmem:[#allocation9_spill] sm:$0xff] }
 0x1db   :  { %7081 = vst [vmem:[#allocation29_spill] sm:$0xff] %v6100_v2  ;;  %v6116_v2 = vpop.f32.mrf.mxu1  ;;  %v1648_v13 = vadd.f32 %v6011_v38, %v1419_v8  ;;  %v2108_v26 = vadd.f32 %v4704_v20, %v1879_v17  ;;  %v1883_v36 = vadd.f32 %v4684_v34, %v1653_v7  ;;  %v1655_v20 = vadd.f32 %v7083_v12, %v1426_v16 }
 0x1dc   :  { %v6102_v23 = vpop.f32.mrf.mxu0  ;;  %v2109_v34 = vadd.f32 %v7085_v21, %v1880_v27  ;;  %v7093_v7 = vmov 0.0  }
 0x1dd   :  { %7082 = vst [vmem:[#allocation30_spill] sm:$0xff] %v6102_v23  ;;  %v6127_v31 = vpop.f32.mrf.mxu1  ;;  %v1878_v50 = vadd.f32 %v1799_v39, %v1648_v13  ;;  %v1652_v39 = vadd.f32 %v6031_v51, %v1423_v57  ;;  %v7084_v51 = vld [vmem:[#allocation24_spill] sm:$0xff]  ;;  %v2112_v30 = vadd.f32 %v7089_v3, %v1883_v36  ;;  %2585 = vst.msk [vmem:[#allocation3 + $0x110] sm:$0x1] %vm2570_vm5, %v7093_v7  ;;  %4784 = vmatprep.mubr.msk.f32.mxu1 %vm5096_vm7, %v7093_v7 }
 0x1de   :  { %v6108_v4 = vpop.f32.mrf.mxu0  ;;  %v7090_v17 = vld [vmem:[#allocation26_spill] sm:$0xff]  ;;  %2571 = vst.msk [vmem:[#allocation3 + $0x10] sm:$0x1] %vm2570_vm5, %v7093_v7  ;;  %2572 = vst.msk [vmem:[#allocation3 + $0x20] sm:$0x1] %vm2570_vm5, %v7093_v7  ;;  %v7104_v3 = vld [vmem:[#allocation12_spill] sm:$0xff]  ;;  %4819 = vmatprep.mubr.msk.f32.mxu0 %vm5096_vm7, %v7093_v7 }
 0x1df   :  { %v6142_v38 = vpop.f32.mrf.mxu1  ;;  %v2107_v60 = vadd.f32 %v2028_v53, %v1878_v50  ;;  %v1203_v53 = vadd.f32 %v5990_v32, %v6029_v14  ;;  %v1882_v8 = vadd.f32 %v7084_v51, %v1652_v39  ;;  %v7086_v32 = vld [vmem:[#allocation13_spill] sm:$0xff]  ;;  %v1885_v13 = vadd.f32 %v7090_v17, %v1655_v20  ;;  %2573 = vst.msk [vmem:[#allocation3 + $0x30] sm:$0x1] %vm2570_vm5, %v7093_v7 }
 0x1e0   :  { %v6112_v63 = vpop.f32.mrf.mxu0  ;;  %v1427_v14 = vadd.f32 %v7086_v32, %v1198_v58  ;;  %v7092_v18 = vld [vmem:[#allocation27_spill] sm:$0xff]  ;;  %2574 = vst.msk [vmem:[#allocation3 + $0x40] sm:$0x1] %vm2570_vm5, %v7093_v7  ;;  %2575 = vst.msk [vmem:[#allocation3 + $0x50] sm:$0x1] %vm2570_vm5, %v7093_v7 }
 0x1e1   :  { %v6164_v28 = vpop.f32.mrf.mxu1  ;;  %v1884_v57 = vadd.f32 %v7092_v18, %v1654_v62  ;;  %v2111_v58 = vadd.f32 %v6106_v56, %v1882_v8  ;;  %2576 = vst.msk [vmem:[#allocation3 + $0x60] sm:$0x1] %vm2570_vm5, %v7093_v7  ;;  %2577 = vst.msk [vmem:[#allocation3 + $0x70] sm:$0x1] %vm2570_vm5, %v7093_v7  ;;  %v7094_v56 = vld [vmem:[#allocation16_spill] sm:$0xff]  ;;  %v1432_v27 = vadd.f32 %v7095_v42, %v1203_v53  ;;  %v7107_v42 = vld [vmem:[#allocation14_spill] sm:$0xff] }
 0x1e2   :  { %v6118_v23 = vpop.f32.mrf.mxu0  ;;  %2578 = vst.msk [vmem:[#allocation3 + $0x80] sm:$0x1] %vm2570_vm5, %v7093_v7  ;;  %2579 = vst.msk [vmem:[#allocation3 + $0xb0] sm:$0x1] %vm2570_vm5, %v7093_v7  ;;  %v1656_v36 = vadd.f32 %v7098_v41, %v1427_v14 }
 0x1e3   :  { %v6190_v22 = vpop.f32.mrf.mxu1  ;;  %2580 = vst.msk [vmem:[#allocation3 + $0xc0] sm:$0x1] %vm2570_vm5, %v7093_v7  ;;  %2581 = vst.msk [vmem:[#allocation3 + $0xd0] sm:$0x1] %vm2570_vm5, %v7093_v7 }
 0x1e4   :  { %v6125_v46 = vpop.f32.mrf.mxu0  ;;  %2582 = vst.msk [vmem:[#allocation3 + $0xe0] sm:$0x1] %vm2570_vm5, %v7093_v7  ;;  %2583 = vst.msk [vmem:[#allocation3 + $0xf0] sm:$0x1] %vm2570_vm5, %v7093_v7  ;;  %v7100_v51 = vld [vmem:[#allocation30_spill] sm:$0xff] }
 0x1e5   :  { %2584 = vst.msk [vmem:[#allocation3 + $0x100] sm:$0x1] %vm2570_vm5, %v7093_v7  ;;  %2586 = vst.msk [vmem:[#allocation3 + $0x120] sm:$0x1] %vm2570_vm5, %v7093_v7  ;;  %v2078_v39 = vpop.f32.mrf.mxu1  ;;  %v1886_v8 = vadd.f32 %v7100_v51, %v1656_v36 }
 0x1e6   :  { %v6130_v6 = vpop.f32.mrf.mxu0  ;;  %2587 = vst.msk [vmem:[#allocation3 + $0x19] sm:$0x1] %vm2570_vm5, %v7093_v7  ;;  %2588 = vst.msk [vmem:[#allocation3 + $0x29] sm:$0x1] %vm2570_vm5, %v7093_v7 }
 0x1e7   :  { %2589 = vst.msk [vmem:[#allocation3 + $0x39] sm:$0x1] %vm2570_vm5, %v7093_v7  ;;  %2590 = vst.msk [vmem:[#allocation3 + $0x49] sm:$0x1] %vm2570_vm5, %v7093_v7 }
 0x1e8   :  { %v6139_v25 = vpop.f32.mrf.mxu0  ;;  %2591 = vst.msk [vmem:[#allocation3 + $0x59] sm:$0x1] %vm2570_vm5, %v7093_v7  ;;  %2592 = vst.msk [vmem:[#allocation3 + $0x69] sm:$0x1] %vm2570_vm5, %v7093_v7 }
 0x1e9   :  { %2593 = vst.msk [vmem:[#allocation3 + $0x79] sm:$0x1] %vm2570_vm5, %v7093_v7  ;;  %2594 = vst.msk [vmem:[#allocation3 + $0x89] sm:$0x1] %vm2570_vm5, %v7093_v7 }
 0x1ea   :  { %v4730_v33 = vpop.f32.mrf.mxu0  ;;  %2595 = vst.msk [vmem:[#allocation3 + $0xb9] sm:$0x1] %vm2570_vm5, %v7093_v7  ;;  %2596 = vst.msk [vmem:[#allocation3 + $0xc9] sm:$0x1] %vm2570_vm5, %v7093_v7 }
 0x1eb   :  { %v2337_v15 = vadd.f32 %v4730_v33, %v2108_v26  ;;  %2597 = vst.msk [vmem:[#allocation3 + $0xd9] sm:$0x1] %vm2570_vm5, %v7093_v7  ;;  %2598 = vst.msk [vmem:[#allocation3 + $0xe9] sm:$0x1] %vm2570_vm5, %v7093_v7  ;;  %v1429_v33 = vadd.f32 %v7094_v56, %v6162_v59  ;;  %v7101_v59 = vld [vmem:[#allocation10_spill] sm:$0xff] }
 0x1ec   :  { %v2257_v40 = vpop.f32.mrf.mxu0  ;;  %2599 = vst.msk [vmem:[#allocation3 + $0xf9] sm:$0x1] %vm2570_vm5, %v7093_v7  ;;  %2600 = vst.msk [vmem:[#allocation3 + $0x109] sm:$0x1] %vm2570_vm5, %v7093_v7 }
 0x1ed   :  { %v6168_v55 = vadd.f32 %v6154_v9, %v2337_v15  ;;  %v2336_v43 = vadd.f32 %v2257_v40, %v2107_v60  ;;  %2601 = vst.msk [vmem:[#allocation3 + $0x119] sm:$0x1] %vm2570_vm5, %v7093_v7  ;;  %2602 = vst.msk [vmem:[#allocation3 + $0x129] sm:$0x1] %vm2570_vm5, %v7093_v7  ;;  %v7096_v15 = vld [vmem:[#allocation7_spill] sm:$0xff]  ;;  %v7097_v60 = vld [vmem:[#allocation4_spill] sm:$0xff] }
 0x1ee   :  { %v4733_v1 = vpop.f32.mrf.mxu0  ;;  %v1204_v48 = vadd.f32 %v7097_v60, %v7096_v15  ;;  %2563 = vst.msk [vmem:[#allocation3 + $0xa8] sm:$0x3] %vm2560_vm6, %v7093_v7  ;;  %2561 = vst.msk [vmem:[#allocation3 + $0x8] sm:$0x3] %vm2560_vm6, %v7093_v7 }
 0x1ef   :  { %v6183_v45 = vadd.f32 %v6154_v9, %v2336_v43  ;;  %v2339_v5 = vadd.f32 %v4733_v1, %v2110_v35  ;;  %v2375_v44 = vsel %vm2373_vm4, %v6168_v55, 0.0  ;;  %v7099_v43 = vld [vmem:[#allocation29_spill] sm:$0xff]  ;;  %v2114_v1 = vadd.f32 %v6116_v2, %v1885_v13  ;;  %v7102_v2 = vld [vmem:[#allocation19_spill] sm:$0xff]  ;;  %2566 = vst.msk [vmem:[#allocation3 + $0x98] sm:$0x3] %vm2560_vm6, %v7093_v7 }
 0x1f0   :  { %v2267_v24 = vpop.f32.mrf.mxu0  ;;  %v1887_v35 = vadd.f32 %v7099_v43, %v1657_v47  ;;  %v1431_v52 = vadd.f32 %v7102_v2, %v6174_v61  ;;  %v7103_v47 = vld [vmem:[#allocation11_spill] sm:$0xff]  ;;  %v7108_v43 = vld [vmem:[#allocation17_spill] sm:$0xff]  ;;  %2568 = vst.msk [vmem:[#allocation3 + $0x138] sm:$0x3] %vm2560_vm6, %v7093_v7 }
 0x1f1   :  { %v2374_v37 = vsel %vm2373_vm4, %v6183_v45, 0.0  ;;  %v2338_v50 = vadd.f32 %v2267_v24, %v2109_v34  ;;  %v6200_v26 = vadd.f32 %v6154_v9, %v2339_v5  ;;  %v1659_v5 = vadd.f32 %v7101_v59, %v1430_v29  ;;  %v7105_v29 = vld [vmem:[#allocation21_spill] sm:$0xff] }
 0x1f2   :  { %v2376_v10 = vadd.f32 %v2375_v44, %v2374_v37  ;;  %v4736_v11 = vpop.f32.mrf.mxu0  ;;  %v2113_v34 = vadd.f32 %v6127_v31, %v1884_v57  ;;  %v1658_v24 = vadd.f32 %v7103_v47, %v1429_v33  ;;  %v4722_v31 = vpop.f32.mrf.mxu1  ;;  %v2116_v54 = vadd.f32 %v6142_v38, %v1887_v35  ;;  %v7106_v38 = vld [vmem:[#allocation23_spill] sm:$0xff] }
 0x1f3   :  { %v6203_v16 = vadd.f32 %v6154_v9, %v2338_v50  ;;  %v2341_v0 = vadd.f32 %v4736_v11, %v2112_v30  ;;  %v2379_v32 = vsel %vm2373_vm4, %v6200_v26, 0.0  ;;  %v1661_v30 = vadd.f32 %v7104_v3, %v1432_v27 }
 0x1f4   :  { %v2277_v40 = vpop.f32.mrf.mxu0  ;;  %v1889_v44 = vadd.f32 %v6108_v4, %v1659_v5  ;;  %v1434_v18 = vadd.f32 %v7105_v29, %v6178_v49  ;;  %v1888_v61 = vadd.f32 %v6112_v63, %v1658_v24  ;;  %v2115_v11 = vadd.f32 %v6164_v28, %v1886_v8  ;;  %v2088_v15 = vpop.f32.mrf.mxu1  ;;  %v7109_v5 = vld [vmem:[#allocation20_spill] sm:$0xff] }
 0x1f5   :  { %v2377_v12 = vsel %vm2373_vm4, %v6203_v16, 0.0  ;;  %v2340_v20 = vadd.f32 %v2277_v40, %v2111_v58  ;;  %v6286_v14 = vadd.f32 %v6154_v9, %v2341_v0  ;;  %v1433_v33 = vadd.f32 %v7106_v38, %v1204_v48 }
 0x1f6   :  { %v2378_v53 = vadd.f32 %v2377_v12, %v2376_v10  ;;  %v4739_v21 = vpop.f32.mrf.mxu0  ;;  %v1660_v49 = vadd.f32 %v7107_v42, %v1431_v52  ;;  %v1891_v60 = vadd.f32 %v6118_v23, %v1661_v30  ;;  %v2118_v36 = vadd.f32 %v6190_v22, %v1889_v44 }
 0x1f7   :  { %v6289_v19 = vadd.f32 %v6154_v9, %v2340_v20  ;;  %v2343_v62 = vadd.f32 %v4739_v21, %v2114_v1  ;;  %v2383_v0 = vsel %vm2373_vm4, %v6286_v14, 0.0  ;;  %v1663_v35 = vadd.f32 %v7108_v43, %v1434_v18  ;;  %v4725_v1 = vpop.f32.mrf.mxu1 }
 0x1f8   :  { %v2380_v17 = vadd.f32 %v2379_v32, %v2378_v53  ;;  %v2287_v13 = vpop.f32.mrf.mxu0  ;;  %v1890_v40 = vadd.f32 %v6125_v46, %v1660_v49  ;;  %v2117_v48 = vadd.f32 %v2078_v39, %v1888_v61  ;;  %v1662_v22 = vadd.f32 %v7109_v5, %v1433_v33 }
 0x1f9   :  { %v2381_v37 = vsel %vm2373_vm4, %v6289_v19, 0.0  ;;  %v2342_v50 = vadd.f32 %v2287_v13, %v2113_v34  ;;  %v6306_v4 = vadd.f32 %v6154_v9, %v2343_v62  ;;  %v1893_v21 = vadd.f32 %v6130_v6, %v1663_v35  ;;  %v2098_v24 = vpop.f32.mrf.mxu1 }
 0x1fa   :  { %v2382_v57 = vadd.f32 %v2381_v37, %v2380_v17  ;;  %v4742_v10 = vpop.f32.mrf.mxu0  ;;  %v2120_v32 = vadd.f32 %v4722_v31, %v1891_v60  ;;  %v1892_v62 = vadd.f32 %v6139_v25, %v1662_v22  ;;  %v2119_v47 = vadd.f32 %v2088_v15, %v1890_v40  ;;  %v7110_v25 = vld [vmem:[#allocation22_spill] sm:$0xff] }
 0x1fb   :  { %v6309_v58 = vadd.f32 %v6154_v9, %v2342_v50  ;;  %v2345_v56 = vadd.f32 %v4742_v10, %v2116_v54  ;;  %v2387_v51 = vsel %vm2373_vm4, %v6306_v4, 0.0  ;;  %v2122_v37 = vadd.f32 %v4725_v1, %v1893_v21  ;;  %2911 = vrot.lane.b32.xlu1 %v7110_v25, %s5094_s6  ;;  %3050 = vrot.lane.b32.xlu0 %v7110_v25, %s5095_s7 }
 0x1fc   :  { %v2384_v27 = vadd.f32 %v2383_v0, %v2382_v57  ;;  %v2297_v63 = vpop.f32.mrf.mxu0  ;;  %v2121_v54 = vadd.f32 %v2098_v24, %v1892_v62 }
 0x1fd   :  { %v2385_v28 = vsel %vm2373_vm4, %v6309_v58, 0.0  ;;  %v2344_v41 = vadd.f32 %v2297_v63, %v2115_v11  ;;  %v6322_v8 = vadd.f32 %v6154_v9, %v2345_v56 }
 0x1fe   :  { %v2386_v12 = vadd.f32 %v2385_v28, %v2384_v27  ;;  %v4745_v20 = vpop.f32.mrf.mxu0 }
 0x1ff   :  { %v6325_v23 = vadd.f32 %v6154_v9, %v2344_v41  ;;  %v2347_v59 = vadd.f32 %v4745_v20, %v2118_v36  ;;  %v2391_v3 = vsel %vm2373_vm4, %v6322_v8, 0.0  ;;  %3189 = vrot.lane.b32.xlu1 %v7110_v25, %s5097_s8  ;;  %3328 = vrot.lane.b32.xlu0 %v7110_v25, %s5098_s9 }
 0x200   :  { %v2388_v53 = vadd.f32 %v2387_v51, %v2386_v12  ;;  %v2307_v46 = vpop.f32.mrf.mxu0 }
 0x201   :  { %v2389_v39 = vsel %vm2373_vm4, %v6325_v23, 0.0  ;;  %v2346_v34 = vadd.f32 %v2307_v46, %v2117_v48  ;;  %v2368_v30 = vadd.f32 %v6154_v9, %v2347_v59 }
 0x202   :  { %v2390_v2 = vadd.f32 %v2389_v39, %v2388_v53  ;;  %v4748_v52 = vpop.f32.mrf.mxu0 }
 0x203   :  { %v2367_v17 = vadd.f32 %v6154_v9, %v2346_v34  ;;  %v2349_v13 = vadd.f32 %v4748_v52, %v2120_v32  ;;  %v2395_v61 = vsel %vm2373_vm4, %v2368_v30, 0.0  ;;  %3607 = vrot.lane.b32.xlu0 %v7110_v25, %s5100_s14 }
 0x204   :  { %v2392_v6 = vadd.f32 %v2391_v3, %v2390_v2  ;;  %v2317_v44 = vpop.f32.mrf.mxu0 }
 0x205   :  { %v2393_v50 = vsel %vm2373_vm4, %v2367_v17, 0.0  ;;  %v2348_v31 = vadd.f32 %v2317_v44, %v2119_v47  ;;  %v2370_v57 = vadd.f32 %v6154_v9, %v2349_v13 }
 0x206   :  { %v2394_v29 = vadd.f32 %v2393_v50, %v2392_v6  ;;  %v4751_v18 = vpop.f32.mrf.mxu0 }
 0x207   :  { %v2369_v10 = vadd.f32 %v6154_v9, %v2348_v31  ;;  %v2351_v11 = vadd.f32 %v4751_v18, %v2122_v37  ;;  %v2399_v49 = vsel %vm2373_vm4, %v2370_v57, 0.0 }
 0x208   :  { %v2396_v0 = vadd.f32 %v2395_v61, %v2394_v29  ;;  %v2327_v56 = vpop.f32.mrf.mxu0 }
 0x209   :  { %v2397_v38 = vsel %vm2373_vm4, %v2369_v10, 0.0  ;;  %v2350_v33 = vadd.f32 %v2327_v56, %v2121_v54  ;;  %v2372_v27 = vadd.f32 %v6154_v9, %v2351_v11 }
 0x20a   :  { %v2398_v42 = vadd.f32 %v2397_v38, %v2396_v0 }
 0x20b   :  { %v2371_v63 = vadd.f32 %v6154_v9, %v2350_v33  ;;  %v2403_v41 = vsel %vm2373_vm4, %v2372_v27, 0.0 }
 0x20c   :  { %v2400_v15 = vadd.f32 %v2399_v49, %v2398_v42 }
 0x20d   :  { %v2401_v60 = vsel %vm2373_vm4, %v2371_v63, 0.0 }
 0x20e   :  { %v2402_v28 = vadd.f32 %v2401_v60, %v2400_v15 }
 0x210   :  { %v2404_v36 = vadd.f32 %v2403_v41, %v2402_v28 }
 0x212   :  { %v2405_v40 = vrot.slane %v2404_v36, 4 }
 0x214   :  { %v2406_v43 = vadd.f32 %v2405_v40, %v2404_v36 }
 0x216   :  { %v2407_v35 = vrot.slane %v2406_v43, 2 }
 0x218   :  { %v2408_v9 = vadd.f32 %v2407_v35, %v2406_v43 }
 0x21a   :  { %v2409_v12 = vrot.slane %v2408_v9, 1 }
 0x21c   :  { %v2410_v20 = vadd.f32 %v2409_v12, %v2408_v9 }
 0x21e   :  { %v2412_v48 = vmul.f32 0.0078125, %v2410_v20 }
 0x220   :  { %v6353_v1 = vsub.f32 %v6183_v45, %v2412_v48  ;;  %v6356_v51 = vsub.f32 %v6168_v55, %v2412_v48  ;;  %v6359_v59 = vsub.f32 %v6203_v16, %v2412_v48  ;;  %v6362_v5 = vsub.f32 %v6200_v26, %v2412_v48 }
 0x221   :  { %v6365_v22 = vsub.f32 %v6289_v19, %v2412_v48  ;;  %v6368_v53 = vsub.f32 %v6286_v14, %v2412_v48  ;;  %v6371_v46 = vsub.f32 %v6309_v58, %v2412_v48  ;;  %v6374_v45 = vsub.f32 %v6306_v4, %v2412_v48 }
 0x222   :  { %v6377_v55 = vsub.f32 %v6325_v23, %v2412_v48  ;;  %v6380_v16 = vsub.f32 %v6322_v8, %v2412_v48  ;;  %v6382_v26 = vsub.f32 %v2367_v17, %v2412_v48  ;;  %v6384_v21 = vsub.f32 %v2368_v30, %v2412_v48 }
 0x223   :  { %v6386_v19 = vsub.f32 %v2369_v10, %v2412_v48  ;;  %v6388_v14 = vsub.f32 %v2370_v57, %v2412_v48  ;;  %v6390_v39 = vsub.f32 %v2371_v63, %v2412_v48  ;;  %v6392_v58 = vsub.f32 %v2372_v27, %v2412_v48 }
 0x224   :  { %v2429_v4 = vmul.f32 %v6353_v1, %v6353_v1  ;;  %v2430_v23 = vmul.f32 %v6356_v51, %v6356_v51  ;;  %v2431_v8 = vmul.f32 %v6359_v59, %v6359_v59  ;;  %v2432_v34 = vmul.f32 %v6362_v5, %v6362_v5 }
 0x225   :  { %v2433_v52 = vmul.f32 %v6365_v22, %v6365_v22  ;;  %v2434_v3 = vmul.f32 %v6368_v53, %v6368_v53  ;;  %v2435_v13 = vmul.f32 %v6371_v46, %v6371_v46  ;;  %v2436_v37 = vmul.f32 %v6374_v45, %v6374_v45 }
 0x226   :  { %v2445_v32 = vsel %vm2373_vm4, %v2429_v4, 0.0  ;;  %v2446_v62 = vsel %vm2373_vm4, %v2430_v23, 0.0  ;;  %v2448_v47 = vsel %vm2373_vm4, %v2431_v8, 0.0  ;;  %v2450_v30 = vsel %vm2373_vm4, %v2432_v34, 0.0 }
 0x227   :  { %v2447_v2 = vadd.f32 %v2446_v62, %v2445_v32  ;;  %v2452_v6 = vsel %vm2373_vm4, %v2433_v52, 0.0  ;;  %v2454_v50 = vsel %vm2373_vm4, %v2434_v3, 0.0  ;;  %v2437_v54 = vmul.f32 %v6377_v55, %v6377_v55 }
 0x228   :  { %v2456_v29 = vsel %vm2373_vm4, %v2435_v13, 0.0  ;;  %v2438_v61 = vmul.f32 %v6380_v16, %v6380_v16  ;;  %v2458_v57 = vsel %vm2373_vm4, %v2436_v37, 0.0  ;;  %v2439_v11 = vmul.f32 %v6382_v26, %v6382_v26 }
 0x229   :  { %v2449_v24 = vadd.f32 %v2448_v47, %v2447_v2  ;;  %v2460_v0 = vsel %vm2373_vm4, %v2437_v54, 0.0  ;;  %v2440_v38 = vmul.f32 %v6384_v21, %v6384_v21  ;;  %v2441_v49 = vmul.f32 %v6386_v19, %v6386_v19 }
 0x22a   :  { %v2462_v33 = vsel %vm2373_vm4, %v2438_v61, 0.0  ;;  %v2464_v27 = vsel %vm2373_vm4, %v2439_v11, 0.0  ;;  %v2442_v15 = vmul.f32 %v6388_v14, %v6388_v14  ;;  %v2443_v41 = vmul.f32 %v6390_v39, %v6390_v39 }
 0x22b   :  { %v2451_v17 = vadd.f32 %v2450_v30, %v2449_v24  ;;  %v2466_v60 = vsel %vm2373_vm4, %v2440_v38, 0.0  ;;  %v2468_v36 = vsel %vm2373_vm4, %v2441_v49, 0.0  ;;  %v2444_v43 = vmul.f32 %v6392_v58, %v6392_v58 }
 0x22c   :  { %v2470_v35 = vsel %vm2373_vm4, %v2442_v15, 0.0  ;;  %v2472_v12 = vsel %vm2373_vm4, %v2443_v41, 0.0 }
 0x22d   :  { %v2453_v44 = vadd.f32 %v2452_v6, %v2451_v17  ;;  %v2474_v48 = vsel %vm2373_vm4, %v2444_v43, 0.0  ;;  %v4057_v6 = vld [vmem:[%s7049_s2 + $0x1] ss:$0 sm:$0xff] }
 0x22f   :  { %v2455_v31 = vadd.f32 %v2454_v50, %v2453_v44 }
 0x231   :  { %v2457_v18 = vadd.f32 %v2456_v29, %v2455_v31 }
 0x233   :  { %v2459_v10 = vadd.f32 %v2458_v57, %v2457_v18 }
 0x235   :  { %v2461_v56 = vadd.f32 %v2460_v0, %v2459_v10 }
 0x237   :  { %v2463_v42 = vadd.f32 %v2462_v33, %v2461_v56 }
 0x239   :  { %v2465_v63 = vadd.f32 %v2464_v27, %v2463_v42 }
 0x23b   :  { %v2467_v28 = vadd.f32 %v2466_v60, %v2465_v63 }
 0x23d   :  { %v2469_v40 = vadd.f32 %v2468_v36, %v2467_v28 }
 0x23f   :  { %v2471_v9 = vadd.f32 %v2470_v35, %v2469_v40 }
 0x241   :  { %v2473_v20 = vadd.f32 %v2472_v12, %v2471_v9 }
 0x243   :  { %v2475_v4 = vadd.f32 %v2474_v48, %v2473_v20 }
 0x245   :  { %v2476_v23 = vrot.slane %v2475_v4, 4 }
 0x247   :  { %v2477_v8 = vadd.f32 %v2476_v23, %v2475_v4 }
 0x249   :  { %v2478_v34 = vrot.slane %v2477_v8, 2 }
 0x24b   :  { %v2479_v32 = vadd.f32 %v2478_v34, %v2477_v8 }
 0x24d   :  { %v2480_v62 = vrot.slane %v2479_v32, 1 }
 0x24f   :  { %v2481_v2 = vadd.f32 %v2480_v62, %v2479_v32 }
 0x251   :  { %v2482_v52 = vmul.f32 0.0078125, %v2481_v2 }
 0x253   :  { %v2483_v47 = vadd.f32 1e-05, %v2482_v52 }
 0x255   :  { %5086 = vrsqrt.f32 %v2483_v47 }
 0x262   :  { %v5087_v24 = vpop.eup %5086 }
 0x263   :  { %v6449_v3 = vmul.f32 %v5087_v24, %v6353_v1  ;;  %v6452_v30 = vmul.f32 %v5087_v24, %v6356_v51  ;;  %v2487_v17 = vmul.f32 %v5087_v24, %v6359_v59  ;;  %v2488_v13 = vmul.f32 %v5087_v24, %v6362_v5 }
 0x264   :  { %v2489_v44 = vmul.f32 %v5087_v24, %v6365_v22  ;;  %v2490_v37 = vmul.f32 %v5087_v24, %v6368_v53  ;;  %v2491_v50 = vmul.f32 %v5087_v24, %v6371_v46  ;;  %v2492_v1 = vmul.f32 %v5087_v24, %v6374_v45  ;;  %v4058_v46 = vld [vmem:[%s7049_s2 + $0x2] ss:$0 sm:$0xff]  ;;  %s5099_s2 = smov 80  }
 0x265   :  { %v2493_v31 = vmul.f32 %v5087_v24, %v6377_v55  ;;  %v2494_v51 = vmul.f32 %v5087_v24, %v6380_v16  ;;  %v2495_v59 = vmul.f32 %v5087_v24, %v6382_v26  ;;  %v2496_v5 = vmul.f32 %v5087_v24, %v6384_v21  ;;  %3468 = vrot.lane.b32.xlu1 %v7110_v25, %s5099_s2 }
 0x266   :  { %v2497_v54 = vmul.f32 %v5087_v24, %v6386_v19  ;;  %v2498_v29 = vmul.f32 %v5087_v24, %v6388_v14  ;;  %v2499_v22 = vmul.f32 %v5087_v24, %v6390_v39  ;;  %v2500_v53 = vmul.f32 %v5087_v24, %v6392_v58 }
 0x267   :  { %v2509_v45 = vmul.f32 %v4057_v6, %v2488_v13  ;;  %v2510_v55 = vmul.f32 %v4057_v6, %v2489_v44  ;;  %v2511_v18 = vmul.f32 %v4057_v6, %v2490_v37  ;;  %v2512_v16 = vmul.f32 %v4057_v6, %v2491_v50 }
 0x268   :  { %v2513_v61 = vmul.f32 %v4057_v6, %v2492_v1  ;;  %v2514_v26 = vmul.f32 %v4057_v6, %v2493_v31  ;;  %v2515_v57 = vmul.f32 %v4057_v6, %v2494_v51  ;;  %v2516_v21 = vmul.f32 %v4057_v6, %v2495_v59 }
 0x269   :  { %v2517_v10 = vmul.f32 %v4057_v6, %v2496_v5  ;;  %v2518_v19 = vmul.f32 %v4057_v6, %v2497_v54  ;;  %v2519_v11 = vmul.f32 %v4057_v6, %v2498_v29  ;;  %v2520_v14 = vmul.f32 %v4057_v6, %v2499_v22 }
 0x26a   :  { %v2521_v0 = vmul.f32 %v4057_v6, %v2500_v53  ;;  %v2532_v39 = vadd.f32 %v4058_v46, %v2511_v18  ;;  %v2533_v56 = vadd.f32 %v4058_v46, %v2512_v16  ;;  %v2534_v58 = vadd.f32 %v4058_v46, %v2513_v61 }
 0x26b   :  { %v2535_v38 = vadd.f32 %v4058_v46, %v2514_v26  ;;  %v2536_v33 = vadd.f32 %v4058_v46, %v2515_v57  ;;  %v2537_v42 = vadd.f32 %v4058_v46, %v2516_v21  ;;  %v2538_v49 = vadd.f32 %v4058_v46, %v2517_v10 }
 0x26c   :  { %v2539_v27 = vadd.f32 %v4058_v46, %v2518_v19  ;;  %v2540_v63 = vadd.f32 %v4058_v46, %v2519_v11  ;;  %v2541_v15 = vadd.f32 %v4058_v46, %v2520_v14  ;;  %v2542_v60 = vadd.f32 %v4058_v46, %v2521_v0 }
 0x26d   :  { %v2548_v28 = vmax.f32 %v2532_v39, 0.0  ;;  %v2549_v41 = vmax.f32 %v2533_v56, 0.0  ;;  %v2550_v36 = vmax.f32 %v2534_v58, 0.0  ;;  %v2551_v40 = vmax.f32 %v2535_v38, 0.0  ;;  %v2636_v38 = vld [vmem:[#allocation3 + $0x1] sm:$0xff] }
 0x26e   :  { %v2552_v43 = vmax.f32 %v2536_v33, 0.0  ;;  %v2553_v35 = vmax.f32 %v2537_v42, 0.0  ;;  %v2554_v9 = vmax.f32 %v2538_v49, 0.0  ;;  %v2555_v12 = vmax.f32 %v2539_v27, 0.0  ;;  %v2619_v33 = vld [vmem:[#allocation3] sm:$0xff]  ;;  %v2654_v42 = vpop.permute.xlu0 %2653 }
 0x26f   :  { %v2556_v20 = vmax.f32 %v2540_v63, 0.0  ;;  %v2557_v48 = vmax.f32 %v2541_v15, 0.0  ;;  %v2558_v4 = vmax.f32 %v2542_v60, 0.0  ;;  %2610 = vst.msk [vmem:[#allocation3 + $0x81] sm:$0xff] %vm2373_vm4, %v2550_v36  ;;  %2611 = vst.msk [vmem:[#allocation3 + $0xb1] sm:$0xff] %vm2373_vm4, %v2551_v40  ;;  %v2531_v23 = vadd.f32 %v4058_v46, %v2510_v55  ;;  %v2627_v55 = vld [vmem:[#allocation3 + $0xa0] sm:$0xff] }
 0x270   :  { %2608 = vst.msk [vmem:[#allocation3 + $0x61] sm:$0xff] %vm2373_vm4, %v2548_v28  ;;  %2609 = vst.msk [vmem:[#allocation3 + $0x71] sm:$0xff] %vm2373_vm4, %v2549_v41  ;;  %v2530_v8 = vadd.f32 %v4058_v46, %v2509_v45  ;;  %v2508_v34 = vmul.f32 %v4057_v6, %v2487_v17  ;;  %v2507_v32 = vmul.f32 %v4057_v6, %v6452_v30  ;;  %v2644_v45 = vld [vmem:[#allocation3 + $0xa1] sm:$0xff] }
 0x271   :  { %2612 = vst.msk [vmem:[#allocation3 + $0xc1] sm:$0xff] %vm2373_vm4, %v2552_v43  ;;  %2613 = vst.msk [vmem:[#allocation3 + $0xd1] sm:$0xff] %vm2373_vm4, %v2553_v35  ;;  %v2506_v62 = vmul.f32 %v4057_v6, %v6449_v3  ;;  %v2547_v2 = vmax.f32 %v2531_v23, 0.0  ;;  %v5090_v15 = vld [vmem:[%s7048_s3] sm:$0xff] }
 0x272   :  { %2614 = vst.msk [vmem:[#allocation3 + $0xe1] sm:$0xff] %vm2373_vm4, %v2554_v9  ;;  %2615 = vst.msk [vmem:[#allocation3 + $0xf1] sm:$0xff] %vm2373_vm4, %v2555_v12  ;;  %v2546_v52 = vmax.f32 %v2530_v8, 0.0  ;;  %v2529_v47 = vadd.f32 %v4058_v46, %v2508_v34  ;;  %v2528_v24 = vadd.f32 %v4058_v46, %v2507_v32  ;;  %3746 = vrot.lane.b32.xlu1 %v5090_v15, %s5101_s22  ;;  %v2903_v40 = vld [vmem:[#allocation3 + $0xa2] sm:$0xff]  ;;  %v2912_v34 = vpop.permute.xlu1 %2911  ;;  %v3051_v32 = vpop.permute.xlu0 %3050 }
 0x273   :  { %2616 = vst.msk [vmem:[#allocation3 + $0x101] sm:$0xff] %vm2373_vm4, %v2556_v20  ;;  %2617 = vst.msk [vmem:[#allocation3 + $0x111] sm:$0xff] %vm2373_vm4, %v2557_v48  ;;  %v2527_v13 = vadd.f32 %v4058_v46, %v2506_v62  ;;  %v2895_v8 = vld [vmem:[#allocation3 + $0x2] sm:$0xff] }
 0x274   :  { %2618 = vst.msk [vmem:[#allocation3 + $0x121] sm:$0xff] %vm2373_vm4, %v2558_v4  ;;  %2607 = vst.msk [vmem:[#allocation3 + $0x51] sm:$0xff] %vm2373_vm4, %v2547_v2  ;;  %v2545_v17 = vmax.f32 %v2529_v47, 0.0  ;;  %v2544_v44 = vmax.f32 %v2528_v24, 0.0 }
 0x275   :  { %2606 = vst.msk [vmem:[#allocation3 + $0x41] sm:$0xff] %vm2373_vm4, %v2546_v52  ;;  %v2543_v30 = vmax.f32 %v2527_v13, 0.0 }
 0x276   :  { %2605 = vst.msk [vmem:[#allocation3 + $0x31] sm:$0xff] %vm2373_vm4, %v2545_v17  ;;  %2604 = vst.msk [vmem:[#allocation3 + $0x21] sm:$0xff] %vm2373_vm4, %v2544_v44  ;;  %v6554_v53 = vld [vmem:[#allocation3 + $0xb1] sm:$0xff]  ;;  %v6717_v35 = vld [vmem:[#allocation3 + $0x80] sm:$0xff]  ;;  %v3190_v24 = vpop.permute.xlu1 %3189  ;;  %v3329_v13 = vpop.permute.xlu0 %3328 }
 0x277   :  { %2603 = vst.msk [vmem:[#allocation3 + $0x11] sm:$0xff] %vm2373_vm4, %v2543_v30  ;;  %v6556_v46 = vld [vmem:[#allocation3 + $0xb0] sm:$0xff]  ;;  %v6578_v61 = vld [vmem:[#allocation3 + $0x61] sm:$0xff] }
 0x278   :  { %v6534_v5 = vld [vmem:[#allocation3 + $0xd1] sm:$0xff]  ;;  %v6544_v29 = vld [vmem:[#allocation3 + $0xc1] sm:$0xff] }
 0x279   :  { %v6512_v1 = vld [vmem:[#allocation3 + $0xf1] sm:$0xff]  ;;  %v6523_v51 = vld [vmem:[#allocation3 + $0xe1] sm:$0xff] }
 0x27a   :  { %v6492_v3 = vld [vmem:[#allocation3 + $0x111] sm:$0xff]  ;;  %v6502_v37 = vld [vmem:[#allocation3 + $0x101] sm:$0xff] }
 0x27b   :  { %v6494_v6 = vld [vmem:[#allocation3 + $0x110] sm:$0xff]  ;;  %4753 = vmatpush3.xpose.msk.msra.mxu1 %vm2373_vm4, %v6492_v3  ;;  %v6504_v50 = vld [vmem:[#allocation3 + $0x100] sm:$0xff] }
 0x27c   :  { %4788 = vmatpush3.xpose.msk.msra.mxu0 %vm2373_vm4, %v6494_v6  ;;  %4754 = vmatprep.subr.mxu1 %v7093_v7  ;;  %v6514_v31 = vld [vmem:[#allocation3 + $0xf0] sm:$0xff]  ;;  %v6525_v59 = vld [vmem:[#allocation3 + $0xe0] sm:$0xff] }
 0x27d   :  { %4789 = vmatprep.subr.mxu0 %v7093_v7  ;;  %v6536_v54 = vld [vmem:[#allocation3 + $0xd0] sm:$0xff]  ;;  %v6546_v22 = vld [vmem:[#allocation3 + $0xc0] sm:$0xff] }
 0x27e   :  { %v6568_v18 = vld [vmem:[#allocation3 + $0x71] sm:$0xff]  ;;  %v6580_v26 = vld [vmem:[#allocation3 + $0x60] sm:$0xff] }
 0x27f   :  { %4755 = vmatpush3.xpose.msk.msra.mxu1 %vm2373_vm4, %v6502_v37  ;;  %v6570_v16 = vld [vmem:[#allocation3 + $0x70] sm:$0xff]  ;;  %v6598_v10 = vld [vmem:[#allocation3 + $0x41] sm:$0xff] }
 0x280   :  { %4790 = vmatpush3.xpose.msk.msra.mxu0 %vm2373_vm4, %v6504_v50  ;;  %4756 = vmatprep.subr.mxu1 %v7093_v7  ;;  %v6588_v57 = vld [vmem:[#allocation3 + $0x51] sm:$0xff]  ;;  %v6600_v19 = vld [vmem:[#allocation3 + $0x40] sm:$0xff] }
 0x281   :  { %4791 = vmatprep.subr.mxu0 %v7093_v7  ;;  %v6590_v21 = vld [vmem:[#allocation3 + $0x50] sm:$0xff]  ;;  %v6618_v0 = vld [vmem:[#allocation3 + $0x21] sm:$0xff] }
 0x282   :  { %v6608_v11 = vld [vmem:[#allocation3 + $0x31] sm:$0xff]  ;;  %v6620_v39 = vld [vmem:[#allocation3 + $0x20] sm:$0xff] }
 0x283   :  { %4757 = vmatpush3.xpose.msk.msra.mxu1 %vm2373_vm4, %v6512_v1  ;;  %v6610_v14 = vld [vmem:[#allocation3 + $0x30] sm:$0xff]  ;;  %v6647_v27 = vld [vmem:[#allocation3 + $0x120] sm:$0xff] }
 0x284   :  { %4792 = vmatpush3.xpose.msk.msra.mxu0 %vm2373_vm4, %v6514_v31  ;;  %4758 = vmatprep.subr.mxu1 %v7093_v7  ;;  %v6628_v56 = vld [vmem:[#allocation3 + $0x11] sm:$0xff]  ;;  %v6678_v60 = vld [vmem:[#allocation3 + $0xe2] sm:$0xff] }
 0x285   :  { %4793 = vmatprep.subr.mxu0 %v7093_v7  ;;  %v6630_v58 = vld [vmem:[#allocation3 + $0x10] sm:$0xff]  ;;  %v6694_v41 = vld [vmem:[#allocation3 + $0xc2] sm:$0xff] }
 0x286   :  { %v6645_v49 = vld [vmem:[#allocation3 + $0x112] sm:$0xff]  ;;  %v6725_v9 = vld [vmem:[#allocation3 + $0x62] sm:$0xff] }
 0x287   :  { %4759 = vmatpush3.xpose.msk.msra.mxu1 %vm2373_vm4, %v6523_v51  ;;  %v6667_v63 = vld [vmem:[#allocation3 + $0xf2] sm:$0xff]  ;;  %v6741_v20 = vld [vmem:[#allocation3 + $0x42] sm:$0xff] }
 0x288   :  { %4794 = vmatpush3.xpose.msk.msra.mxu0 %vm2373_vm4, %v6525_v59  ;;  %4760 = vmatprep.subr.mxu1 %v7093_v7  ;;  %v6686_v28 = vld [vmem:[#allocation3 + $0xd2] sm:$0xff]  ;;  %v6757_v4 = vld [vmem:[#allocation3 + $0x22] sm:$0xff] }
 0x289   :  { %4795 = vmatprep.subr.mxu0 %v7093_v7  ;;  %v6702_v36 = vld [vmem:[#allocation3 + $0xb2] sm:$0xff]  ;;  %v6780_v62 = vld [vmem:[#allocation3 + $0x121] sm:$0xff] }
 0x28a   :  { %v6715_v43 = vld [vmem:[#allocation3 + $0x72] sm:$0xff]  ;;  %v6782_v2 = vld [vmem:[#allocation3 + $0x122] sm:$0xff] }
 0x28b   :  { %4761 = vmatpush3.xpose.msk.msra.mxu1 %vm2373_vm4, %v6534_v5  ;;  %v6733_v12 = vld [vmem:[#allocation3 + $0x52] sm:$0xff]  ;;  %v6836_v52 = vld [vmem:[#allocation3 + $0x81] sm:$0xff] }
 0x28c   :  { %4796 = vmatpush3.xpose.msk.msra.mxu0 %vm2373_vm4, %v6536_v54  ;;  %4762 = vmatprep.subr.mxu1 %v7093_v7  ;;  %v6749_v48 = vld [vmem:[#allocation3 + $0x32] sm:$0xff]  ;;  %v6838_v47 = vld [vmem:[#allocation3 + $0x82] sm:$0xff] }
 0x28d   :  { %4797 = vmatprep.subr.mxu0 %v7093_v7  ;;  %v6765_v23 = vld [vmem:[#allocation3 + $0x12] sm:$0xff] }
 0x28e   :  { %v3467_v17 = vld [vmem:[#allocation3 + $0x130] sm:$0xff] }
 0x28f   :  { %4763 = vmatpush3.xpose.msk.msra.mxu1 %vm2373_vm4, %v6544_v29  ;;  %v3606_v44 = vld [vmem:[#allocation3 + $0x131] sm:$0xff] }
 0x290   :  { %4798 = vmatpush3.xpose.msk.msra.mxu0 %vm2373_vm4, %v6546_v22  ;;  %4764 = vmatprep.subr.mxu1 %v7093_v7  ;;  %v3459_v30 = vld [vmem:[#allocation3 + $0x90] sm:$0xff] }
 0x291   :  { %4799 = vmatprep.subr.mxu0 %v7093_v7 }
 0x293   :  { %4765 = vmatpush3.xpose.msk.msra.mxu1 %vm2373_vm4, %v6554_v53 }
 0x294   :  { %4800 = vmatpush3.xpose.msk.msra.mxu0 %vm2373_vm4, %v6556_v46  ;;  %4766 = vmatprep.subr.mxu1 %v7093_v7 }
 0x295   :  { %4801 = vmatprep.subr.mxu0 %v7093_v7 }
 0x297   :  { %4767 = vmatpush3.xpose.msk.msra.mxu1 %vm2373_vm4, %v2644_v45 }
 0x298   :  { %4802 = vmatpush3.xpose.msk.msra.mxu0 %vm2373_vm4, %v2627_v55  ;;  %4768 = vmatprep.subr.mxu1 %v7093_v7 }
 0x299   :  { %4803 = vmatprep.subr.mxu0 %v7093_v7 }
 0x29b   :  { %4769 = vmatpush3.xpose.msk.msra.mxu1 %vm2373_vm4, %v6568_v18 }
 0x29c   :  { %4804 = vmatpush3.xpose.msk.msra.mxu0 %vm2373_vm4, %v6570_v16  ;;  %4770 = vmatprep.subr.mxu1 %v7093_v7 }
 0x29d   :  { %4805 = vmatprep.subr.mxu0 %v7093_v7 }
 0x29f   :  { %4771 = vmatpush3.xpose.msk.msra.mxu1 %vm2373_vm4, %v6578_v61 }
 0x2a0   :  { %4806 = vmatpush3.xpose.msk.msra.mxu0 %vm2373_vm4, %v6580_v26  ;;  %4772 = vmatprep.subr.mxu1 %v7093_v7 }
 0x2a1   :  { %4807 = vmatprep.subr.mxu0 %v7093_v7 }
 0x2a3   :  { %4773 = vmatpush3.xpose.msk.msra.mxu1 %vm2373_vm4, %v6588_v57 }
 0x2a4   :  { %4808 = vmatpush3.xpose.msk.msra.mxu0 %vm2373_vm4, %v6590_v21  ;;  %4774 = vmatprep.subr.mxu1 %v7093_v7 }
 0x2a5   :  { %4809 = vmatprep.subr.mxu0 %v7093_v7 }
 0x2a7   :  { %4775 = vmatpush3.xpose.msk.msra.mxu1 %vm2373_vm4, %v6598_v10 }
 0x2a8   :  { %4810 = vmatpush3.xpose.msk.msra.mxu0 %vm2373_vm4, %v6600_v19  ;;  %4776 = vmatprep.subr.mxu1 %v7093_v7 }
 0x2a9   :  { %4811 = vmatprep.subr.mxu0 %v7093_v7 }
 0x2ab   :  { %4777 = vmatpush3.xpose.msk.msra.mxu1 %vm2373_vm4, %v6608_v11 }
 0x2ac   :  { %4812 = vmatpush3.xpose.msk.msra.mxu0 %vm2373_vm4, %v6610_v14  ;;  %4778 = vmatprep.subr.mxu1 %v7093_v7 }
 0x2ad   :  { %4813 = vmatprep.subr.mxu0 %v7093_v7 }
 0x2af   :  { %4779 = vmatpush3.xpose.msk.msra.mxu1 %vm2373_vm4, %v6618_v0 }
 0x2b0   :  { %4814 = vmatpush3.xpose.msk.msra.mxu0 %vm2373_vm4, %v6620_v39  ;;  %4780 = vmatprep.subr.mxu1 %v7093_v7 }
 0x2b1   :  { %4815 = vmatprep.subr.mxu0 %v7093_v7 }
 0x2b3   :  { %4781 = vmatpush3.xpose.msk.msra.mxu1 %vm2373_vm4, %v6628_v56 }
 0x2b4   :  { %4816 = vmatpush3.xpose.msk.msra.mxu0 %vm2373_vm4, %v6630_v58  ;;  %4782 = vmatprep.subr.mxu1 %v7093_v7 }
 0x2b5   :  { %4817 = vmatprep.subr.mxu0 %v7093_v7 }
 0x2b7   :  { %4783 = vmatpush3.xpose.msk.msra.mxu1 %vm2373_vm4, %v2636_v38 }
 0x2b8   :  { %4818 = vmatpush3.xpose.msk.msra.mxu0 %vm2373_vm4, %v2619_v33  ;;  %4822 = vmatprep.subr.mxu1 %v7093_v7 }
 0x2b9   :  { %4857 = vmatprep.subr.mxu0 %v7093_v7 }
 0x2ba   :  { %4785 = vmatmul.mubr.msk.f32.vlgmr.msra.gmra.mxu1 %vm2373_vm4, %v2654_v42 }
 0x2bb   :  { %4820 = vmatmul.mubr.msk.f32.vlgmr.msra.gmra.mxu0 %vm2373_vm4, %v7110_v25  ;;  %4823 = vmatpush3.xpose.msk.msra.mxu1 %vm2373_vm4, %v6645_v49  ;;  %v6659_v25 = vld [vmem:[#allocation3 + $0x102] sm:$0xff] }
 0x2bc   :  { %4858 = vmatpush3.xpose.msk.msra.mxu0 %vm2373_vm4, %v6647_v27  ;;  %4824 = vmatprep.subr.mxu1 %v7093_v7 }
 0x2bd   :  { %4859 = vmatprep.subr.mxu0 %v7093_v7  ;;  %4854 = vmatprep.mubr.msk.f32.mxu1 %vm5096_vm7, %v7093_v7 }
 0x2be   :  { %4889 = vmatprep.mubr.msk.f32.mxu0 %vm5096_vm7, %v7093_v7 }
 0x2bf   :  { %4825 = vmatpush3.xpose.msk.msra.mxu1 %vm2373_vm4, %v6659_v25 }
 0x2c0   :  { %4860 = vmatpush3.xpose.msk.msra.mxu0 %vm2373_vm4, %v6494_v6  ;;  %4826 = vmatprep.subr.mxu1 %v7093_v7 }
 0x2c1   :  { %4861 = vmatprep.subr.mxu0 %v7093_v7 }
 0x2c3   :  { %4827 = vmatpush3.xpose.msk.msra.mxu1 %vm2373_vm4, %v6667_v63 }
 0x2c4   :  { %4862 = vmatpush3.xpose.msk.msra.mxu0 %vm2373_vm4, %v6504_v50  ;;  %4828 = vmatprep.subr.mxu1 %v7093_v7 }
 0x2c5   :  { %4863 = vmatprep.subr.mxu0 %v7093_v7 }
 0x2c7   :  { %4829 = vmatpush3.xpose.msk.msra.mxu1 %vm2373_vm4, %v6678_v60 }
 0x2c8   :  { %4864 = vmatpush3.xpose.msk.msra.mxu0 %vm2373_vm4, %v6514_v31  ;;  %4830 = vmatprep.subr.mxu1 %v7093_v7 }
 0x2c9   :  { %4865 = vmatprep.subr.mxu0 %v7093_v7 }
 0x2cb   :  { %4831 = vmatpush3.xpose.msk.msra.mxu1 %vm2373_vm4, %v6686_v28 }
 0x2cc   :  { %4866 = vmatpush3.xpose.msk.msra.mxu0 %vm2373_vm4, %v6525_v59  ;;  %4832 = vmatprep.subr.mxu1 %v7093_v7 }
 0x2cd   :  { %4867 = vmatprep.subr.mxu0 %v7093_v7 }
 0x2cf   :  { %4833 = vmatpush3.xpose.msk.msra.mxu1 %vm2373_vm4, %v6694_v41 }
 0x2d0   :  { %4868 = vmatpush3.xpose.msk.msra.mxu0 %vm2373_vm4, %v6536_v54  ;;  %4834 = vmatprep.subr.mxu1 %v7093_v7 }
 0x2d1   :  { %4869 = vmatprep.subr.mxu0 %v7093_v7 }
 0x2d3   :  { %4835 = vmatpush3.xpose.msk.msra.mxu1 %vm2373_vm4, %v6702_v36 }
 0x2d4   :  { %4870 = vmatpush3.xpose.msk.msra.mxu0 %vm2373_vm4, %v6546_v22  ;;  %4836 = vmatprep.subr.mxu1 %v7093_v7 }
 0x2d5   :  { %4871 = vmatprep.subr.mxu0 %v7093_v7 }
 0x2d7   :  { %4837 = vmatpush3.xpose.msk.msra.mxu1 %vm2373_vm4, %v2903_v40 }
 0x2d8   :  { %4872 = vmatpush3.xpose.msk.msra.mxu0 %vm2373_vm4, %v6556_v46  ;;  %4838 = vmatprep.subr.mxu1 %v7093_v7 }
 0x2d9   :  { %4873 = vmatprep.subr.mxu0 %v7093_v7 }
 0x2db   :  { %4839 = vmatpush3.xpose.msk.msra.mxu1 %vm2373_vm4, %v6715_v43 }
 0x2dc   :  { %4874 = vmatpush3.xpose.msk.msra.mxu0 %vm2373_vm4, %v6717_v35  ;;  %4840 = vmatprep.subr.mxu1 %v7093_v7 }
 0x2dd   :  { %4875 = vmatprep.subr.mxu0 %v7093_v7 }
 0x2df   :  { %4841 = vmatpush3.xpose.msk.msra.mxu1 %vm2373_vm4, %v6725_v9 }
 0x2e0   :  { %4876 = vmatpush3.xpose.msk.msra.mxu0 %vm2373_vm4, %v6570_v16  ;;  %4842 = vmatprep.subr.mxu1 %v7093_v7 }
 0x2e1   :  { %4877 = vmatprep.subr.mxu0 %v7093_v7 }
 0x2e3   :  { %4843 = vmatpush3.xpose.msk.msra.mxu1 %vm2373_vm4, %v6733_v12 }
 0x2e4   :  { %4878 = vmatpush3.xpose.msk.msra.mxu0 %vm2373_vm4, %v6580_v26  ;;  %4844 = vmatprep.subr.mxu1 %v7093_v7 }
 0x2e5   :  { %4879 = vmatprep.subr.mxu0 %v7093_v7 }
 0x2e7   :  { %4845 = vmatpush3.xpose.msk.msra.mxu1 %vm2373_vm4, %v6741_v20 }
 0x2e8   :  { %4880 = vmatpush3.xpose.msk.msra.mxu0 %vm2373_vm4, %v6590_v21  ;;  %4846 = vmatprep.subr.mxu1 %v7093_v7 }
 0x2e9   :  { %4881 = vmatprep.subr.mxu0 %v7093_v7 }
 0x2eb   :  { %4847 = vmatpush3.xpose.msk.msra.mxu1 %vm2373_vm4, %v6749_v48 }
 0x2ec   :  { %4882 = vmatpush3.xpose.msk.msra.mxu0 %vm2373_vm4, %v6600_v19  ;;  %4848 = vmatprep.subr.mxu1 %v7093_v7 }
 0x2ed   :  { %4883 = vmatprep.subr.mxu0 %v7093_v7 }
 0x2ef   :  { %4849 = vmatpush3.xpose.msk.msra.mxu1 %vm2373_vm4, %v6757_v4 }
 0x2f0   :  { %4884 = vmatpush3.xpose.msk.msra.mxu0 %vm2373_vm4, %v6610_v14  ;;  %4850 = vmatprep.subr.mxu1 %v7093_v7 }
 0x2f1   :  { %4885 = vmatprep.subr.mxu0 %v7093_v7 }
 0x2f3   :  { %4851 = vmatpush3.xpose.msk.msra.mxu1 %vm2373_vm4, %v6765_v23 }
 0x2f4   :  { %4886 = vmatpush3.xpose.msk.msra.mxu0 %vm2373_vm4, %v6620_v39  ;;  %4852 = vmatprep.subr.mxu1 %v7093_v7 }
 0x2f5   :  { %4887 = vmatprep.subr.mxu0 %v7093_v7 }
 0x2f7   :  { %4853 = vmatpush3.xpose.msk.msra.mxu1 %vm2373_vm4, %v2895_v8 }
 0x2f8   :  { %4888 = vmatpush3.xpose.msk.msra.mxu0 %vm2373_vm4, %v6630_v58  ;;  %4892 = vmatprep.subr.mxu1 %v7093_v7 }
 0x2f9   :  { %4927 = vmatprep.subr.mxu0 %v7093_v7 }
 0x2fa   :  { %4855 = vmatmul.mubr.msk.f32.vlgmr.msra.gmra.mxu1 %vm2373_vm4, %v2912_v34 }
 0x2fb   :  { %4890 = vmatmul.mubr.msk.f32.vlgmr.msra.gmra.mxu0 %vm2373_vm4, %v3051_v32  ;;  %4893 = vmatpush3.xpose.msk.msra.mxu1 %vm2373_vm4, %v6780_v62 }
 0x2fc   :  { %4928 = vmatpush3.xpose.msk.msra.mxu0 %vm2373_vm4, %v6782_v2  ;;  %4894 = vmatprep.subr.mxu1 %v7093_v7 }
 0x2fd   :  { %4929 = vmatprep.subr.mxu0 %v7093_v7  ;;  %4924 = vmatprep.mubr.msk.f32.mxu1 %vm5096_vm7, %v7093_v7 }
 0x2fe   :  { %4959 = vmatprep.mubr.msk.f32.mxu0 %vm5096_vm7, %v7093_v7 }
 0x2ff   :  { %4895 = vmatpush3.xpose.msk.msra.mxu1 %vm2373_vm4, %v6492_v3 }
 0x300   :  { %4930 = vmatpush3.xpose.msk.msra.mxu0 %vm2373_vm4, %v6645_v49  ;;  %4896 = vmatprep.subr.mxu1 %v7093_v7 }
 0x301   :  { %4931 = vmatprep.subr.mxu0 %v7093_v7 }
 0x303   :  { %4897 = vmatpush3.xpose.msk.msra.mxu1 %vm2373_vm4, %v6502_v37 }
 0x304   :  { %4932 = vmatpush3.xpose.msk.msra.mxu0 %vm2373_vm4, %v6659_v25  ;;  %4898 = vmatprep.subr.mxu1 %v7093_v7 }
 0x305   :  { %4933 = vmatprep.subr.mxu0 %v7093_v7 }
 0x307   :  { %4899 = vmatpush3.xpose.msk.msra.mxu1 %vm2373_vm4, %v6512_v1 }
 0x308   :  { %4934 = vmatpush3.xpose.msk.msra.mxu0 %vm2373_vm4, %v6667_v63  ;;  %4900 = vmatprep.subr.mxu1 %v7093_v7 }
 0x309   :  { %4935 = vmatprep.subr.mxu0 %v7093_v7 }
 0x30b   :  { %4901 = vmatpush3.xpose.msk.msra.mxu1 %vm2373_vm4, %v6523_v51 }
 0x30c   :  { %4936 = vmatpush3.xpose.msk.msra.mxu0 %vm2373_vm4, %v6678_v60  ;;  %4902 = vmatprep.subr.mxu1 %v7093_v7 }
 0x30d   :  { %4937 = vmatprep.subr.mxu0 %v7093_v7 }
 0x30f   :  { %4903 = vmatpush3.xpose.msk.msra.mxu1 %vm2373_vm4, %v6534_v5 }
 0x310   :  { %4938 = vmatpush3.xpose.msk.msra.mxu0 %vm2373_vm4, %v6686_v28  ;;  %4904 = vmatprep.subr.mxu1 %v7093_v7 }
 0x311   :  { %4939 = vmatprep.subr.mxu0 %v7093_v7 }
 0x313   :  { %4905 = vmatpush3.xpose.msk.msra.mxu1 %vm2373_vm4, %v6544_v29 }
 0x314   :  { %4940 = vmatpush3.xpose.msk.msra.mxu0 %vm2373_vm4, %v6694_v41  ;;  %4906 = vmatprep.subr.mxu1 %v7093_v7 }
 0x315   :  { %4941 = vmatprep.subr.mxu0 %v7093_v7 }
 0x317   :  { %4907 = vmatpush3.xpose.msk.msra.mxu1 %vm2373_vm4, %v6554_v53 }
 0x318   :  { %4942 = vmatpush3.xpose.msk.msra.mxu0 %vm2373_vm4, %v6702_v36  ;;  %4908 = vmatprep.subr.mxu1 %v7093_v7 }
 0x319   :  { %4943 = vmatprep.subr.mxu0 %v7093_v7 }
 0x31b   :  { %4909 = vmatpush3.xpose.msk.msra.mxu1 %vm2373_vm4, %v6836_v52 }
 0x31c   :  { %4944 = vmatpush3.xpose.msk.msra.mxu0 %vm2373_vm4, %v6838_v47  ;;  %4910 = vmatprep.subr.mxu1 %v7093_v7 }
 0x31d   :  { %4945 = vmatprep.subr.mxu0 %v7093_v7 }
 0x31f   :  { %4911 = vmatpush3.xpose.msk.msra.mxu1 %vm2373_vm4, %v6568_v18 }
 0x320   :  { %4946 = vmatpush3.xpose.msk.msra.mxu0 %vm2373_vm4, %v6715_v43  ;;  %4912 = vmatprep.subr.mxu1 %v7093_v7 }
 0x321   :  { %4947 = vmatprep.subr.mxu0 %v7093_v7 }
 0x323   :  { %4913 = vmatpush3.xpose.msk.msra.mxu1 %vm2373_vm4, %v6578_v61 }
 0x324   :  { %4948 = vmatpush3.xpose.msk.msra.mxu0 %vm2373_vm4, %v6725_v9  ;;  %4914 = vmatprep.subr.mxu1 %v7093_v7 }
 0x325   :  { %4949 = vmatprep.subr.mxu0 %v7093_v7 }
 0x327   :  { %4915 = vmatpush3.xpose.msk.msra.mxu1 %vm2373_vm4, %v6588_v57 }
 0x328   :  { %4950 = vmatpush3.xpose.msk.msra.mxu0 %vm2373_vm4, %v6733_v12  ;;  %4916 = vmatprep.subr.mxu1 %v7093_v7 }
 0x329   :  { %4951 = vmatprep.subr.mxu0 %v7093_v7 }
 0x32b   :  { %4917 = vmatpush3.xpose.msk.msra.mxu1 %vm2373_vm4, %v6598_v10 }
 0x32c   :  { %4952 = vmatpush3.xpose.msk.msra.mxu0 %vm2373_vm4, %v6741_v20  ;;  %4918 = vmatprep.subr.mxu1 %v7093_v7 }
 0x32d   :  { %4953 = vmatprep.subr.mxu0 %v7093_v7 }
 0x32f   :  { %4919 = vmatpush3.xpose.msk.msra.mxu1 %vm2373_vm4, %v6608_v11 }
 0x330   :  { %4954 = vmatpush3.xpose.msk.msra.mxu0 %vm2373_vm4, %v6749_v48  ;;  %4920 = vmatprep.subr.mxu1 %v7093_v7 }
 0x331   :  { %4955 = vmatprep.subr.mxu0 %v7093_v7 }
 0x333   :  { %4921 = vmatpush3.xpose.msk.msra.mxu1 %vm2373_vm4, %v6618_v0 }
 0x334   :  { %4956 = vmatpush3.xpose.msk.msra.mxu0 %vm2373_vm4, %v6757_v4  ;;  %4922 = vmatprep.subr.mxu1 %v7093_v7 }
 0x335   :  { %4957 = vmatprep.subr.mxu0 %v7093_v7 }
 0x337   :  { %4923 = vmatpush3.xpose.msk.msra.mxu1 %vm2373_vm4, %v6628_v56 }
 0x338   :  { %4958 = vmatpush3.xpose.msk.msra.mxu0 %vm2373_vm4, %v6765_v23  ;;  %4962 = vmatprep.subr.mxu1 %v7093_v7 }
 0x339   :  { %4997 = vmatprep.subr.mxu0 %v7093_v7 }
 0x33a   :  { %4925 = vmatmul.mubr.msk.f32.vlgmr.msra.gmra.mxu1 %vm2373_vm4, %v3190_v24 }
 0x33b   :  { %4960 = vmatmul.mubr.msk.f32.vlgmr.msra.gmra.mxu0 %vm2373_vm4, %v3329_v13  ;;  %4963 = vmatpush3.xpose.msk.msra.mxu1 %vm2373_vm4, %v3467_v17 }
 0x33c   :  { %4998 = vmatpush3.xpose.msk.msra.mxu0 %vm2373_vm4, %v3606_v44  ;;  %4964 = vmatprep.subr.mxu1 %v7093_v7 }
 0x33d   :  { %4999 = vmatprep.subr.mxu0 %v7093_v7  ;;  %4994 = vmatprep.mubr.msk.f32.mxu1 %vm5096_vm7, %v7093_v7 }
 0x33e   :  { %5029 = vmatprep.mubr.msk.f32.mxu0 %vm5096_vm7, %v7093_v7 }
 0x33f   :  { %4965 = vmatpush3.xpose.msk.msra.mxu1 %vm2373_vm4, %v6647_v27 }
 0x340   :  { %5000 = vmatpush3.xpose.msk.msra.mxu0 %vm2373_vm4, %v6780_v62  ;;  %4966 = vmatprep.subr.mxu1 %v7093_v7 }
 0x341   :  { %5001 = vmatprep.subr.mxu0 %v7093_v7 }
 0x343   :  { %4967 = vmatpush3.xpose.msk.msra.mxu1 %vm2373_vm4, %v6494_v6  ;;  %v3469_v6 = vpop.permute.xlu1 %3468 }
 0x344   :  { %5002 = vmatpush3.xpose.msk.msra.mxu0 %vm2373_vm4, %v6492_v3  ;;  %4968 = vmatprep.subr.mxu1 %v7093_v7  ;;  %v3598_v3 = vld [vmem:[#allocation3 + $0x91] sm:$0xff] }
 0x345   :  { %5003 = vmatprep.subr.mxu0 %v7093_v7 }
 0x347   :  { %4969 = vmatpush3.xpose.msk.msra.mxu1 %vm2373_vm4, %v6504_v50  ;;  %v3745_v50 = vld [vmem:[#allocation3 + $0x132] sm:$0xff]  ;;  %v3747_v53 = vpop.permute.xlu1 %3746 }
 0x348   :  { %5004 = vmatpush3.xpose.msk.msra.mxu0 %vm2373_vm4, %v6502_v37  ;;  %4970 = vmatprep.subr.mxu1 %v7093_v7  ;;  %v3608_v37 = vpop.permute.xlu0 %3607 }
 0x349   :  { %5005 = vmatprep.subr.mxu0 %v7093_v7 }
 0x34b   :  { %4971 = vmatpush3.xpose.msk.msra.mxu1 %vm2373_vm4, %v6514_v31 }
 0x34c   :  { %5006 = vmatpush3.xpose.msk.msra.mxu0 %vm2373_vm4, %v6512_v1  ;;  %4972 = vmatprep.subr.mxu1 %v7093_v7 }
 0x34d   :  { %5007 = vmatprep.subr.mxu0 %v7093_v7 }
 0x34f   :  { %4973 = vmatpush3.xpose.msk.msra.mxu1 %vm2373_vm4, %v6525_v59 }
 0x350   :  { %5008 = vmatpush3.xpose.msk.msra.mxu0 %vm2373_vm4, %v6523_v51  ;;  %4974 = vmatprep.subr.mxu1 %v7093_v7 }
 0x351   :  { %5009 = vmatprep.subr.mxu0 %v7093_v7 }
 0x353   :  { %4975 = vmatpush3.xpose.msk.msra.mxu1 %vm2373_vm4, %v6536_v54  ;;  %v5102_v54 = vmov 0  }
 0x354   :  { %5010 = vmatpush3.xpose.msk.msra.mxu0 %vm2373_vm4, %v6534_v5  ;;  %4976 = vmatprep.subr.mxu1 %v7093_v7 }
 0x355   :  { %5011 = vmatprep.subr.mxu0 %v7093_v7  ;;  %5083 = vset.pattern.permute.xlu0 %v5102_v54 }
 0x357   :  { %4977 = vmatpush3.xpose.msk.msra.mxu1 %vm2373_vm4, %v6546_v22  ;;  %v3737_v22 = vld [vmem:[#allocation3 + $0x92] sm:$0xff] }
 0x358   :  { %5012 = vmatpush3.xpose.msk.msra.mxu0 %vm2373_vm4, %v6544_v29  ;;  %4978 = vmatprep.subr.mxu1 %v7093_v7  ;;  %v6994_v29 = vld [vmem:[%s7050_s4] sm:$0xff] }
 0x359   :  { %5013 = vmatprep.subr.mxu0 %v7093_v7  ;;  %3872 = vperm.xlu0 %5083, %v6994_v29  }
 0x35b   :  { %4979 = vmatpush3.xpose.msk.msra.mxu1 %vm2373_vm4, %v3459_v30 }
 0x35c   :  { %5014 = vmatpush3.xpose.msk.msra.mxu0 %vm2373_vm4, %v3598_v3  ;;  %4980 = vmatprep.subr.mxu1 %v7093_v7 }
 0x35d   :  { %5015 = vmatprep.subr.mxu0 %v7093_v7 }
 0x35f   :  { %4981 = vmatpush3.xpose.msk.msra.mxu1 %vm2373_vm4, %v6717_v35 }
 0x360   :  { %5016 = vmatpush3.xpose.msk.msra.mxu0 %vm2373_vm4, %v6836_v52  ;;  %4982 = vmatprep.subr.mxu1 %v7093_v7 }
 0x361   :  { %5017 = vmatprep.subr.mxu0 %v7093_v7 }
 0x363   :  { %4983 = vmatpush3.xpose.msk.msra.mxu1 %vm2373_vm4, %v6570_v16 }
 0x364   :  { %5018 = vmatpush3.xpose.msk.msra.mxu0 %vm2373_vm4, %v6568_v18  ;;  %4984 = vmatprep.subr.mxu1 %v7093_v7 }
 0x365   :  { %5019 = vmatprep.subr.mxu0 %v7093_v7 }
 0x367   :  { %4985 = vmatpush3.xpose.msk.msra.mxu1 %vm2373_vm4, %v6580_v26 }
 0x368   :  { %5020 = vmatpush3.xpose.msk.msra.mxu0 %vm2373_vm4, %v6578_v61  ;;  %4986 = vmatprep.subr.mxu1 %v7093_v7 }
 0x369   :  { %5021 = vmatprep.subr.mxu0 %v7093_v7 }
 0x36b   :  { %4987 = vmatpush3.xpose.msk.msra.mxu1 %vm2373_vm4, %v6590_v21 }
 0x36c   :  { %5022 = vmatpush3.xpose.msk.msra.mxu0 %vm2373_vm4, %v6588_v57  ;;  %4988 = vmatprep.subr.mxu1 %v7093_v7 }
 0x36d   :  { %5023 = vmatprep.subr.mxu0 %v7093_v7 }
 0x36f   :  { %4989 = vmatpush3.xpose.msk.msra.mxu1 %vm2373_vm4, %v6600_v19 }
 0x370   :  { %5024 = vmatpush3.xpose.msk.msra.mxu0 %vm2373_vm4, %v6598_v10  ;;  %4990 = vmatprep.subr.mxu1 %v7093_v7 }
 0x371   :  { %5025 = vmatprep.subr.mxu0 %v7093_v7 }
 0x373   :  { %4991 = vmatpush3.xpose.msk.msra.mxu1 %vm2373_vm4, %v6610_v14 }
 0x374   :  { %5026 = vmatpush3.xpose.msk.msra.mxu0 %vm2373_vm4, %v6608_v11  ;;  %4992 = vmatprep.subr.mxu1 %v7093_v7 }
 0x375   :  { %5027 = vmatprep.subr.mxu0 %v7093_v7 }
 0x377   :  { %4993 = vmatpush3.xpose.msk.msra.mxu1 %vm2373_vm4, %v6620_v39 }
 0x378   :  { %5028 = vmatpush3.xpose.msk.msra.mxu0 %vm2373_vm4, %v6618_v0  ;;  %5032 = vmatprep.subr.mxu1 %v7093_v7 }
 0x37a   :  { %v2771_v1 = vpop.f32.mrf.mxu1  ;;  %4995 = vmatmul.mubr.msk.f32.vlgmr.msra.gmra.mxu1 %vm2373_vm4, %v3469_v6 }
 0x37b   :  { %v2891_v31 = vpop.f32.mrf.mxu0  ;;  %5030 = vmatmul.mubr.msk.f32.vlgmr.msra.gmra.mxu0 %vm2373_vm4, %v3608_v37  ;;  %5033 = vmatpush3.xpose.msk.msra.mxu1 %vm2373_vm4, %v3745_v50 }
 0x37c   :  { %v2892_v51 = vadd.f32 %v2891_v31, %v2771_v1  ;;  %5064 = vmatprep.mubr.msk.f32.mxu1 %vm5096_vm7, %v7093_v7  ;;  %v4786_v59 = vpop.f32.mrf.mxu1  ;;  %5034 = vmatprep.subr.mxu1 %v7093_v7 }
 0x37d   :  { %v4821_v5 = vpop.f32.mrf.mxu0 }
 0x37f   :  { %5035 = vmatpush3.xpose.msk.msra.mxu1 %vm2373_vm4, %v6782_v2 }
 0x380   :  { %5036 = vmatprep.subr.mxu1 %v7093_v7 }
 0x383   :  { %5037 = vmatpush3.xpose.msk.msra.mxu1 %vm2373_vm4, %v6645_v49 }
 0x384   :  { %5038 = vmatprep.subr.mxu1 %v7093_v7 }
 0x387   :  { %5039 = vmatpush3.xpose.msk.msra.mxu1 %vm2373_vm4, %v6659_v25  ;;  %v5103_v25 = vmov 1  }
 0x388   :  { %5040 = vmatprep.subr.mxu1 %v7093_v7  ;;  %5084 = vset.pattern.permute.xlu1 %v5103_v25 }
 0x38b   :  { %5041 = vmatpush3.xpose.msk.msra.mxu1 %vm2373_vm4, %v6667_v63  ;;  %v5104_v63 = vmov 2  }
 0x38c   :  { %5042 = vmatprep.subr.mxu1 %v7093_v7  ;;  %5085 = vset.pattern.permute.xlu0 %v5104_v63 }
 0x38f   :  { %5043 = vmatpush3.xpose.msk.msra.mxu1 %vm2373_vm4, %v6678_v60 }
 0x390   :  { %5044 = vmatprep.subr.mxu1 %v7093_v7 }
 0x393   :  { %5045 = vmatpush3.xpose.msk.msra.mxu1 %vm2373_vm4, %v6686_v28 }
 0x394   :  { %5046 = vmatprep.subr.mxu1 %v7093_v7 }
 0x397   :  { %5047 = vmatpush3.xpose.msk.msra.mxu1 %vm2373_vm4, %v6694_v41 }
 0x398   :  { %5048 = vmatprep.subr.mxu1 %v7093_v7 }
 0x39b   :  { %5049 = vmatpush3.xpose.msk.msra.mxu1 %vm2373_vm4, %v3737_v22 }
 0x39c   :  { %5050 = vmatprep.subr.mxu1 %v7093_v7 }
 0x39f   :  { %5051 = vmatpush3.xpose.msk.msra.mxu1 %vm2373_vm4, %v6838_v47 }
 0x3a0   :  { %5052 = vmatprep.subr.mxu1 %v7093_v7 }
 0x3a3   :  { %5053 = vmatpush3.xpose.msk.msra.mxu1 %vm2373_vm4, %v6715_v43 }
 0x3a4   :  { %5054 = vmatprep.subr.mxu1 %v7093_v7 }
 0x3a7   :  { %5055 = vmatpush3.xpose.msk.msra.mxu1 %vm2373_vm4, %v6725_v9 }
 0x3a8   :  { %5056 = vmatprep.subr.mxu1 %v7093_v7 }
 0x3ab   :  { %5057 = vmatpush3.xpose.msk.msra.mxu1 %vm2373_vm4, %v6733_v12 }
 0x3ac   :  { %5058 = vmatprep.subr.mxu1 %v7093_v7 }
 0x3af   :  { %5059 = vmatpush3.xpose.msk.msra.mxu1 %vm2373_vm4, %v6741_v20 }
 0x3b0   :  { %5060 = vmatprep.subr.mxu1 %v7093_v7 }
 0x3b3   :  { %5061 = vmatpush3.xpose.msk.msra.mxu1 %vm2373_vm4, %v6749_v48 }
 0x3b4   :  { %5062 = vmatprep.subr.mxu1 %v7093_v7 }
 0x3b7   :  { %5063 = vmatpush3.xpose.msk.msra.mxu1 %vm2373_vm4, %v6757_v4 }
 0x3ba   :  { %v3029_v46 = vpop.f32.mrf.mxu1  ;;  %5065 = vmatmul.mubr.msk.f32.vlgmr.msra.gmra.mxu1 %vm2373_vm4, %v3747_v53 }
 0x3bb   :  { %v3168_v45 = vpop.f32.mrf.mxu0  ;;  %v3033_v55 = vadd.f32 %v3029_v46, %v2892_v51 }
 0x3bc   :  { %v4856_v18 = vpop.f32.mrf.mxu1 }
 0x3bd   :  { %v4891_v16 = vpop.f32.mrf.mxu0  ;;  %v3172_v61 = vadd.f32 %v3168_v45, %v3033_v55 }
 0x3d4   :  { %v3873_v33 = vpop.permute.xlu0 %3872 }
 0x3fa   :  { %v3307_v26 = vpop.f32.mrf.mxu1 }
 0x3fb   :  { %v3446_v57 = vpop.f32.mrf.mxu0  ;;  %v3311_v21 = vadd.f32 %v3307_v26, %v3172_v61 }
 0x3fc   :  { %v4926_v10 = vpop.f32.mrf.mxu1 }
 0x3fd   :  { %v4961_v19 = vpop.f32.mrf.mxu0  ;;  %v3450_v11 = vadd.f32 %v3446_v57, %v3311_v21 }
 0x43a   :  { %v3586_v14 = vpop.f32.mrf.mxu1 }
 0x43b   :  { %v3725_v7 = vpop.f32.mrf.mxu0  ;;  %v3590_v56 = vadd.f32 %v3586_v14, %v3450_v11 }
 0x43c   :  { %v4996_v0 = vpop.f32.mrf.mxu1 }
 0x43d   :  { %v5031_v39 = vpop.f32.mrf.mxu0  ;;  %v3729_v58 = vadd.f32 %v3725_v7, %v3590_v56 }
 0x47a   :  { %v3864_v38 = vpop.f32.mrf.mxu1 }
 0x47b   :  { %v3868_v42 = vadd.f32 %v3864_v38, %v3729_v58 }
 0x47c   :  { %v5066_v49 = vpop.f32.mrf.mxu1 }
 0x47d   :  { %v3875_v27 = vadd.f32 %v3873_v33, %v3868_v42 }
 0x47f   :  { %3876 = vadd.xlane.f32.xlu1 %v3875_v27 }
 0x490   :  { %3888 = vperm.xlu1 %5084, %v6994_v29  }
 0x508   :  { %v3877_v15 = vpop.xlane.xlu1 %3876 }
 0x509   :  { %v3878_v60 = vmul.f32 0.0078125, %v3877_v15 }
 0x50b   :  { %v3879_v28 = vsub.f32 %v3875_v27, %v3878_v60 }
 0x50c   :  { %v3889_v9 = vpop.permute.xlu1 %3888 }
 0x50d   :  { %v3880_v41 = vmul.f32 %v3879_v28, %v3879_v28 }
 0x50f   :  { %3881 = vadd.xlane.f32.xlu0 %v3880_v41 }
 0x525   :  { %3893 = vperm.xlu0 %5085, %v6994_v29  }
 0x598   :  { %v3882_v36 = vpop.xlane.xlu0 %3881 }
 0x599   :  { %v3883_v40 = vmul.f32 0.0078125, %v3882_v36 }
 0x59b   :  { %v3884_v43 = vadd.f32 1e-05, %v3883_v40 }
 0x59d   :  { %5088 = vrsqrt.f32 %v3884_v43 }
 0x5a0   :  { %v3894_v20 = vpop.permute.xlu0 %3893 }
 0x5aa   :  { %v5089_v35 = vpop.eup %5088 }
 0x5ab   :  { %v3886_v12 = vmul.f32 %v5089_v35, %v3879_v28 }
 0x5ad   :  { %v3891_v48 = vmul.f32 %v3889_v9, %v3886_v12 }
 0x5af   :  { %v3896_v4 = vadd.f32 %v3894_v20, %v3891_v48 }
 0x5b1   :  { %v3897_v23 = vmax.f32 %v3896_v4, 0.0 }
 0x5b3   :  { %3898 = vst [vmem:[%s7051_s5] sm:$0xff] %v3897_v23 }

</bundles_post_ra>
